<compile_context>
chip_gen: v5e
topology: v5e:2x2
jax: 0.10.0
libtpu: 0.0.40
codegen_flags: <defaults>
</compile_context>

<pallas_src>
import functools

import jax
import jax.numpy as jnp
from jax.experimental import pallas as pl
from jax.experimental.pallas import tpu as pltpu

EMBED_D = 32               # args.embed_d
HID = EMBED_D // 2         # per-direction hidden size of the bidirectional LSTMs
GATE_W = 8 * HID           # packed gate width: 4 gates x 2 directions x HID = 128
LEAKY_SLOPE = 0.01         # nn.LeakyReLU default negative_slope
TILE_B = 128               # batch rows per grid step (multiple of 16)
MXU_DTYPE = jnp.bfloat16   # matmul-input dtype (f32 accumulate); float32 for parity
APPROX_SOFTMAX_RECIP = True  # False for exact softmax divide (PyTorch parity)


def _round_up(x, m):
    return ((x + m - 1) // m) * m


def _const_index_map(ndim):
    return lambda i: (0,) * ndim


# ------------------------------------------------------------------
# Fused per-role-group kernel factory.  One grid step computes, in VMEM:
#   agg_fc -> content bi-LSTM for the central tile and every neighbor tile,
#   fused-direction neigh bi-LSTM + mean over top_k, heterogeneous-type
#   attention -> (tile_b, D) output tile.
# ------------------------------------------------------------------
def make_group_kernel(node_types, central_type, top_k_by_type, tile_b):
    H, D, G = HID, EMBED_D, GATE_W

    def content_bilstm_step(x_f32, wih, b):
        # Single-timestep bidirectional LSTM, h0 = c0 = 0.
        # Packed gate columns: [i | f | g | o], each 2H wide as [fwd | bwd].
        gates = jnp.dot(x_f32.astype(wih.dtype), wih,
                        preferred_element_type=jnp.float32) + b          # (M, 8H)
        sig = jax.nn.sigmoid(gates)                                      # 1 full-width EUP pass
        th = jnp.tanh(gates)                                             # 1 full-width EUP pass
        c1 = sig[:, 0:2 * H] * th[:, 4 * H:6 * H]                        # i*g  (f*c0 == 0 exactly)
        return sig[:, 6 * H:8 * H] * jnp.tanh(c1)                        # o*tanh(c) -> (M, D)

    def kernel(*refs):
        it = iter(refs)
        cen_ref = next(it)
        nb_refs = {nt: next(it) for nt in node_types}
        p = {}
        for nt in node_types:
            p[nt] = {k: next(it) for k in
                     ("agg_w", "agg_b", "cont_wih", "cont_b",
                      "neigh_wih", "neigh_whh", "neigh_b")}
        att_c = next(it)[...]
        att_e = next(it)[...]
        out_ref = next(it)

        # Static lane mask: inside each 2H gate block, lanes [0:H] are the
        # forward direction, lanes [H:2H] the backward direction.
        lane = jax.lax.broadcasted_iota(jnp.int32, (1, G), 1)
        fwd_mask = (lane % (2 * H)) < H

        # ---- central node: agg_fc + content bi-LSTM --------------------------
        pc = p[central_type]
        c_emb = jnp.dot(cen_ref[...], pc["agg_w"][...],
                        preferred_element_type=jnp.float32) + pc["agg_b"][...]
        c_agg = content_bilstm_step(c_emb, pc["cont_wih"][...], pc["cont_b"][...])

        # ---- per-neighbor-type aggregation ------------------------------------
        agg = []
        for nt in node_types:
            T = top_k_by_type[nt]
            pp = p[nt]
            agg_w = pp["agg_w"][...]
            agg_b = pp["agg_b"][...]
            cont_wih = pp["cont_wih"][...]
            cont_b = pp["cont_b"][...]
            neigh_wih = pp["neigh_wih"][...]
            whh = pp["neigh_whh"][...]        # (2H, 8H) fused block-structured W_hh
            nb_b = pp["neigh_b"][...]         # (1, 8H)

            # Hoisted (non-recurrent) work per timestep: agg_fc + content LSTM
            # + neigh-LSTM input projection. Independent MXU ops, pipelined.
            xp = []
            for t in range(T):
                feat_t = nb_refs[nt][t]                                   # (tile_b, F)
                emb_t = jnp.dot(feat_t, agg_w,
                                preferred_element_type=jnp.float32) + agg_b
                cont_t = content_bilstm_step(emb_t, cont_wih, cont_b)     # (tile_b, D)
                xp.append(jnp.dot(cont_t.astype(neigh_wih.dtype), neigh_wih,
                                  preferred_element_type=jnp.float32))   # (tile_b, 8H)

            # Fused bidirectional recurrence: h = [h_fwd | h_bwd] (tile_b, 2H).
            # ONE (tile_b,2H)@(2H,8H) MXU op per timestep; the backward
            # direction consumes the time-reversed projection via the lane mask.
            h = jnp.zeros((tile_b, 2 * H), jnp.float32)
            c = jnp.zeros((tile_b, 2 * H), jnp.float32)
            acc = jnp.zeros((tile_b, 2 * H), jnp.float32)
            for t in range(T):                                            # statically unrolled
                x_t = jnp.where(fwd_mask, xp[t], xp[T - 1 - t])
                g_pre = x_t + jnp.dot(h.astype(whh.dtype), whh,
                                      preferred_element_type=jnp.float32) + nb_b
                sig = jax.nn.sigmoid(g_pre)                               # full-width
                th = jnp.tanh(g_pre)                                      # full-width
                c = sig[:, 2 * H:4 * H] * c + sig[:, 0:2 * H] * th[:, 4 * H:6 * H]
                h = sig[:, 6 * H:8 * H] * jnp.tanh(c)
                acc = acc + h
            agg.append(acc * (1.0 / float(T)))     # mean over top_k timesteps (both dirs)

        # ---- heterogeneous-type attention (f32, VPU mults + lane reduce) ------
        s_c = jnp.sum(c_agg * att_c, axis=-1, keepdims=True)             # (tile_b, 1)
        embeds = [c_agg] + agg
        scores = []
        for e in embeds:
            s = s_c + jnp.sum(e * att_e, axis=-1, keepdims=True)
            scores.append(jnp.where(s > 0, s, LEAKY_SLOPE * s))          # LeakyReLU
        m = scores[0]
        for s in scores[1:]:
            m = jnp.maximum(m, s)
        exps = [jnp.exp(s - m) for s in scores]
        denom = exps[0]
        for e2 in exps[1:]:
            denom = denom + e2
        inv = pl.reciprocal(denom, approx=APPROX_SOFTMAX_RECIP)
        out = jnp.zeros((tile_b, D), jnp.float32)
        for w, e in zip(exps, embeds):
            out = out + (w * inv) * e
        # TODO(synk): output lane width is 32 (<128) -> masked stores; pack several
        # role-group outputs along lanes if this store ever dominates.
        out_ref[...] = out

    return kernel


# ------------------------------------------------------------------
# Wrapper: gathers (XLA) + ONE batch-tiled pallas_call per role-group.
# ------------------------------------------------------------------
@functools.partial(jax.jit, static_argnames=("node_type", "node_types", "top_k_t"))
def node_het_agg_batch(id_batch, *, node_type, params, features, neigh_lists,
                       node_types, top_k_t):
    n = id_batch.shape[0]
    tile_b = min(TILE_B, _round_up(n, 16))     # multiple of 16 (bf16 sublane packing)
    n_pad = _round_up(n, tile_b)
    if n_pad != n:
        id_pad = jnp.concatenate([id_batch, jnp.zeros((n_pad - n,), id_batch.dtype)])
    else:
        id_pad = id_batch
    top_k_by_type = dict(zip(node_types, top_k_t))

    inputs, in_specs = [], []

    cen_feat = features[node_type][id_pad].astype(MXU_DTYPE)            # (n_pad, F_c)
    inputs.append(cen_feat)
    in_specs.append(pl.BlockSpec((tile_b, cen_feat.shape[1]), lambda i: (i, 0)))

    # TODO(synk): move these gathers in-kernel (scalar-prefetched neighbor ids +
    # manual DMA row gather) to avoid materializing (top_k, n, F) in HBM.
    for nt in node_types:
        T = top_k_by_type[nt]
        nb_ids = neigh_lists[node_type][nt][id_pad]                      # (n_pad, T)
        nb_feat = features[nt][nb_ids.T].astype(MXU_DTYPE)               # (T, n_pad, F) timestep-major
        inputs.append(nb_feat)
        in_specs.append(
            pl.BlockSpec((T, tile_b, nb_feat.shape[2]), lambda i: (0, i, 0)))

    for nt in node_types:
        pp = params[nt]
        packed = {
            "agg_w": pp["agg_w"].astype(MXU_DTYPE),
            "agg_b": pp["agg_b"],
            "cont_wih": pp["cont_wih"].astype(MXU_DTYPE),
            "cont_b": pp["cont_b"],
            "neigh_wih": pp["neigh_wih"].astype(MXU_DTYPE),
            "neigh_whh": pp["neigh_whh"].astype(MXU_DTYPE),
            "neigh_b": pp["neigh_b"],
        }
        for name in ("agg_w", "agg_b", "cont_wih", "cont_b",
                     "neigh_wih", "neigh_whh", "neigh_b"):
            w = packed[name]
            inputs.append(w)
            in_specs.append(pl.BlockSpec(w.shape, _const_index_map(w.ndim)))

    for name in ("att_c", "att_e"):
        w = params[node_type][name]
        inputs.append(w)
        in_specs.append(pl.BlockSpec(w.shape, _const_index_map(w.ndim)))

    kernel = make_group_kernel(node_types, node_type, top_k_by_type, tile_b)
    out = pl.pallas_call(
        kernel,
        grid=(n_pad // tile_b,),
        in_specs=in_specs,
        out_specs=pl.BlockSpec((tile_b, EMBED_D), lambda i: (i, 0)),
        out_shape=jax.ShapeDtypeStruct((n_pad, EMBED_D), jnp.float32),
        compiler_params=pltpu.CompilerParams(
            dimension_semantics=("parallel",)),   # per-tile buffers are small; default VMEM limit is plenty
    )(*inputs)
    return out[:n]


def het_agg_forward(triple_list_batch, triple_pair, params, features,
                    neigh_lists, top_k, node_types):
    c_ids = jnp.asarray([x[0] for x in triple_list_batch], jnp.int32)
    p_ids = jnp.asarray([x[1] for x in triple_list_batch], jnp.int32)
    n_ids = jnp.asarray([x[2] for x in triple_list_batch], jnp.int32)
    b = c_ids.shape[0]
    node_types = tuple(node_types)
    top_k_t = tuple(int(top_k[nt]) for nt in node_types)

    c_out = node_het_agg_batch(
        c_ids, node_type=triple_pair[0], params=params, features=features,
        neigh_lists=neigh_lists, node_types=node_types, top_k_t=top_k_t)
    # pos and neg share node type + parameters -> one fused call on a 2B batch.
    # TODO(synk): central and pos/neg groups could share one pallas_call via a
    # leading role grid axis when their node types / feature dims coincide.
    pn_out = node_het_agg_batch(
        jnp.concatenate([p_ids, n_ids]), node_type=triple_pair[1], params=params,
        features=features, neigh_lists=neigh_lists, node_types=node_types,
        top_k_t=top_k_t)
    return c_out, pn_out[:b], pn_out[b:2 * b]


# ------------------------------------------------------------------
# Parameter init (packed layouts, random values — stand-in for PyTorch weights).
# ------------------------------------------------------------------
def _fuse_bidir_whh(whh_fwd, whh_bwd):
    # whh_fwd/whh_bwd: (H, 4H) per-direction hidden->gate weights, gate-major
    # columns [i|f|g|o].  Returns the fused (2H, 8H) block-structured matrix so
    # that concat([h_fwd, h_bwd]) @ fused produces both directions' gates in the
    # packed column layout [i_f,i_b | f_f,f_b | g_f,g_b | o_f,o_b].
    H = HID
    fused = jnp.zeros((2 * H, 8 * H), jnp.float32)
    for k in range(4):
        fused = fused.at[0:H, k * 2 * H:k * 2 * H + H].set(whh_fwd[:, k * H:(k + 1) * H])
        fused = fused.at[H:2 * H, k * 2 * H + H:(k + 1) * 2 * H].set(whh_bwd[:, k * H:(k + 1) * H])
    return fused


def init_params(key, node_types, feat_dims):
    # To port real PyTorch weights:
    #   agg_w = nn.Linear.weight.T, agg_b = bias
    #   *_wih / biases: gate-major columns [i|f|g|o], each gate [fwd|bwd] of
    #     width HID; column block (gate k, dir d) = weight_ih_l0{_reverse}[kH:(k+1)H,:].T
    #     bias = b_ih + b_hh rearranged the same way.
    #   neigh_whh built from per-direction weight_hh via _fuse_bidir_whh.
    params = {}
    s = 0.1
    for t in node_types:
        keys = jax.random.split(jax.random.fold_in(key, t), 9)
        whh_fwd = (jax.random.normal(keys[4], (HID, 4 * HID)) * s).astype(jnp.float32)
        whh_bwd = (jax.random.normal(keys[5], (HID, 4 * HID)) * s).astype(jnp.float32)
        params[t] = {
            "agg_w": (jax.random.normal(keys[0], (feat_dims[t], EMBED_D)) * s).astype(jnp.float32),
            "agg_b": jnp.full((1, EMBED_D), 0.1, jnp.float32),
            "cont_wih": (jax.random.normal(keys[1], (EMBED_D, GATE_W)) * s).astype(jnp.float32),
            "cont_b": (jax.random.normal(keys[2], (1, GATE_W)) * s).astype(jnp.float32),
            "neigh_wih": (jax.random.normal(keys[3], (EMBED_D, GATE_W)) * s).astype(jnp.float32),
            "neigh_whh": _fuse_bidir_whh(whh_fwd, whh_bwd),
            "neigh_b": (jax.random.normal(keys[6], (1, GATE_W)) * s).astype(jnp.float32),
            "att_c": (jax.random.normal(keys[7], (1, EMBED_D)) * s).astype(jnp.float32),
            "att_e": (jax.random.normal(keys[8], (1, EMBED_D)) * s).astype(jnp.float32),
        }
    return params


if __name__ == "__main__":
    key = jax.random.PRNGKey(0)
    node_types = (0, 1)                 # dl.nodes['attr'].keys()
    counts = {0: 20, 1: 16}             # dl.nodes['count']
    feat_dims = {0: 48, 1: 40}          # feature_list[t].shape[1]
    top_k = {0: 4, 1: 3}                # input_data.top_k
    batch = 3                           # len(triple_list_batch)

    k_param, k_feat, k_neigh = jax.random.split(key, 3)
    params = init_params(k_param, node_types, feat_dims)

    features = {
        t: jax.random.normal(jax.random.fold_in(k_feat, t), (counts[t], feat_dims[t]), jnp.float32)
        for t in node_types
    }

    # neigh_list_train[node_type][n_type][node_id] -> top_k[n_type] neighbor ids
    neigh_lists = {}
    for t in node_types:
        neigh_lists[t] = {}
        for nt in node_types:
            kk = jax.random.fold_in(k_neigh, t * 10 + nt)
            neigh_lists[t][nt] = jax.random.randint(kk, (counts[t], top_k[nt]), 0, counts[nt])

    triple_pair = (0, 1)                            # central type 0, pos/neg type 1
    triple_list_batch = [(1, 2, 5), (4, 0, 7), (9, 3, 11)]

    c_out, p_out, n_out = het_agg_forward(
        triple_list_batch, triple_pair, params, features, neigh_lists, top_k, node_types
    )
    jax.block_until_ready((c_out, p_out, n_out))
    assert c_out.shape == (batch, EMBED_D)
    assert p_out.shape == (batch, EMBED_D)
    assert n_out.shape == (batch, EMBED_D)
    assert bool(jnp.all(jnp.isfinite(c_out)))
    assert bool(jnp.all(jnp.isfinite(p_out)))
    assert bool(jnp.all(jnp.isfinite(n_out)))
    print("KERNEL_OK")
</pallas_src>

<mosaic_0001>
module attributes {stable_mosaic.version = 11 : i64} {
  func.func @kernel(%arg0: i32, %arg1: memref<16x48xbf16, #tpu.memory_space<vmem>>, %arg2: memref<4x16x48xbf16, #tpu.memory_space<vmem>>, %arg3: memref<3x16x40xbf16, #tpu.memory_space<vmem>>, %arg4: memref<48x32xbf16, #tpu.memory_space<vmem>>, %arg5: memref<1x32xf32, #tpu.memory_space<vmem>>, %arg6: memref<32x128xbf16, #tpu.memory_space<vmem>>, %arg7: memref<1x128xf32, #tpu.memory_space<vmem>>, %arg8: memref<32x128xbf16, #tpu.memory_space<vmem>>, %arg9: memref<32x128xbf16, #tpu.memory_space<vmem>>, %arg10: memref<1x128xf32, #tpu.memory_space<vmem>>, %arg11: memref<40x32xbf16, #tpu.memory_space<vmem>>, %arg12: memref<1x32xf32, #tpu.memory_space<vmem>>, %arg13: memref<32x128xbf16, #tpu.memory_space<vmem>>, %arg14: memref<1x128xf32, #tpu.memory_space<vmem>>, %arg15: memref<32x128xbf16, #tpu.memory_space<vmem>>, %arg16: memref<32x128xbf16, #tpu.memory_space<vmem>>, %arg17: memref<1x128xf32, #tpu.memory_space<vmem>>, %arg18: memref<1x32xf32, #tpu.memory_space<vmem>>, %arg19: memref<1x32xf32, #tpu.memory_space<vmem>>, %arg20: memref<16x32xf32, #tpu.memory_space<vmem>>) attributes {dimension_semantics = [#tpu.dimension_semantics<parallel>], iteration_bounds = array<i64: 1>, scalar_prefetch = 0 : i64, scratch_operands = 0 : i64, tpu.core_type = #tpu.core_type<tc>, window_params = [{transform_indices = @transform_0, window_bounds = array<i64: 16, 48>}, {transform_indices = @transform_1, window_bounds = array<i64: 4, 16, 48>}, {transform_indices = @transform_2, window_bounds = array<i64: 3, 16, 40>}, {pipeline_mode = #tpu.pipeline_mode<synchronous>, transform_indices = @transform_3, window_bounds = array<i64: 48, 32>}, {pipeline_mode = #tpu.pipeline_mode<synchronous>, transform_indices = @transform_4, window_bounds = array<i64: 1, 32>}, {pipeline_mode = #tpu.pipeline_mode<synchronous>, transform_indices = @transform_5, window_bounds = array<i64: 32, 128>}, {pipeline_mode = #tpu.pipeline_mode<synchronous>, transform_indices = @transform_6, window_bounds = array<i64: 1, 128>}, {pipeline_mode = #tpu.pipeline_mode<synchronous>, transform_indices = @transform_7, window_bounds = array<i64: 32, 128>}, {pipeline_mode = #tpu.pipeline_mode<synchronous>, transform_indices = @transform_8, window_bounds = array<i64: 32, 128>}, {pipeline_mode = #tpu.pipeline_mode<synchronous>, transform_indices = @transform_9, window_bounds = array<i64: 1, 128>}, {pipeline_mode = #tpu.pipeline_mode<synchronous>, transform_indices = @transform_10, window_bounds = array<i64: 40, 32>}, {pipeline_mode = #tpu.pipeline_mode<synchronous>, transform_indices = @transform_11, window_bounds = array<i64: 1, 32>}, {pipeline_mode = #tpu.pipeline_mode<synchronous>, transform_indices = @transform_12, window_bounds = array<i64: 32, 128>}, {pipeline_mode = #tpu.pipeline_mode<synchronous>, transform_indices = @transform_13, window_bounds = array<i64: 1, 128>}, {pipeline_mode = #tpu.pipeline_mode<synchronous>, transform_indices = @transform_14, window_bounds = array<i64: 32, 128>}, {pipeline_mode = #tpu.pipeline_mode<synchronous>, transform_indices = @transform_15, window_bounds = array<i64: 32, 128>}, {pipeline_mode = #tpu.pipeline_mode<synchronous>, transform_indices = @transform_16, window_bounds = array<i64: 1, 128>}, {pipeline_mode = #tpu.pipeline_mode<synchronous>, transform_indices = @transform_17, window_bounds = array<i64: 1, 32>}, {pipeline_mode = #tpu.pipeline_mode<synchronous>, transform_indices = @transform_18, window_bounds = array<i64: 1, 32>}, {transform_indices = @transform_19, window_bounds = array<i64: 16, 32>}]} {
    %c0 = arith.constant 0 : index
    %c0_0 = arith.constant 0 : index
    %0 = vector.load %arg18[%c0, %c0_0] : memref<1x32xf32, #tpu.memory_space<vmem>>, vector<1x32xf32>
    %c0_1 = arith.constant 0 : index
    %c0_2 = arith.constant 0 : index
    %1 = vector.load %arg19[%c0_1, %c0_2] : memref<1x32xf32, #tpu.memory_space<vmem>>, vector<1x32xf32>
    %2 = tpu.iota {dimensions = array<i32: 1>} : vector<1x128xi32>
    %c32_i32 = arith.constant 32 : i32
    %c0_i32 = arith.constant 0 : i32
    %3 = arith.cmpi eq, %c32_i32, %c0_i32 : i32
    %c1_i32 = arith.constant 1 : i32
    %4 = arith.select %3, %c1_i32, %c32_i32 : i32
    %5 = vector.broadcast %4 : i32 to vector<1x128xi32>
    %6 = arith.remsi %2, %5 : vector<1x128xi32>
    %c0_i32_3 = arith.constant 0 : i32
    %7 = vector.broadcast %c0_i32_3 : i32 to vector<1x128xi32>
    %8 = arith.cmpi ne, %6, %7 : vector<1x128xi32>
    %c0_i32_4 = arith.constant 0 : i32
    %9 = vector.broadcast %c0_i32_4 : i32 to vector<1x128xi32>
    %10 = arith.cmpi slt, %6, %9 : vector<1x128xi32>
    %c0_i32_5 = arith.constant 0 : i32
    %11 = arith.cmpi slt, %4, %c0_i32_5 : i32
    %12 = vector.broadcast %11 : i1 to vector<1x128xi1>
    %13 = vector.broadcast %12 : vector<1x128xi1> to vector<1x128xi1>
    %14 = arith.xori %10, %13 : vector<1x128xi1>
    %15 = arith.andi %14, %8 : vector<1x128xi1>
    %16 = vector.broadcast %4 : i32 to vector<1x128xi32>
    %17 = arith.addi %6, %16 : vector<1x128xi32>
    %18 = arith.select %15, %17, %6 : vector<1x128xi1>, vector<1x128xi32>
    %c16_i32 = arith.constant 16 : i32
    %19 = vector.broadcast %c16_i32 : i32 to vector<1x128xi32>
    %20 = arith.cmpi slt, %18, %19 : vector<1x128xi32>
    %c0_6 = arith.constant 0 : index
    %c0_7 = arith.constant 0 : index
    %21 = vector.load %arg1[%c0_6, %c0_7] : memref<16x48xbf16, #tpu.memory_space<vmem>>, vector<16x48xbf16>
    %c0_8 = arith.constant 0 : index
    %c0_9 = arith.constant 0 : index
    %22 = vector.load %arg4[%c0_8, %c0_9] : memref<48x32xbf16, #tpu.memory_space<vmem>>, vector<48x32xbf16>
    %cst = arith.constant dense<0.000000e+00> : vector<16x32xf32>
    %23 = tpu.matmul %21, %22, %cst {dimension_numbers = #tpu.dot_dimension_numbers<[1], [0], [0], [1], [0, 0, 1, 1], [], []>} : vector<16x48xbf16>, vector<48x32xbf16>, vector<16x32xf32> -> vector<16x32xf32>
    %c0_10 = arith.constant 0 : index
    %c0_11 = arith.constant 0 : index
    %24 = vector.load %arg5[%c0_10, %c0_11] : memref<1x32xf32, #tpu.memory_space<vmem>>, vector<1x32xf32>
    %25 = vector.broadcast %24 : vector<1x32xf32> to vector<16x32xf32>
    %26 = arith.addf %23, %25 : vector<16x32xf32>
    %c0_12 = arith.constant 0 : index
    %c0_13 = arith.constant 0 : index
    %27 = vector.load %arg6[%c0_12, %c0_13] : memref<32x128xbf16, #tpu.memory_space<vmem>>, vector<32x128xbf16>
    %c0_14 = arith.constant 0 : index
    %c0_15 = arith.constant 0 : index
    %28 = vector.load %arg7[%c0_14, %c0_15] : memref<1x128xf32, #tpu.memory_space<vmem>>, vector<1x128xf32>
    %29 = arith.truncf %26 : vector<16x32xf32> to vector<16x32xbf16>
    %cst_16 = arith.constant dense<0.000000e+00> : vector<16x128xf32>
    %30 = tpu.matmul %29, %27, %cst_16 {dimension_numbers = #tpu.dot_dimension_numbers<[1], [0], [0], [1], [0, 0, 1, 1], [], []>} : vector<16x32xbf16>, vector<32x128xbf16>, vector<16x128xf32> -> vector<16x128xf32>
    %31 = vector.broadcast %28 : vector<1x128xf32> to vector<16x128xf32>
    %32 = arith.addf %30, %31 : vector<16x128xf32>
    %33 = arith.negf %32 : vector<16x128xf32>
    %34 = math.exp %33 : vector<16x128xf32>
    %cst_17 = arith.constant 1.000000e+00 : f32
    %35 = vector.broadcast %cst_17 : f32 to vector<16x128xf32>
    %36 = arith.addf %35, %34 : vector<16x128xf32>
    %37 = arith.divf %35, %36 : vector<16x128xf32>
    %38 = math.tanh %32 : vector<16x128xf32>
    %39 = vector.extract_strided_slice %37 {offsets = [0, 0], sizes = [16, 32], strides = [1, 1]} : vector<16x128xf32> to vector<16x32xf32>
    %40 = vector.extract_strided_slice %38 {offsets = [0, 64], sizes = [16, 32], strides = [1, 1]} : vector<16x128xf32> to vector<16x32xf32>
    %41 = arith.mulf %39, %40 : vector<16x32xf32>
    %42 = vector.extract_strided_slice %37 {offsets = [0, 96], sizes = [16, 32], strides = [1, 1]} : vector<16x128xf32> to vector<16x32xf32>
    %43 = math.tanh %41 : vector<16x32xf32>
    %44 = arith.mulf %42, %43 : vector<16x32xf32>
    %c0_18 = arith.constant 0 : index
    %c0_19 = arith.constant 0 : index
    %45 = vector.load %arg4[%c0_18, %c0_19] : memref<48x32xbf16, #tpu.memory_space<vmem>>, vector<48x32xbf16>
    %c0_20 = arith.constant 0 : index
    %c0_21 = arith.constant 0 : index
    %46 = vector.load %arg5[%c0_20, %c0_21] : memref<1x32xf32, #tpu.memory_space<vmem>>, vector<1x32xf32>
    %c0_22 = arith.constant 0 : index
    %c0_23 = arith.constant 0 : index
    %47 = vector.load %arg6[%c0_22, %c0_23] : memref<32x128xbf16, #tpu.memory_space<vmem>>, vector<32x128xbf16>
    %c0_24 = arith.constant 0 : index
    %c0_25 = arith.constant 0 : index
    %48 = vector.load %arg7[%c0_24, %c0_25] : memref<1x128xf32, #tpu.memory_space<vmem>>, vector<1x128xf32>
    %c0_26 = arith.constant 0 : index
    %c0_27 = arith.constant 0 : index
    %49 = vector.load %arg8[%c0_26, %c0_27] : memref<32x128xbf16, #tpu.memory_space<vmem>>, vector<32x128xbf16>
    %c0_28 = arith.constant 0 : index
    %c0_29 = arith.constant 0 : index
    %50 = vector.load %arg9[%c0_28, %c0_29] : memref<32x128xbf16, #tpu.memory_space<vmem>>, vector<32x128xbf16>
    %c0_30 = arith.constant 0 : index
    %c0_31 = arith.constant 0 : index
    %51 = vector.load %arg10[%c0_30, %c0_31] : memref<1x128xf32, #tpu.memory_space<vmem>>, vector<1x128xf32>
    %c0_32 = arith.constant 0 : index
    %c0_33 = arith.constant 0 : index
    %c0_34 = arith.constant 0 : index
    %52 = vector.load %arg2[%c0_32, %c0_33, %c0_34] : memref<4x16x48xbf16, #tpu.memory_space<vmem>>, vector<1x16x48xbf16>
    %53 = vector.shape_cast %52 : vector<1x16x48xbf16> to vector<16x48xbf16>
    %cst_35 = arith.constant dense<0.000000e+00> : vector<16x32xf32>
    %54 = tpu.matmul %53, %45, %cst_35 {dimension_numbers = #tpu.dot_dimension_numbers<[1], [0], [0], [1], [0, 0, 1, 1], [], []>} : vector<16x48xbf16>, vector<48x32xbf16>, vector<16x32xf32> -> vector<16x32xf32>
    %55 = vector.broadcast %46 : vector<1x32xf32> to vector<16x32xf32>
    %56 = arith.addf %54, %55 : vector<16x32xf32>
    %57 = arith.truncf %56 : vector<16x32xf32> to vector<16x32xbf16>
    %cst_36 = arith.constant dense<0.000000e+00> : vector<16x128xf32>
    %58 = tpu.matmul %57, %47, %cst_36 {dimension_numbers = #tpu.dot_dimension_numbers<[1], [0], [0], [1], [0, 0, 1, 1], [], []>} : vector<16x32xbf16>, vector<32x128xbf16>, vector<16x128xf32> -> vector<16x128xf32>
    %59 = vector.broadcast %48 : vector<1x128xf32> to vector<16x128xf32>
    %60 = arith.addf %58, %59 : vector<16x128xf32>
    %61 = arith.negf %60 : vector<16x128xf32>
    %62 = math.exp %61 : vector<16x128xf32>
    %cst_37 = arith.constant 1.000000e+00 : f32
    %63 = vector.broadcast %cst_37 : f32 to vector<16x128xf32>
    %64 = arith.addf %63, %62 : vector<16x128xf32>
    %65 = arith.divf %63, %64 : vector<16x128xf32>
    %66 = math.tanh %60 : vector<16x128xf32>
    %67 = vector.extract_strided_slice %65 {offsets = [0, 0], sizes = [16, 32], strides = [1, 1]} : vector<16x128xf32> to vector<16x32xf32>
    %68 = vector.extract_strided_slice %66 {offsets = [0, 64], sizes = [16, 32], strides = [1, 1]} : vector<16x128xf32> to vector<16x32xf32>
    %69 = arith.mulf %67, %68 : vector<16x32xf32>
    %70 = vector.extract_strided_slice %65 {offsets = [0, 96], sizes = [16, 32], strides = [1, 1]} : vector<16x128xf32> to vector<16x32xf32>
    %71 = math.tanh %69 : vector<16x32xf32>
    %72 = arith.mulf %70, %71 : vector<16x32xf32>
    %73 = arith.truncf %72 : vector<16x32xf32> to vector<16x32xbf16>
    %cst_38 = arith.constant dense<0.000000e+00> : vector<16x128xf32>
    %74 = tpu.matmul %73, %49, %cst_38 {dimension_numbers = #tpu.dot_dimension_numbers<[1], [0], [0], [1], [0, 0, 1, 1], [], []>} : vector<16x32xbf16>, vector<32x128xbf16>, vector<16x128xf32> -> vector<16x128xf32>
    %c1 = arith.constant 1 : index
    %c0_39 = arith.constant 0 : index
    %c0_40 = arith.constant 0 : index
    %75 = vector.load %arg2[%c1, %c0_39, %c0_40] : memref<4x16x48xbf16, #tpu.memory_space<vmem>>, vector<1x16x48xbf16>
    %76 = vector.shape_cast %75 : vector<1x16x48xbf16> to vector<16x48xbf16>
    %cst_41 = arith.constant dense<0.000000e+00> : vector<16x32xf32>
    %77 = tpu.matmul %76, %45, %cst_41 {dimension_numbers = #tpu.dot_dimension_numbers<[1], [0], [0], [1], [0, 0, 1, 1], [], []>} : vector<16x48xbf16>, vector<48x32xbf16>, vector<16x32xf32> -> vector<16x32xf32>
    %78 = vector.broadcast %46 : vector<1x32xf32> to vector<16x32xf32>
    %79 = arith.addf %77, %78 : vector<16x32xf32>
    %80 = arith.truncf %79 : vector<16x32xf32> to vector<16x32xbf16>
    %cst_42 = arith.constant dense<0.000000e+00> : vector<16x128xf32>
    %81 = tpu.matmul %80, %47, %cst_42 {dimension_numbers = #tpu.dot_dimension_numbers<[1], [0], [0], [1], [0, 0, 1, 1], [], []>} : vector<16x32xbf16>, vector<32x128xbf16>, vector<16x128xf32> -> vector<16x128xf32>
    %82 = vector.broadcast %48 : vector<1x128xf32> to vector<16x128xf32>
    %83 = arith.addf %81, %82 : vector<16x128xf32>
    %84 = arith.negf %83 : vector<16x128xf32>
    %85 = math.exp %84 : vector<16x128xf32>
    %cst_43 = arith.constant 1.000000e+00 : f32
    %86 = vector.broadcast %cst_43 : f32 to vector<16x128xf32>
    %87 = arith.addf %86, %85 : vector<16x128xf32>
    %88 = arith.divf %86, %87 : vector<16x128xf32>
    %89 = math.tanh %83 : vector<16x128xf32>
    %90 = vector.extract_strided_slice %88 {offsets = [0, 0], sizes = [16, 32], strides = [1, 1]} : vector<16x128xf32> to vector<16x32xf32>
    %91 = vector.extract_strided_slice %89 {offsets = [0, 64], sizes = [16, 32], strides = [1, 1]} : vector<16x128xf32> to vector<16x32xf32>
    %92 = arith.mulf %90, %91 : vector<16x32xf32>
    %93 = vector.extract_strided_slice %88 {offsets = [0, 96], sizes = [16, 32], strides = [1, 1]} : vector<16x128xf32> to vector<16x32xf32>
    %94 = math.tanh %92 : vector<16x32xf32>
    %95 = arith.mulf %93, %94 : vector<16x32xf32>
    %96 = arith.truncf %95 : vector<16x32xf32> to vector<16x32xbf16>
    %cst_44 = arith.constant dense<0.000000e+00> : vector<16x128xf32>
    %97 = tpu.matmul %96, %49, %cst_44 {dimension_numbers = #tpu.dot_dimension_numbers<[1], [0], [0], [1], [0, 0, 1, 1], [], []>} : vector<16x32xbf16>, vector<32x128xbf16>, vector<16x128xf32> -> vector<16x128xf32>
    %c2 = arith.constant 2 : index
    %c0_45 = arith.constant 0 : index
    %c0_46 = arith.constant 0 : index
    %98 = vector.load %arg2[%c2, %c0_45, %c0_46] : memref<4x16x48xbf16, #tpu.memory_space<vmem>>, vector<1x16x48xbf16>
    %99 = vector.shape_cast %98 : vector<1x16x48xbf16> to vector<16x48xbf16>
    %cst_47 = arith.constant dense<0.000000e+00> : vector<16x32xf32>
    %100 = tpu.matmul %99, %45, %cst_47 {dimension_numbers = #tpu.dot_dimension_numbers<[1], [0], [0], [1], [0, 0, 1, 1], [], []>} : vector<16x48xbf16>, vector<48x32xbf16>, vector<16x32xf32> -> vector<16x32xf32>
    %101 = vector.broadcast %46 : vector<1x32xf32> to vector<16x32xf32>
    %102 = arith.addf %100, %101 : vector<16x32xf32>
    %103 = arith.truncf %102 : vector<16x32xf32> to vector<16x32xbf16>
    %cst_48 = arith.constant dense<0.000000e+00> : vector<16x128xf32>
    %104 = tpu.matmul %103, %47, %cst_48 {dimension_numbers = #tpu.dot_dimension_numbers<[1], [0], [0], [1], [0, 0, 1, 1], [], []>} : vector<16x32xbf16>, vector<32x128xbf16>, vector<16x128xf32> -> vector<16x128xf32>
    %105 = vector.broadcast %48 : vector<1x128xf32> to vector<16x128xf32>
    %106 = arith.addf %104, %105 : vector<16x128xf32>
    %107 = arith.negf %106 : vector<16x128xf32>
    %108 = math.exp %107 : vector<16x128xf32>
    %cst_49 = arith.constant 1.000000e+00 : f32
    %109 = vector.broadcast %cst_49 : f32 to vector<16x128xf32>
    %110 = arith.addf %109, %108 : vector<16x128xf32>
    %111 = arith.divf %109, %110 : vector<16x128xf32>
    %112 = math.tanh %106 : vector<16x128xf32>
    %113 = vector.extract_strided_slice %111 {offsets = [0, 0], sizes = [16, 32], strides = [1, 1]} : vector<16x128xf32> to vector<16x32xf32>
    %114 = vector.extract_strided_slice %112 {offsets = [0, 64], sizes = [16, 32], strides = [1, 1]} : vector<16x128xf32> to vector<16x32xf32>
    %115 = arith.mulf %113, %114 : vector<16x32xf32>
    %116 = vector.extract_strided_slice %111 {offsets = [0, 96], sizes = [16, 32], strides = [1, 1]} : vector<16x128xf32> to vector<16x32xf32>
    %117 = math.tanh %115 : vector<16x32xf32>
    %118 = arith.mulf %116, %117 : vector<16x32xf32>
    %119 = arith.truncf %118 : vector<16x32xf32> to vector<16x32xbf16>
    %cst_50 = arith.constant dense<0.000000e+00> : vector<16x128xf32>
    %120 = tpu.matmul %119, %49, %cst_50 {dimension_numbers = #tpu.dot_dimension_numbers<[1], [0], [0], [1], [0, 0, 1, 1], [], []>} : vector<16x32xbf16>, vector<32x128xbf16>, vector<16x128xf32> -> vector<16x128xf32>
    %c3 = arith.constant 3 : index
    %c0_51 = arith.constant 0 : index
    %c0_52 = arith.constant 0 : index
    %121 = vector.load %arg2[%c3, %c0_51, %c0_52] : memref<4x16x48xbf16, #tpu.memory_space<vmem>>, vector<1x16x48xbf16>
    %122 = vector.shape_cast %121 : vector<1x16x48xbf16> to vector<16x48xbf16>
    %cst_53 = arith.constant dense<0.000000e+00> : vector<16x32xf32>
    %123 = tpu.matmul %122, %45, %cst_53 {dimension_numbers = #tpu.dot_dimension_numbers<[1], [0], [0], [1], [0, 0, 1, 1], [], []>} : vector<16x48xbf16>, vector<48x32xbf16>, vector<16x32xf32> -> vector<16x32xf32>
    %124 = vector.broadcast %46 : vector<1x32xf32> to vector<16x32xf32>
    %125 = arith.addf %123, %124 : vector<16x32xf32>
    %126 = arith.truncf %125 : vector<16x32xf32> to vector<16x32xbf16>
    %cst_54 = arith.constant dense<0.000000e+00> : vector<16x128xf32>
    %127 = tpu.matmul %126, %47, %cst_54 {dimension_numbers = #tpu.dot_dimension_numbers<[1], [0], [0], [1], [0, 0, 1, 1], [], []>} : vector<16x32xbf16>, vector<32x128xbf16>, vector<16x128xf32> -> vector<16x128xf32>
    %128 = vector.broadcast %48 : vector<1x128xf32> to vector<16x128xf32>
    %129 = arith.addf %127, %128 : vector<16x128xf32>
    %130 = arith.negf %129 : vector<16x128xf32>
    %131 = math.exp %130 : vector<16x128xf32>
    %cst_55 = arith.constant 1.000000e+00 : f32
    %132 = vector.broadcast %cst_55 : f32 to vector<16x128xf32>
    %133 = arith.addf %132, %131 : vector<16x128xf32>
    %134 = arith.divf %132, %133 : vector<16x128xf32>
    %135 = math.tanh %129 : vector<16x128xf32>
    %136 = vector.extract_strided_slice %134 {offsets = [0, 0], sizes = [16, 32], strides = [1, 1]} : vector<16x128xf32> to vector<16x32xf32>
    %137 = vector.extract_strided_slice %135 {offsets = [0, 64], sizes = [16, 32], strides = [1, 1]} : vector<16x128xf32> to vector<16x32xf32>
    %138 = arith.mulf %136, %137 : vector<16x32xf32>
    %139 = vector.extract_strided_slice %134 {offsets = [0, 96], sizes = [16, 32], strides = [1, 1]} : vector<16x128xf32> to vector<16x32xf32>
    %140 = math.tanh %138 : vector<16x32xf32>
    %141 = arith.mulf %139, %140 : vector<16x32xf32>
    %142 = arith.truncf %141 : vector<16x32xf32> to vector<16x32xbf16>
    %cst_56 = arith.constant dense<0.000000e+00> : vector<16x128xf32>
    %143 = tpu.matmul %142, %49, %cst_56 {dimension_numbers = #tpu.dot_dimension_numbers<[1], [0], [0], [1], [0, 0, 1, 1], [], []>} : vector<16x32xbf16>, vector<32x128xbf16>, vector<16x128xf32> -> vector<16x128xf32>
    %cst_57 = arith.constant 0.000000e+00 : f32
    %144 = vector.broadcast %cst_57 : f32 to vector<16x32xf32>
    %cst_58 = arith.constant 0.000000e+00 : f32
    %145 = vector.broadcast %cst_58 : f32 to vector<16x32xf32>
    %cst_59 = arith.constant 0.000000e+00 : f32
    %146 = vector.broadcast %cst_59 : f32 to vector<16x32xf32>
    %147 = vector.shape_cast %20 : vector<1x128xi1> to vector<1x128xi1>
    %148 = vector.broadcast %147 : vector<1x128xi1> to vector<16x128xi1>
    %149 = arith.select %148, %74, %143 : vector<16x128xi1>, vector<16x128xf32>
    %150 = arith.truncf %144 : vector<16x32xf32> to vector<16x32xbf16>
    %cst_60 = arith.constant dense<0.000000e+00> : vector<16x128xf32>
    %151 = tpu.matmul %150, %50, %cst_60 {dimension_numbers = #tpu.dot_dimension_numbers<[1], [0], [0], [1], [0, 0, 1, 1], [], []>} : vector<16x32xbf16>, vector<32x128xbf16>, vector<16x128xf32> -> vector<16x128xf32>
    %152 = arith.addf %149, %151 : vector<16x128xf32>
    %153 = vector.broadcast %51 : vector<1x128xf32> to vector<16x128xf32>
    %154 = arith.addf %152, %153 : vector<16x128xf32>
    %155 = arith.negf %154 : vector<16x128xf32>
    %156 = math.exp %155 : vector<16x128xf32>
    %cst_61 = arith.constant 1.000000e+00 : f32
    %157 = vector.broadcast %cst_61 : f32 to vector<16x128xf32>
    %158 = arith.addf %157, %156 : vector<16x128xf32>
    %159 = arith.divf %157, %158 : vector<16x128xf32>
    %160 = math.tanh %154 : vector<16x128xf32>
    %161 = vector.extract_strided_slice %159 {offsets = [0, 32], sizes = [16, 32], strides = [1, 1]} : vector<16x128xf32> to vector<16x32xf32>
    %162 = arith.mulf %161, %145 : vector<16x32xf32>
    %163 = vector.extract_strided_slice %159 {offsets = [0, 0], sizes = [16, 32], strides = [1, 1]} : vector<16x128xf32> to vector<16x32xf32>
    %164 = vector.extract_strided_slice %160 {offsets = [0, 64], sizes = [16, 32], strides = [1, 1]} : vector<16x128xf32> to vector<16x32xf32>
    %165 = arith.mulf %163, %164 : vector<16x32xf32>
    %166 = arith.addf %162, %165 : vector<16x32xf32>
    %167 = vector.extract_strided_slice %159 {offsets = [0, 96], sizes = [16, 32], strides = [1, 1]} : vector<16x128xf32> to vector<16x32xf32>
    %168 = math.tanh %166 : vector<16x32xf32>
    %169 = arith.mulf %167, %168 : vector<16x32xf32>
    %170 = arith.addf %146, %169 : vector<16x32xf32>
    %171 = vector.shape_cast %20 : vector<1x128xi1> to vector<1x128xi1>
    %172 = vector.broadcast %171 : vector<1x128xi1> to vector<16x128xi1>
    %173 = arith.select %172, %97, %120 : vector<16x128xi1>, vector<16x128xf32>
    %174 = arith.truncf %169 : vector<16x32xf32> to vector<16x32xbf16>
    %cst_62 = arith.constant dense<0.000000e+00> : vector<16x128xf32>
    %175 = tpu.matmul %174, %50, %cst_62 {dimension_numbers = #tpu.dot_dimension_numbers<[1], [0], [0], [1], [0, 0, 1, 1], [], []>} : vector<16x32xbf16>, vector<32x128xbf16>, vector<16x128xf32> -> vector<16x128xf32>
    %176 = arith.addf %173, %175 : vector<16x128xf32>
    %177 = vector.broadcast %51 : vector<1x128xf32> to vector<16x128xf32>
    %178 = arith.addf %176, %177 : vector<16x128xf32>
    %179 = arith.negf %178 : vector<16x128xf32>
    %180 = math.exp %179 : vector<16x128xf32>
    %cst_63 = arith.constant 1.000000e+00 : f32
    %181 = vector.broadcast %cst_63 : f32 to vector<16x128xf32>
    %182 = arith.addf %181, %180 : vector<16x128xf32>
    %183 = arith.divf %181, %182 : vector<16x128xf32>
    %184 = math.tanh %178 : vector<16x128xf32>
    %185 = vector.extract_strided_slice %183 {offsets = [0, 32], sizes = [16, 32], strides = [1, 1]} : vector<16x128xf32> to vector<16x32xf32>
    %186 = arith.mulf %185, %166 : vector<16x32xf32>
    %187 = vector.extract_strided_slice %183 {offsets = [0, 0], sizes = [16, 32], strides = [1, 1]} : vector<16x128xf32> to vector<16x32xf32>
    %188 = vector.extract_strided_slice %184 {offsets = [0, 64], sizes = [16, 32], strides = [1, 1]} : vector<16x128xf32> to vector<16x32xf32>
    %189 = arith.mulf %187, %188 : vector<16x32xf32>
    %190 = arith.addf %186, %189 : vector<16x32xf32>
    %191 = vector.extract_strided_slice %183 {offsets = [0, 96], sizes = [16, 32], strides = [1, 1]} : vector<16x128xf32> to vector<16x32xf32>
    %192 = math.tanh %190 : vector<16x32xf32>
    %193 = arith.mulf %191, %192 : vector<16x32xf32>
    %194 = arith.addf %170, %193 : vector<16x32xf32>
    %195 = vector.shape_cast %20 : vector<1x128xi1> to vector<1x128xi1>
    %196 = vector.broadcast %195 : vector<1x128xi1> to vector<16x128xi1>
    %197 = arith.select %196, %120, %97 : vector<16x128xi1>, vector<16x128xf32>
    %198 = arith.truncf %193 : vector<16x32xf32> to vector<16x32xbf16>
    %cst_64 = arith.constant dense<0.000000e+00> : vector<16x128xf32>
    %199 = tpu.matmul %198, %50, %cst_64 {dimension_numbers = #tpu.dot_dimension_numbers<[1], [0], [0], [1], [0, 0, 1, 1], [], []>} : vector<16x32xbf16>, vector<32x128xbf16>, vector<16x128xf32> -> vector<16x128xf32>
    %200 = arith.addf %197, %199 : vector<16x128xf32>
    %201 = vector.broadcast %51 : vector<1x128xf32> to vector<16x128xf32>
    %202 = arith.addf %200, %201 : vector<16x128xf32>
    %203 = arith.negf %202 : vector<16x128xf32>
    %204 = math.exp %203 : vector<16x128xf32>
    %cst_65 = arith.constant 1.000000e+00 : f32
    %205 = vector.broadcast %cst_65 : f32 to vector<16x128xf32>
    %206 = arith.addf %205, %204 : vector<16x128xf32>
    %207 = arith.divf %205, %206 : vector<16x128xf32>
    %208 = math.tanh %202 : vector<16x128xf32>
    %209 = vector.extract_strided_slice %207 {offsets = [0, 32], sizes = [16, 32], strides = [1, 1]} : vector<16x128xf32> to vector<16x32xf32>
    %210 = arith.mulf %209, %190 : vector<16x32xf32>
    %211 = vector.extract_strided_slice %207 {offsets = [0, 0], sizes = [16, 32], strides = [1, 1]} : vector<16x128xf32> to vector<16x32xf32>
    %212 = vector.extract_strided_slice %208 {offsets = [0, 64], sizes = [16, 32], strides = [1, 1]} : vector<16x128xf32> to vector<16x32xf32>
    %213 = arith.mulf %211, %212 : vector<16x32xf32>
    %214 = arith.addf %210, %213 : vector<16x32xf32>
    %215 = vector.extract_strided_slice %207 {offsets = [0, 96], sizes = [16, 32], strides = [1, 1]} : vector<16x128xf32> to vector<16x32xf32>
    %216 = math.tanh %214 : vector<16x32xf32>
    %217 = arith.mulf %215, %216 : vector<16x32xf32>
    %218 = arith.addf %194, %217 : vector<16x32xf32>
    %219 = vector.shape_cast %20 : vector<1x128xi1> to vector<1x128xi1>
    %220 = vector.broadcast %219 : vector<1x128xi1> to vector<16x128xi1>
    %221 = arith.select %220, %143, %74 : vector<16x128xi1>, vector<16x128xf32>
    %222 = arith.truncf %217 : vector<16x32xf32> to vector<16x32xbf16>
    %cst_66 = arith.constant dense<0.000000e+00> : vector<16x128xf32>
    %223 = tpu.matmul %222, %50, %cst_66 {dimension_numbers = #tpu.dot_dimension_numbers<[1], [0], [0], [1], [0, 0, 1, 1], [], []>} : vector<16x32xbf16>, vector<32x128xbf16>, vector<16x128xf32> -> vector<16x128xf32>
    %224 = arith.addf %221, %223 : vector<16x128xf32>
    %225 = vector.broadcast %51 : vector<1x128xf32> to vector<16x128xf32>
    %226 = arith.addf %224, %225 : vector<16x128xf32>
    %227 = arith.negf %226 : vector<16x128xf32>
    %228 = math.exp %227 : vector<16x128xf32>
    %cst_67 = arith.constant 1.000000e+00 : f32
    %229 = vector.broadcast %cst_67 : f32 to vector<16x128xf32>
    %230 = arith.addf %229, %228 : vector<16x128xf32>
    %231 = arith.divf %229, %230 : vector<16x128xf32>
    %232 = math.tanh %226 : vector<16x128xf32>
    %233 = vector.extract_strided_slice %231 {offsets = [0, 32], sizes = [16, 32], strides = [1, 1]} : vector<16x128xf32> to vector<16x32xf32>
    %234 = arith.mulf %233, %214 : vector<16x32xf32>
    %235 = vector.extract_strided_slice %231 {offsets = [0, 0], sizes = [16, 32], strides = [1, 1]} : vector<16x128xf32> to vector<16x32xf32>
    %236 = vector.extract_strided_slice %232 {offsets = [0, 64], sizes = [16, 32], strides = [1, 1]} : vector<16x128xf32> to vector<16x32xf32>
    %237 = arith.mulf %235, %236 : vector<16x32xf32>
    %238 = arith.addf %234, %237 : vector<16x32xf32>
    %239 = vector.extract_strided_slice %231 {offsets = [0, 96], sizes = [16, 32], strides = [1, 1]} : vector<16x128xf32> to vector<16x32xf32>
    %240 = math.tanh %238 : vector<16x32xf32>
    %241 = arith.mulf %239, %240 : vector<16x32xf32>
    %242 = arith.addf %218, %241 : vector<16x32xf32>
    %cst_68 = arith.constant 2.500000e-01 : f32
    %243 = vector.broadcast %cst_68 : f32 to vector<16x32xf32>
    %244 = arith.mulf %242, %243 : vector<16x32xf32>
    %c0_69 = arith.constant 0 : index
    %c0_70 = arith.constant 0 : index
    %245 = vector.load %arg11[%c0_69, %c0_70] : memref<40x32xbf16, #tpu.memory_space<vmem>>, vector<40x32xbf16>
    %c0_71 = arith.constant 0 : index
    %c0_72 = arith.constant 0 : index
    %246 = vector.load %arg12[%c0_71, %c0_72] : memref<1x32xf32, #tpu.memory_space<vmem>>, vector<1x32xf32>
    %c0_73 = arith.constant 0 : index
    %c0_74 = arith.constant 0 : index
    %247 = vector.load %arg13[%c0_73, %c0_74] : memref<32x128xbf16, #tpu.memory_space<vmem>>, vector<32x128xbf16>
    %c0_75 = arith.constant 0 : index
    %c0_76 = arith.constant 0 : index
    %248 = vector.load %arg14[%c0_75, %c0_76] : memref<1x128xf32, #tpu.memory_space<vmem>>, vector<1x128xf32>
    %c0_77 = arith.constant 0 : index
    %c0_78 = arith.constant 0 : index
    %249 = vector.load %arg15[%c0_77, %c0_78] : memref<32x128xbf16, #tpu.memory_space<vmem>>, vector<32x128xbf16>
    %c0_79 = arith.constant 0 : index
    %c0_80 = arith.constant 0 : index
    %250 = vector.load %arg16[%c0_79, %c0_80] : memref<32x128xbf16, #tpu.memory_space<vmem>>, vector<32x128xbf16>
    %c0_81 = arith.constant 0 : index
    %c0_82 = arith.constant 0 : index
    %251 = vector.load %arg17[%c0_81, %c0_82] : memref<1x128xf32, #tpu.memory_space<vmem>>, vector<1x128xf32>
    %c0_83 = arith.constant 0 : index
    %c0_84 = arith.constant 0 : index
    %c0_85 = arith.constant 0 : index
    %252 = vector.load %arg3[%c0_83, %c0_84, %c0_85] : memref<3x16x40xbf16, #tpu.memory_space<vmem>>, vector<1x16x40xbf16>
    %253 = vector.shape_cast %252 : vector<1x16x40xbf16> to vector<16x40xbf16>
    %cst_86 = arith.constant dense<0.000000e+00> : vector<16x32xf32>
    %254 = tpu.matmul %253, %245, %cst_86 {dimension_numbers = #tpu.dot_dimension_numbers<[1], [0], [0], [1], [0, 0, 1, 1], [], []>} : vector<16x40xbf16>, vector<40x32xbf16>, vector<16x32xf32> -> vector<16x32xf32>
    %255 = vector.broadcast %246 : vector<1x32xf32> to vector<16x32xf32>
    %256 = arith.addf %254, %255 : vector<16x32xf32>
    %257 = arith.truncf %256 : vector<16x32xf32> to vector<16x32xbf16>
    %cst_87 = arith.constant dense<0.000000e+00> : vector<16x128xf32>
    %258 = tpu.matmul %257, %247, %cst_87 {dimension_numbers = #tpu.dot_dimension_numbers<[1], [0], [0], [1], [0, 0, 1, 1], [], []>} : vector<16x32xbf16>, vector<32x128xbf16>, vector<16x128xf32> -> vector<16x128xf32>
    %259 = vector.broadcast %248 : vector<1x128xf32> to vector<16x128xf32>
    %260 = arith.addf %258, %259 : vector<16x128xf32>
    %261 = arith.negf %260 : vector<16x128xf32>
    %262 = math.exp %261 : vector<16x128xf32>
    %cst_88 = arith.constant 1.000000e+00 : f32
    %263 = vector.broadcast %cst_88 : f32 to vector<16x128xf32>
    %264 = arith.addf %263, %262 : vector<16x128xf32>
    %265 = arith.divf %263, %264 : vector<16x128xf32>
    %266 = math.tanh %260 : vector<16x128xf32>
    %267 = vector.extract_strided_slice %265 {offsets = [0, 0], sizes = [16, 32], strides = [1, 1]} : vector<16x128xf32> to vector<16x32xf32>
    %268 = vector.extract_strided_slice %266 {offsets = [0, 64], sizes = [16, 32], strides = [1, 1]} : vector<16x128xf32> to vector<16x32xf32>
    %269 = arith.mulf %267, %268 : vector<16x32xf32>
    %270 = vector.extract_strided_slice %265 {offsets = [0, 96], sizes = [16, 32], strides = [1, 1]} : vector<16x128xf32> to vector<16x32xf32>
    %271 = math.tanh %269 : vector<16x32xf32>
    %272 = arith.mulf %270, %271 : vector<16x32xf32>
    %273 = arith.truncf %272 : vector<16x32xf32> to vector<16x32xbf16>
    %cst_89 = arith.constant dense<0.000000e+00> : vector<16x128xf32>
    %274 = tpu.matmul %273, %249, %cst_89 {dimension_numbers = #tpu.dot_dimension_numbers<[1], [0], [0], [1], [0, 0, 1, 1], [], []>} : vector<16x32xbf16>, vector<32x128xbf16>, vector<16x128xf32> -> vector<16x128xf32>
    %c1_90 = arith.constant 1 : index
    %c0_91 = arith.constant 0 : index
    %c0_92 = arith.constant 0 : index
    %275 = vector.load %arg3[%c1_90, %c0_91, %c0_92] : memref<3x16x40xbf16, #tpu.memory_space<vmem>>, vector<1x16x40xbf16>
    %276 = vector.shape_cast %275 : vector<1x16x40xbf16> to vector<16x40xbf16>
    %cst_93 = arith.constant dense<0.000000e+00> : vector<16x32xf32>
    %277 = tpu.matmul %276, %245, %cst_93 {dimension_numbers = #tpu.dot_dimension_numbers<[1], [0], [0], [1], [0, 0, 1, 1], [], []>} : vector<16x40xbf16>, vector<40x32xbf16>, vector<16x32xf32> -> vector<16x32xf32>
    %278 = vector.broadcast %246 : vector<1x32xf32> to vector<16x32xf32>
    %279 = arith.addf %277, %278 : vector<16x32xf32>
    %280 = arith.truncf %279 : vector<16x32xf32> to vector<16x32xbf16>
    %cst_94 = arith.constant dense<0.000000e+00> : vector<16x128xf32>
    %281 = tpu.matmul %280, %247, %cst_94 {dimension_numbers = #tpu.dot_dimension_numbers<[1], [0], [0], [1], [0, 0, 1, 1], [], []>} : vector<16x32xbf16>, vector<32x128xbf16>, vector<16x128xf32> -> vector<16x128xf32>
    %282 = vector.broadcast %248 : vector<1x128xf32> to vector<16x128xf32>
    %283 = arith.addf %281, %282 : vector<16x128xf32>
    %284 = arith.negf %283 : vector<16x128xf32>
    %285 = math.exp %284 : vector<16x128xf32>
    %cst_95 = arith.constant 1.000000e+00 : f32
    %286 = vector.broadcast %cst_95 : f32 to vector<16x128xf32>
    %287 = arith.addf %286, %285 : vector<16x128xf32>
    %288 = arith.divf %286, %287 : vector<16x128xf32>
    %289 = math.tanh %283 : vector<16x128xf32>
    %290 = vector.extract_strided_slice %288 {offsets = [0, 0], sizes = [16, 32], strides = [1, 1]} : vector<16x128xf32> to vector<16x32xf32>
    %291 = vector.extract_strided_slice %289 {offsets = [0, 64], sizes = [16, 32], strides = [1, 1]} : vector<16x128xf32> to vector<16x32xf32>
    %292 = arith.mulf %290, %291 : vector<16x32xf32>
    %293 = vector.extract_strided_slice %288 {offsets = [0, 96], sizes = [16, 32], strides = [1, 1]} : vector<16x128xf32> to vector<16x32xf32>
    %294 = math.tanh %292 : vector<16x32xf32>
    %295 = arith.mulf %293, %294 : vector<16x32xf32>
    %296 = arith.truncf %295 : vector<16x32xf32> to vector<16x32xbf16>
    %cst_96 = arith.constant dense<0.000000e+00> : vector<16x128xf32>
    %297 = tpu.matmul %296, %249, %cst_96 {dimension_numbers = #tpu.dot_dimension_numbers<[1], [0], [0], [1], [0, 0, 1, 1], [], []>} : vector<16x32xbf16>, vector<32x128xbf16>, vector<16x128xf32> -> vector<16x128xf32>
    %c2_97 = arith.constant 2 : index
    %c0_98 = arith.constant 0 : index
    %c0_99 = arith.constant 0 : index
    %298 = vector.load %arg3[%c2_97, %c0_98, %c0_99] : memref<3x16x40xbf16, #tpu.memory_space<vmem>>, vector<1x16x40xbf16>
    %299 = vector.shape_cast %298 : vector<1x16x40xbf16> to vector<16x40xbf16>
    %cst_100 = arith.constant dense<0.000000e+00> : vector<16x32xf32>
    %300 = tpu.matmul %299, %245, %cst_100 {dimension_numbers = #tpu.dot_dimension_numbers<[1], [0], [0], [1], [0, 0, 1, 1], [], []>} : vector<16x40xbf16>, vector<40x32xbf16>, vector<16x32xf32> -> vector<16x32xf32>
    %301 = vector.broadcast %246 : vector<1x32xf32> to vector<16x32xf32>
    %302 = arith.addf %300, %301 : vector<16x32xf32>
    %303 = arith.truncf %302 : vector<16x32xf32> to vector<16x32xbf16>
    %cst_101 = arith.constant dense<0.000000e+00> : vector<16x128xf32>
    %304 = tpu.matmul %303, %247, %cst_101 {dimension_numbers = #tpu.dot_dimension_numbers<[1], [0], [0], [1], [0, 0, 1, 1], [], []>} : vector<16x32xbf16>, vector<32x128xbf16>, vector<16x128xf32> -> vector<16x128xf32>
    %305 = vector.broadcast %248 : vector<1x128xf32> to vector<16x128xf32>
    %306 = arith.addf %304, %305 : vector<16x128xf32>
    %307 = arith.negf %306 : vector<16x128xf32>
    %308 = math.exp %307 : vector<16x128xf32>
    %cst_102 = arith.constant 1.000000e+00 : f32
    %309 = vector.broadcast %cst_102 : f32 to vector<16x128xf32>
    %310 = arith.addf %309, %308 : vector<16x128xf32>
    %311 = arith.divf %309, %310 : vector<16x128xf32>
    %312 = math.tanh %306 : vector<16x128xf32>
    %313 = vector.extract_strided_slice %311 {offsets = [0, 0], sizes = [16, 32], strides = [1, 1]} : vector<16x128xf32> to vector<16x32xf32>
    %314 = vector.extract_strided_slice %312 {offsets = [0, 64], sizes = [16, 32], strides = [1, 1]} : vector<16x128xf32> to vector<16x32xf32>
    %315 = arith.mulf %313, %314 : vector<16x32xf32>
    %316 = vector.extract_strided_slice %311 {offsets = [0, 96], sizes = [16, 32], strides = [1, 1]} : vector<16x128xf32> to vector<16x32xf32>
    %317 = math.tanh %315 : vector<16x32xf32>
    %318 = arith.mulf %316, %317 : vector<16x32xf32>
    %319 = arith.truncf %318 : vector<16x32xf32> to vector<16x32xbf16>
    %cst_103 = arith.constant dense<0.000000e+00> : vector<16x128xf32>
    %320 = tpu.matmul %319, %249, %cst_103 {dimension_numbers = #tpu.dot_dimension_numbers<[1], [0], [0], [1], [0, 0, 1, 1], [], []>} : vector<16x32xbf16>, vector<32x128xbf16>, vector<16x128xf32> -> vector<16x128xf32>
    %cst_104 = arith.constant 0.000000e+00 : f32
    %321 = vector.broadcast %cst_104 : f32 to vector<16x32xf32>
    %cst_105 = arith.constant 0.000000e+00 : f32
    %322 = vector.broadcast %cst_105 : f32 to vector<16x32xf32>
    %cst_106 = arith.constant 0.000000e+00 : f32
    %323 = vector.broadcast %cst_106 : f32 to vector<16x32xf32>
    %324 = vector.shape_cast %20 : vector<1x128xi1> to vector<1x128xi1>
    %325 = vector.broadcast %324 : vector<1x128xi1> to vector<16x128xi1>
    %326 = arith.select %325, %274, %320 : vector<16x128xi1>, vector<16x128xf32>
    %327 = arith.truncf %321 : vector<16x32xf32> to vector<16x32xbf16>
    %cst_107 = arith.constant dense<0.000000e+00> : vector<16x128xf32>
    %328 = tpu.matmul %327, %250, %cst_107 {dimension_numbers = #tpu.dot_dimension_numbers<[1], [0], [0], [1], [0, 0, 1, 1], [], []>} : vector<16x32xbf16>, vector<32x128xbf16>, vector<16x128xf32> -> vector<16x128xf32>
    %329 = arith.addf %326, %328 : vector<16x128xf32>
    %330 = vector.broadcast %251 : vector<1x128xf32> to vector<16x128xf32>
    %331 = arith.addf %329, %330 : vector<16x128xf32>
    %332 = arith.negf %331 : vector<16x128xf32>
    %333 = math.exp %332 : vector<16x128xf32>
    %cst_108 = arith.constant 1.000000e+00 : f32
    %334 = vector.broadcast %cst_108 : f32 to vector<16x128xf32>
    %335 = arith.addf %334, %333 : vector<16x128xf32>
    %336 = arith.divf %334, %335 : vector<16x128xf32>
    %337 = math.tanh %331 : vector<16x128xf32>
    %338 = vector.extract_strided_slice %336 {offsets = [0, 32], sizes = [16, 32], strides = [1, 1]} : vector<16x128xf32> to vector<16x32xf32>
    %339 = arith.mulf %338, %322 : vector<16x32xf32>
    %340 = vector.extract_strided_slice %336 {offsets = [0, 0], sizes = [16, 32], strides = [1, 1]} : vector<16x128xf32> to vector<16x32xf32>
    %341 = vector.extract_strided_slice %337 {offsets = [0, 64], sizes = [16, 32], strides = [1, 1]} : vector<16x128xf32> to vector<16x32xf32>
    %342 = arith.mulf %340, %341 : vector<16x32xf32>
    %343 = arith.addf %339, %342 : vector<16x32xf32>
    %344 = vector.extract_strided_slice %336 {offsets = [0, 96], sizes = [16, 32], strides = [1, 1]} : vector<16x128xf32> to vector<16x32xf32>
    %345 = math.tanh %343 : vector<16x32xf32>
    %346 = arith.mulf %344, %345 : vector<16x32xf32>
    %347 = arith.addf %323, %346 : vector<16x32xf32>
    %348 = vector.shape_cast %20 : vector<1x128xi1> to vector<1x128xi1>
    %349 = vector.broadcast %348 : vector<1x128xi1> to vector<16x128xi1>
    %350 = arith.select %349, %297, %297 : vector<16x128xi1>, vector<16x128xf32>
    %351 = arith.truncf %346 : vector<16x32xf32> to vector<16x32xbf16>
    %cst_109 = arith.constant dense<0.000000e+00> : vector<16x128xf32>
    %352 = tpu.matmul %351, %250, %cst_109 {dimension_numbers = #tpu.dot_dimension_numbers<[1], [0], [0], [1], [0, 0, 1, 1], [], []>} : vector<16x32xbf16>, vector<32x128xbf16>, vector<16x128xf32> -> vector<16x128xf32>
    %353 = arith.addf %350, %352 : vector<16x128xf32>
    %354 = vector.broadcast %251 : vector<1x128xf32> to vector<16x128xf32>
    %355 = arith.addf %353, %354 : vector<16x128xf32>
    %356 = arith.negf %355 : vector<16x128xf32>
    %357 = math.exp %356 : vector<16x128xf32>
    %cst_110 = arith.constant 1.000000e+00 : f32
    %358 = vector.broadcast %cst_110 : f32 to vector<16x128xf32>
    %359 = arith.addf %358, %357 : vector<16x128xf32>
    %360 = arith.divf %358, %359 : vector<16x128xf32>
    %361 = math.tanh %355 : vector<16x128xf32>
    %362 = vector.extract_strided_slice %360 {offsets = [0, 32], sizes = [16, 32], strides = [1, 1]} : vector<16x128xf32> to vector<16x32xf32>
    %363 = arith.mulf %362, %343 : vector<16x32xf32>
    %364 = vector.extract_strided_slice %360 {offsets = [0, 0], sizes = [16, 32], strides = [1, 1]} : vector<16x128xf32> to vector<16x32xf32>
    %365 = vector.extract_strided_slice %361 {offsets = [0, 64], sizes = [16, 32], strides = [1, 1]} : vector<16x128xf32> to vector<16x32xf32>
    %366 = arith.mulf %364, %365 : vector<16x32xf32>
    %367 = arith.addf %363, %366 : vector<16x32xf32>
    %368 = vector.extract_strided_slice %360 {offsets = [0, 96], sizes = [16, 32], strides = [1, 1]} : vector<16x128xf32> to vector<16x32xf32>
    %369 = math.tanh %367 : vector<16x32xf32>
    %370 = arith.mulf %368, %369 : vector<16x32xf32>
    %371 = arith.addf %347, %370 : vector<16x32xf32>
    %372 = vector.shape_cast %20 : vector<1x128xi1> to vector<1x128xi1>
    %373 = vector.broadcast %372 : vector<1x128xi1> to vector<16x128xi1>
    %374 = arith.select %373, %320, %274 : vector<16x128xi1>, vector<16x128xf32>
    %375 = arith.truncf %370 : vector<16x32xf32> to vector<16x32xbf16>
    %cst_111 = arith.constant dense<0.000000e+00> : vector<16x128xf32>
    %376 = tpu.matmul %375, %250, %cst_111 {dimension_numbers = #tpu.dot_dimension_numbers<[1], [0], [0], [1], [0, 0, 1, 1], [], []>} : vector<16x32xbf16>, vector<32x128xbf16>, vector<16x128xf32> -> vector<16x128xf32>
    %377 = arith.addf %374, %376 : vector<16x128xf32>
    %378 = vector.broadcast %251 : vector<1x128xf32> to vector<16x128xf32>
    %379 = arith.addf %377, %378 : vector<16x128xf32>
    %380 = arith.negf %379 : vector<16x128xf32>
    %381 = math.exp %380 : vector<16x128xf32>
    %cst_112 = arith.constant 1.000000e+00 : f32
    %382 = vector.broadcast %cst_112 : f32 to vector<16x128xf32>
    %383 = arith.addf %382, %381 : vector<16x128xf32>
    %384 = arith.divf %382, %383 : vector<16x128xf32>
    %385 = math.tanh %379 : vector<16x128xf32>
    %386 = vector.extract_strided_slice %384 {offsets = [0, 32], sizes = [16, 32], strides = [1, 1]} : vector<16x128xf32> to vector<16x32xf32>
    %387 = arith.mulf %386, %367 : vector<16x32xf32>
    %388 = vector.extract_strided_slice %384 {offsets = [0, 0], sizes = [16, 32], strides = [1, 1]} : vector<16x128xf32> to vector<16x32xf32>
    %389 = vector.extract_strided_slice %385 {offsets = [0, 64], sizes = [16, 32], strides = [1, 1]} : vector<16x128xf32> to vector<16x32xf32>
    %390 = arith.mulf %388, %389 : vector<16x32xf32>
    %391 = arith.addf %387, %390 : vector<16x32xf32>
    %392 = vector.extract_strided_slice %384 {offsets = [0, 96], sizes = [16, 32], strides = [1, 1]} : vector<16x128xf32> to vector<16x32xf32>
    %393 = math.tanh %391 : vector<16x32xf32>
    %394 = arith.mulf %392, %393 : vector<16x32xf32>
    %395 = arith.addf %371, %394 : vector<16x32xf32>
    %cst_113 = arith.constant 0.333333343 : f32
    %396 = vector.broadcast %cst_113 : f32 to vector<16x32xf32>
    %397 = arith.mulf %395, %396 : vector<16x32xf32>
    %398 = vector.broadcast %0 : vector<1x32xf32> to vector<16x32xf32>
    %399 = arith.mulf %44, %398 : vector<16x32xf32>
    %cst_114 = arith.constant dense<0.000000e+00> : vector<16xf32>
    %400 = vector.multi_reduction <add>, %399, %cst_114 [1] : vector<16x32xf32> to vector<16xf32>
    %401 = vector.shape_cast %400 : vector<16xf32> to vector<16x1xf32>
    %402 = vector.broadcast %1 : vector<1x32xf32> to vector<16x32xf32>
    %403 = arith.mulf %44, %402 : vector<16x32xf32>
    %cst_115 = arith.constant dense<0.000000e+00> : vector<16xf32>
    %404 = vector.multi_reduction <add>, %403, %cst_115 [1] : vector<16x32xf32> to vector<16xf32>
    %405 = vector.shape_cast %404 : vector<16xf32> to vector<16x1xf32>
    %406 = arith.addf %401, %405 : vector<16x1xf32>
    %cst_116 = arith.constant 0.000000e+00 : f32
    %407 = vector.broadcast %cst_116 : f32 to vector<16x1xf32>
    %408 = arith.cmpf ogt, %406, %407 : vector<16x1xf32>
    %cst_117 = arith.constant 0.00999999977 : f32
    %409 = vector.broadcast %cst_117 : f32 to vector<16x1xf32>
    %410 = arith.mulf %409, %406 : vector<16x1xf32>
    %411 = arith.select %408, %406, %410 : vector<16x1xi1>, vector<16x1xf32>
    %412 = vector.broadcast %1 : vector<1x32xf32> to vector<16x32xf32>
    %413 = arith.mulf %244, %412 : vector<16x32xf32>
    %cst_118 = arith.constant dense<0.000000e+00> : vector<16xf32>
    %414 = vector.multi_reduction <add>, %413, %cst_118 [1] : vector<16x32xf32> to vector<16xf32>
    %415 = vector.shape_cast %414 : vector<16xf32> to vector<16x1xf32>
    %416 = arith.addf %401, %415 : vector<16x1xf32>
    %cst_119 = arith.constant 0.000000e+00 : f32
    %417 = vector.broadcast %cst_119 : f32 to vector<16x1xf32>
    %418 = arith.cmpf ogt, %416, %417 : vector<16x1xf32>
    %cst_120 = arith.constant 0.00999999977 : f32
    %419 = vector.broadcast %cst_120 : f32 to vector<16x1xf32>
    %420 = arith.mulf %419, %416 : vector<16x1xf32>
    %421 = arith.select %418, %416, %420 : vector<16x1xi1>, vector<16x1xf32>
    %422 = vector.broadcast %1 : vector<1x32xf32> to vector<16x32xf32>
    %423 = arith.mulf %397, %422 : vector<16x32xf32>
    %cst_121 = arith.constant dense<0.000000e+00> : vector<16xf32>
    %424 = vector.multi_reduction <add>, %423, %cst_121 [1] : vector<16x32xf32> to vector<16xf32>
    %425 = vector.shape_cast %424 : vector<16xf32> to vector<16x1xf32>
    %426 = arith.addf %401, %425 : vector<16x1xf32>
    %cst_122 = arith.constant 0.000000e+00 : f32
    %427 = vector.broadcast %cst_122 : f32 to vector<16x1xf32>
    %428 = arith.cmpf ogt, %426, %427 : vector<16x1xf32>
    %cst_123 = arith.constant 0.00999999977 : f32
    %429 = vector.broadcast %cst_123 : f32 to vector<16x1xf32>
    %430 = arith.mulf %429, %426 : vector<16x1xf32>
    %431 = arith.select %428, %426, %430 : vector<16x1xi1>, vector<16x1xf32>
    %432 = arith.maximumf %411, %421 : vector<16x1xf32>
    %433 = arith.maximumf %432, %431 : vector<16x1xf32>
    %434 = arith.subf %411, %433 : vector<16x1xf32>
    %435 = math.exp %434 : vector<16x1xf32>
    %436 = arith.subf %421, %433 : vector<16x1xf32>
    %437 = math.exp %436 : vector<16x1xf32>
    %438 = arith.subf %431, %433 : vector<16x1xf32>
    %439 = math.exp %438 : vector<16x1xf32>
    %440 = arith.addf %435, %437 : vector<16x1xf32>
    %441 = arith.addf %440, %439 : vector<16x1xf32>
    %442 = tpu.reciprocal %441 {approx = true} : vector<16x1xf32> -> vector<16x1xf32>
    %cst_124 = arith.constant 0.000000e+00 : f32
    %443 = vector.broadcast %cst_124 : f32 to vector<16x32xf32>
    %444 = arith.mulf %435, %442 : vector<16x1xf32>
    %445 = vector.broadcast %444 : vector<16x1xf32> to vector<16x32xf32>
    %446 = arith.mulf %445, %44 : vector<16x32xf32>
    %447 = arith.addf %443, %446 : vector<16x32xf32>
    %448 = arith.mulf %437, %442 : vector<16x1xf32>
    %449 = vector.broadcast %448 : vector<16x1xf32> to vector<16x32xf32>
    %450 = arith.mulf %449, %244 : vector<16x32xf32>
    %451 = arith.addf %447, %450 : vector<16x32xf32>
    %452 = arith.mulf %439, %442 : vector<16x1xf32>
    %453 = vector.broadcast %452 : vector<16x1xf32> to vector<16x32xf32>
    %454 = arith.mulf %453, %397 : vector<16x32xf32>
    %455 = arith.addf %451, %454 : vector<16x32xf32>
    %c0_125 = arith.constant 0 : index
    %c0_126 = arith.constant 0 : index
    %456 = vector.load %arg20[%c0_125, %c0_126] : memref<16x32xf32, #tpu.memory_space<vmem>>, vector<16x32xf32>
    tpu.vector_store %arg20[%c0_125, %c0_126], %455 {strides = array<i32>} : memref<16x32xf32, #tpu.memory_space<vmem>>, vector<16x32xf32>,
    return
  }
  func.func @transform_0(%arg0: i32) -> (i32, i32) {
    %c0_i32 = arith.constant 0 : i32
    %c0_i32_0 = arith.constant 0 : i32
    return %arg0, %c0_i32 : i32, i32
  }
  func.func @transform_1(%arg0: i32) -> (i32, i32, i32) {
    %c0_i32 = arith.constant 0 : i32
    %c0_i32_0 = arith.constant 0 : i32
    %c0_i32_1 = arith.constant 0 : i32
    return %c0_i32, %arg0, %c0_i32_0 : i32, i32, i32
  }
  func.func @transform_2(%arg0: i32) -> (i32, i32, i32) {
    %c0_i32 = arith.constant 0 : i32
    %c0_i32_0 = arith.constant 0 : i32
    %c0_i32_1 = arith.constant 0 : i32
    return %c0_i32, %arg0, %c0_i32_0 : i32, i32, i32
  }
  func.func @transform_3(%arg0: i32) -> (i32, i32) {
    %c0_i32 = arith.constant 0 : i32
    %c0_i32_0 = arith.constant 0 : i32
    %c0_i32_1 = arith.constant 0 : i32
    return %c0_i32, %c0_i32_0 : i32, i32
  }
  func.func @transform_4(%arg0: i32) -> (i32, i32) {
    %c0_i32 = arith.constant 0 : i32
    %c0_i32_0 = arith.constant 0 : i32
    %c0_i32_1 = arith.constant 0 : i32
    return %c0_i32, %c0_i32_0 : i32, i32
  }
  func.func @transform_5(%arg0: i32) -> (i32, i32) {
    %c0_i32 = arith.constant 0 : i32
    %c0_i32_0 = arith.constant 0 : i32
    %c0_i32_1 = arith.constant 0 : i32
    return %c0_i32, %c0_i32_0 : i32, i32
  }
  func.func @transform_6(%arg0: i32) -> (i32, i32) {
    %c0_i32 = arith.constant 0 : i32
    %c0_i32_0 = arith.constant 0 : i32
    %c0_i32_1 = arith.constant 0 : i32
    return %c0_i32, %c0_i32_0 : i32, i32
  }
  func.func @transform_7(%arg0: i32) -> (i32, i32) {
    %c0_i32 = arith.constant 0 : i32
    %c0_i32_0 = arith.constant 0 : i32
    %c0_i32_1 = arith.constant 0 : i32
    return %c0_i32, %c0_i32_0 : i32, i32
  }
  func.func @transform_8(%arg0: i32) -> (i32, i32) {
    %c0_i32 = arith.constant 0 : i32
    %c0_i32_0 = arith.constant 0 : i32
    %c0_i32_1 = arith.constant 0 : i32
    return %c0_i32, %c0_i32_0 : i32, i32
  }
  func.func @transform_9(%arg0: i32) -> (i32, i32) {
    %c0_i32 = arith.constant 0 : i32
    %c0_i32_0 = arith.constant 0 : i32
    %c0_i32_1 = arith.constant 0 : i32
    return %c0_i32, %c0_i32_0 : i32, i32
  }
  func.func @transform_10(%arg0: i32) -> (i32, i32) {
    %c0_i32 = arith.constant 0 : i32
    %c0_i32_0 = arith.constant 0 : i32
    %c0_i32_1 = arith.constant 0 : i32
    return %c0_i32, %c0_i32_0 : i32, i32
  }
  func.func @transform_11(%arg0: i32) -> (i32, i32) {
    %c0_i32 = arith.constant 0 : i32
    %c0_i32_0 = arith.constant 0 : i32
    %c0_i32_1 = arith.constant 0 : i32
    return %c0_i32, %c0_i32_0 : i32, i32
  }
  func.func @transform_12(%arg0: i32) -> (i32, i32) {
    %c0_i32 = arith.constant 0 : i32
    %c0_i32_0 = arith.constant 0 : i32
    %c0_i32_1 = arith.constant 0 : i32
    return %c0_i32, %c0_i32_0 : i32, i32
  }
  func.func @transform_13(%arg0: i32) -> (i32, i32) {
    %c0_i32 = arith.constant 0 : i32
    %c0_i32_0 = arith.constant 0 : i32
    %c0_i32_1 = arith.constant 0 : i32
    return %c0_i32, %c0_i32_0 : i32, i32
  }
  func.func @transform_14(%arg0: i32) -> (i32, i32) {
    %c0_i32 = arith.constant 0 : i32
    %c0_i32_0 = arith.constant 0 : i32
    %c0_i32_1 = arith.constant 0 : i32
    return %c0_i32, %c0_i32_0 : i32, i32
  }
  func.func @transform_15(%arg0: i32) -> (i32, i32) {
    %c0_i32 = arith.constant 0 : i32
    %c0_i32_0 = arith.constant 0 : i32
    %c0_i32_1 = arith.constant 0 : i32
    return %c0_i32, %c0_i32_0 : i32, i32
  }
  func.func @transform_16(%arg0: i32) -> (i32, i32) {
    %c0_i32 = arith.constant 0 : i32
    %c0_i32_0 = arith.constant 0 : i32
    %c0_i32_1 = arith.constant 0 : i32
    return %c0_i32, %c0_i32_0 : i32, i32
  }
  func.func @transform_17(%arg0: i32) -> (i32, i32) {
    %c0_i32 = arith.constant 0 : i32
    %c0_i32_0 = arith.constant 0 : i32
    %c0_i32_1 = arith.constant 0 : i32
    return %c0_i32, %c0_i32_0 : i32, i32
  }
  func.func @transform_18(%arg0: i32) -> (i32, i32) {
    %c0_i32 = arith.constant 0 : i32
    %c0_i32_0 = arith.constant 0 : i32
    %c0_i32_1 = arith.constant 0 : i32
    return %c0_i32, %c0_i32_0 : i32, i32
  }
  func.func @transform_19(%arg0: i32) -> (i32, i32) {
    %c0_i32 = arith.constant 0 : i32
    %c0_i32_0 = arith.constant 0 : i32
    return %arg0, %c0_i32 : i32, i32
  }
}

</mosaic_0001>

<bundles_post_ra>
// kernel: node_het_agg_batch.1
= control target key start
LH: loop header
LB: loop body
LE: loop exit
PB: predicated region body
PF: predicated region fallthrough
CT: control target
= control target key end

     0   :  { %vm115_vm0 = vcmask 392192   ;;  %vm154_vm1 = vcmask 261120   ;;  %s2568_s23 = smov 64   ;;  %s2569_s24 = smov 96   ;;  %s3274_s3 = inlined_call_operand.vmem [shape: bf16[48,32], index: 3, kind: input, shape index: {}]   ;;  %s3275_s4 = inlined_call_operand.vmem [shape: f32[1,32], index: 4, kind: input, shape index: {}]   ;;  %s3276_s1 = inlined_call_operand.vmem [shape: bf16[4,16,48], index: 1, kind: input, shape index: {}]   ;;  %s3277_s6 = inlined_call_operand.vmem [shape: f32[1,128], index: 6, kind: input, shape index: {}]   ;;  %s3278_s5 = inlined_call_operand.vmem [shape: bf16[32,128], index: 5, kind: input, shape index: {}]   ;;  %s3279_s0 = inlined_call_operand.vmem [shape: bf16[16,48], index: 0, kind: input, shape index: {}]   ;;  %s3280_s7 = inlined_call_operand.vmem [shape: bf16[32,128], index: 7, kind: input, shape index: {}]   ;;  %s3281_s8 = inlined_call_operand.vmem [shape: bf16[32,128], index: 8, kind: input, shape index: {}]   ;;  %s3282_s9 = inlined_call_operand.vmem [shape: f32[1,128], index: 9, kind: input, shape index: {}]   ;;  %s3283_s10 = inlined_call_operand.vmem [shape: bf16[40,32], index: 10, kind: input, shape index: {}]   ;;  %s3284_s2 = inlined_call_operand.vmem [shape: bf16[3,16,40], index: 2, kind: input, shape index: {}]   ;;  %s3285_s11 = inlined_call_operand.vmem [shape: f32[1,32], index: 11, kind: input, shape index: {}]   ;;  %s3286_s12 = inlined_call_operand.vmem [shape: bf16[32,128], index: 12, kind: input, shape index: {}]   ;;  %s3287_s13 = inlined_call_operand.vmem [shape: f32[1,128], index: 13, kind: input, shape index: {}]   ;;  %s3288_s14 = inlined_call_operand.vmem [shape: bf16[32,128], index: 14, kind: input, shape index: {}]   ;;  %s3289_s15 = inlined_call_operand.vmem [shape: bf16[32,128], index: 15, kind: input, shape index: {}]   ;;  %s3290_s16 = inlined_call_operand.vmem [shape: f32[1,128], index: 16, kind: input, shape index: {}]   ;;  %s3291_s18 = inlined_call_operand.vmem [shape: f32[1,32], index: 18, kind: input, shape index: {}]   ;;  %s3292_s17 = inlined_call_operand.vmem [shape: f32[1,32], index: 17, kind: input, shape index: {}]   ;;  %s3293_s19 = inlined_call_operand.vmem [shape: f32[16,32], index: 19, kind: output, shape index: {}]  }
   0x1   :  { %3297 = sst [smem:[#allocation2_spill]] %s3274_s3  ;;  %v2700_v4 = vld [vmem:[%s3278_s5 + $0x8] sm:$0xff]  ;;  %v2708_v5 = vld [vmem:[%s3278_s5] sm:$0xff] }
   0x2   :  { %3298 = sst [smem:[#allocation3_spill]] %s3275_s4  ;;  %277 = vmatpush.bf16.msra.mxu3 %v2700_v4  ;;  %164 = vmatpush.bf16.msra.mxu1 %v2700_v4  ;;  %v2273_v6 = vld [vmem:[%s3279_s0] sm:$0xff] }
   0x3   :  { %3299 = sst [smem:[#allocation4_spill]] %s3276_s1 }
   0x4   :  { %3300 = sst [smem:[#allocation5_spill]] %s3277_s6  ;;  %s2570_s6 = smov 32  }
   0x5   :  { %s3301_s20 = sld [smem:[#allocation2_spill]] }
   0x6   :  { %s3302_s25 = sld [smem:[#allocation4_spill]]  ;;  %278 = vmatpush.bf16.msra.mxu3 %v2708_v5  ;;  %165 = vmatpush.bf16.msra.mxu1 %v2708_v5 }
   0x7   :  { %s3304_s1 = sld [smem:[#allocation5_spill]] }
   0xb   :  { %v2675_v0 = vld [vmem:[%s3301_s20 + $0x10] sm:$0xff]  ;;  %v2681_v1 = vld [vmem:[%s3301_s20 + $0x8] sm:$0xff]  ;;  %v2688_v2 = vld [vmem:[%s3301_s20] sm:$0xff]  ;;  %s3303_s20 = sld [smem:[#allocation3_spill]] }
   0xc   :  { %258 = vmatpush.bf16.msra.mxu2 %v2675_v0  ;;  %124 = vmatpush.bf16.msra.mxu0 %v2675_v0  ;;  %v2283_v3 = vld [vmem:[%s3302_s25] sm:$0xff]  ;;  %v2284_v13 = vld [vmem:[%s3302_s25 + $0x8] sm:$0xff] }
   0xd   :  { %396 = vmatpush.bf16.msrb.mxu3 %v2675_v0  ;;  %v2737_v14 = vld [vmem:[%s3304_s1] ss:$0 sm:$0xff] }
  0x10   :  { %259 = vmatpush.bf16.msra.mxu2 %v2681_v1  ;;  %125 = vmatpush.bf16.msra.mxu0 %v2681_v1 }
  0x11   :  { %397 = vmatpush.bf16.msrb.mxu3 %v2681_v1  ;;  %v2723_v8 = vld [vmem:[%s3303_s20] ss:$0 sm:$0xff] }
  0x14   :  { %260 = vmatpush.bf16.msra.mxu2 %v2688_v2  ;;  %126 = vmatpush.bf16.msra.mxu0 %v2688_v2 }
  0x15   :  { %398 = vmatpush.bf16.msrb.mxu3 %v2688_v2 }
  0x17   :  { %2137 = vmatmul.msk.bf16.vlgmr.msra.gmra.mxu2 %vm115_vm0, %v2283_v3  ;;  %2121 = vmatmul.msk.bf16.vlgmr.msra.gmra.mxu0 %vm115_vm0, %v2273_v6 }
  0x18   :  { %415 = vmatpush.bf16.msrb.mxu0 %v2700_v4 }
  0x1c   :  { %416 = vmatpush.bf16.msrb.mxu0 %v2708_v5 }
  0x94   :  { %v128_v15 = vpop.f32.mrf.mxu0 }
  0x95   :  { %v129_v18 = vadd.f32 %v2723_v8, %v128_v15 }
  0x9a   :  { %v262_v7 = vpop.f32.mrf.mxu2 }
  0x9b   :  { %v263_v10 = vadd.f32 %v2723_v8, %v262_v7 }
  0x9c   :  { %v130_v19 = vpop.f32.mrf.mxu0 }
  0x9d   :  { %v131_v20 = vadd.f32 %v2723_v8, %v130_v19 }
  0x9f   :  { %v138_v22 = vpack.c.bf16 %v131_v20, %v129_v18 }
  0xa1   :  { %2130 = vmatmul.msk.bf16.vlgmr.msra.gmra.mxu1 %vm154_vm1, %v138_v22 }
  0xa2   :  { %v264_v9 = vpop.f32.mrf.mxu2 }
  0xa3   :  { %v265_v11 = vadd.f32 %v2723_v8, %v264_v9 }
  0xa5   :  { %v267_v12 = vpack.c.bf16 %v265_v11, %v263_v10 }
  0xa7   :  { %2138 = vmatmul.msk.bf16.vlgmr.msra.gmra.mxu3 %vm154_vm1, %v267_v12 }
  0xa8   :  { %541 = vmatpush.bf16.msra.mxu3 %v2700_v4 }
  0xac   :  { %542 = vmatpush.bf16.msra.mxu3 %v2708_v5 }
  0xb7   :  { %2156 = vmatmul.msk.bf16.vlgmr.msrb.gmra.mxu3 %vm115_vm0, %v2284_v13 }
 0x12a   :  { %v280_v16 = vpop.f32.mrf.mxu3 }
 0x12b   :  { %v281_v17 = vadd.f32 %v2737_v14, %v280_v16 }
 0x12d   :  { %2310 = vtanh.f32 %v281_v17  ;;  %v2139_v31 = vmul.f32 -1.442695, %v281_v17 }
 0x132   :  { %v282_v21 = vpop.f32.mrf.mxu3 }
 0x133   :  { %v2311_v23 = vpop.eup %2310  ;;  %v283_v24 = vadd.f32 %v2737_v14, %v282_v21 }
 0x134   :  { %327 = vrot.lane.b32.xlu0 %v2311_v23, %s2568_s23 }
 0x135   :  { %2312 = vtanh.f32 %v283_v24  ;;  %v2140_v32 = vmul.f32 -1.442695, %v283_v24 }
 0x136   :  { %2314 = vpow2.f32 %v2139_v31 }
 0x137   :  { %2316 = vpow2.f32 %v2140_v32 }
 0x13a   :  { %v400_v25 = vpop.f32.mrf.mxu3 }
 0x13b   :  { %v2313_v26 = vpop.eup %2312  ;;  %v401_v28 = vadd.f32 %v2723_v8, %v400_v25 }
 0x13c   :  { %329 = vrot.lane.b32.xlu0 %v2313_v26, %s2568_s23  ;;  %v2315_v33 = vpop.eup %2314 }
 0x13d   :  { %v291_v34 = vadd.f32 1.0, %v2315_v33  ;;  %v2317_v35 = vpop.eup %2316 }
 0x13e   :  { %v292_v36 = vadd.f32 1.0, %v2317_v35 }
 0x13f   :  { %2318 = vrcp.f32 %v291_v34  ;;  %v304_v45 = vand.u32 2147483648, %v291_v34  ;;  %vm298_vm3 = vweird.f32 %v291_v34  ;;  %v302_v46 = vand.u32 2147483647, %v291_v34 }
 0x140   :  { %2320 = vrcp.f32 %v292_v36  ;;  %v319_v54 = vand.u32 2147483648, %v292_v36  ;;  %vm313_vm7 = vweird.f32 %v292_v36  ;;  %v317_v55 = vand.u32 2147483647, %v292_v36 }
 0x141   :  { %v305_v49 = vor.u32 1.1754944e-38, %v304_v45  ;;  %vm303_vm5 = vcmp.eq.f32.partialorder %v302_v46, 8.507059e+37 }
 0x142   :  { %v402_v27 = vpop.f32.mrf.mxu3  ;;  %v320_v57 = vor.u32 1.1754944e-38, %v319_v54  ;;  %vm318_vm9 = vcmp.eq.f32.partialorder %v317_v55, 8.507059e+37  ;;  %v2778_v55 = vpop.f32.mrf.mxu1 }
 0x143   :  { %v403_v29 = vadd.f32 %v2723_v8, %v402_v27  ;;  %v2280_v27 = vld [vmem:[%s3280_s7 + $0x8] sm:$0xff] }
 0x144   :  { %372 = vmatpush.bf16.msrb.mxu1 %v2280_v27  ;;  %498 = vmatpush.bf16.msrb.mxu2 %v2280_v27 }
 0x145   :  { %v405_v30 = vpack.c.bf16 %v403_v29, %v401_v28  ;;  %v2319_v37 = vpop.eup %2318  ;;  %v2279_v28 = vld [vmem:[%s3280_s7] sm:$0xff]  ;;  %624 = vmatpush.bf16.msra.mxu0 %v2280_v27  ;;  %750 = vmatpush.bf16.msrb.mxu3 %v2280_v27 }
 0x146   :  { %v294_v38 = vmul.f32 %v2319_v37, %v291_v34  ;;  %v2321_v40 = vpop.eup %2320  ;;  %vm299_vm2 = vweird.f32 %v2319_v37 }
 0x147   :  { %2157 = vmatmul.msk.bf16.vlgmr.msrb.gmra.mxu0 %vm154_vm1, %v405_v30  ;;  %v309_v42 = vmul.f32 %v2321_v40, %v292_v36  ;;  %vm300_vm4 = vmor %vm298_vm3, %vm299_vm2  ;;  %vm314_vm6 = vweird.f32 %v2321_v40 }
 0x148   :  { %v295_v39 = vsub.f32 1.0, %v294_v38  ;;  %vm315_vm8 = vmor %vm313_vm7, %vm314_vm6  ;;  %373 = vmatpush.bf16.msrb.mxu1 %v2279_v28  ;;  %499 = vmatpush.bf16.msrb.mxu2 %v2279_v28 }
 0x149   :  { %v310_v44 = vsub.f32 1.0, %v309_v42  ;;  %625 = vmatpush.bf16.msra.mxu0 %v2279_v28  ;;  %751 = vmatpush.bf16.msrb.mxu3 %v2279_v28 }
 0x14a   :  { %v296_v41 = vmul.f32 %v2319_v37, %v295_v39 }
 0x14b   :  { %v311_v48 = vmul.f32 %v2321_v40, %v310_v44 }
 0x14c   :  { %v297_v43 = vadd.f32 %v2319_v37, %v296_v41  ;;  %522 = vmatpush.bf16.msra.mxu1 %v2675_v0  ;;  %648 = vmatpush.bf16.msra.mxu2 %v2675_v0 }
 0x14d   :  { %v312_v53 = vadd.f32 %v2321_v40, %v311_v48 }
 0x14e   :  { %v301_v47 = vsel %vm300_vm4, %v2319_v37, %v297_v43 }
 0x14f   :  { %v306_v51 = vsel %vm303_vm5, %v305_v49, %v301_v47  ;;  %v316_v56 = vsel %vm315_vm8, %v2321_v40, %v312_v53 }
 0x150   :  { %v321_v58 = vsel %vm318_vm9, %v320_v57, %v316_v56  ;;  %523 = vmatpush.bf16.msra.mxu1 %v2681_v1  ;;  %649 = vmatpush.bf16.msra.mxu2 %v2681_v1  ;;  %v2780_v56 = vpop.f32.mrf.mxu1 }
 0x154   :  { %524 = vmatpush.bf16.msra.mxu1 %v2688_v2  ;;  %650 = vmatpush.bf16.msra.mxu2 %v2688_v2  ;;  %v2285_v2 = vld [vmem:[%s3302_s25 + $0x10] sm:$0xff] }
 0x1a6   :  { %v328_v50 = vpop.permute.xlu0 %327 }
 0x1a7   :  { %v333_v52 = vmul.f32 %v328_v50, %v306_v51 }
 0x1a9   :  { %2322 = vtanh.f32 %v333_v52 }
 0x1ae   :  { %v330_v59 = vpop.permute.xlu0 %329 }
 0x1af   :  { %v2323_v60 = vpop.eup %2322  ;;  %v334_v61 = vmul.f32 %v330_v59, %v321_v58 }
 0x1b0   :  { %339 = vrot.lane.b32.xlu2 %v2323_v60, %s2569_s24 }
 0x1b1   :  { %2324 = vtanh.f32 %v334_v61 }
 0x1b7   :  { %v2325_v62 = vpop.eup %2324 }
 0x1b8   :  { %341 = vrot.lane.b32.xlu2 %v2325_v62, %s2569_s24 }
 0x1c4   :  { %v418_v63 = vpop.f32.mrf.mxu0 }
 0x1c5   :  { %v419_v3 = vadd.f32 %v2737_v14, %v418_v63  ;;  %v2286_v63 = vld [vmem:[%s3302_s25 + $0x18] sm:$0xff] }
 0x1c7   :  { %2326 = vtanh.f32 %v419_v3  ;;  %v2158_v13 = vmul.f32 -1.442695, %v419_v3 }
 0x1cc   :  { %v420_v6 = vpop.f32.mrf.mxu0 }
 0x1cd   :  { %v2327_v7 = vpop.eup %2326  ;;  %v421_v9 = vadd.f32 %v2737_v14, %v420_v6 }
 0x1ce   :  { %465 = vrot.lane.b32.xlu1 %v2327_v7, %s2568_s23 }
 0x1cf   :  { %2328 = vtanh.f32 %v421_v9  ;;  %v2159_v18 = vmul.f32 -1.442695, %v421_v9 }
 0x1d0   :  { %2330 = vpow2.f32 %v2158_v13 }
 0x1d1   :  { %2332 = vpow2.f32 %v2159_v18 }
 0x1d5   :  { %v2329_v10 = vpop.eup %2328 }
 0x1d6   :  { %467 = vrot.lane.b32.xlu1 %v2329_v10, %s2568_s23  ;;  %v2331_v19 = vpop.eup %2330 }
 0x1d7   :  { %v429_v20 = vadd.f32 1.0, %v2331_v19  ;;  %v2333_v21 = vpop.eup %2332 }
 0x1d8   :  { %v430_v22 = vadd.f32 1.0, %v2333_v21 }
 0x1d9   :  { %2334 = vrcp.f32 %v429_v20  ;;  %v442_v33 = vand.u32 2147483648, %v429_v20  ;;  %vm436_vm11 = vweird.f32 %v429_v20  ;;  %v440_v34 = vand.u32 2147483647, %v429_v20 }
 0x1da   :  { %2336 = vrcp.f32 %v430_v22  ;;  %v457_v0 = vand.u32 2147483648, %v430_v22  ;;  %vm451_vm15 = vweird.f32 %v430_v22  ;;  %v455_v42 = vand.u32 2147483647, %v430_v22 }
 0x1db   :  { %v443_v37 = vor.u32 1.1754944e-38, %v442_v33  ;;  %vm441_vm13 = vcmp.eq.f32.partialorder %v440_v34, 8.507059e+37 }
 0x1dc   :  { %v458_v44 = vor.u32 1.1754944e-38, %v457_v0  ;;  %vm456_vm3 = vcmp.eq.f32.partialorder %v455_v42, 8.507059e+37 }
 0x1df   :  { %v2335_v23 = vpop.eup %2334 }
 0x1e0   :  { %v432_v24 = vmul.f32 %v2335_v23, %v429_v20  ;;  %v2337_v26 = vpop.eup %2336  ;;  %vm437_vm10 = vweird.f32 %v2335_v23 }
 0x1e1   :  { %v447_v30 = vmul.f32 %v2337_v26, %v430_v22  ;;  %vm438_vm12 = vmor %vm436_vm11, %vm437_vm10  ;;  %vm452_vm14 = vweird.f32 %v2337_v26 }
 0x1e2   :  { %v433_v25 = vsub.f32 1.0, %v432_v24  ;;  %vm453_vm2 = vmor %vm451_vm15, %vm452_vm14 }
 0x1e3   :  { %v448_v32 = vsub.f32 1.0, %v447_v30 }
 0x1e4   :  { %v434_v29 = vmul.f32 %v2335_v23, %v433_v25 }
 0x1e5   :  { %v449_v36 = vmul.f32 %v2337_v26, %v448_v32 }
 0x1e6   :  { %v435_v31 = vadd.f32 %v2335_v23, %v434_v29 }
 0x1e7   :  { %v450_v41 = vadd.f32 %v2337_v26, %v449_v36 }
 0x1e8   :  { %v439_v35 = vsel %vm438_vm12, %v2335_v23, %v435_v31 }
 0x1e9   :  { %v444_v39 = vsel %vm441_vm13, %v443_v37, %v439_v35  ;;  %v454_v43 = vsel %vm453_vm2, %v2337_v26, %v450_v41 }
 0x1ea   :  { %v459_v1 = vsel %vm456_vm3, %v458_v44, %v454_v43 }
 0x20a   :  { %v340_v11 = vpop.permute.xlu2 %339 }
 0x20b   :  { %v345_v15 = vmul.f32 %v340_v11, %v306_v51 }
 0x212   :  { %v342_v12 = vpop.permute.xlu2 %341 }
 0x213   :  { %v346_v16 = vmul.f32 %v342_v12, %v321_v58 }
 0x215   :  { %v347_v17 = vpack.c.bf16 %v346_v16, %v345_v15 }
 0x217   :  { %349 = vrot.lane.b32.xlu2 %v347_v17, %s2570_s6 }
 0x240   :  { %v466_v38 = vpop.permute.xlu1 %465 }
 0x241   :  { %v471_v40 = vmul.f32 %v466_v38, %v444_v39 }
 0x243   :  { %2338 = vtanh.f32 %v471_v40 }
 0x248   :  { %v468_v45 = vpop.permute.xlu1 %467 }
 0x249   :  { %v2339_v46 = vpop.eup %2338  ;;  %v472_v47 = vmul.f32 %v468_v45, %v459_v1 }
 0x24a   :  { %477 = vrot.lane.b32.xlu0 %v2339_v46, %s2569_s24 }
 0x24b   :  { %2340 = vtanh.f32 %v472_v47 }
 0x251   :  { %v2341_v48 = vpop.eup %2340 }
 0x252   :  { %479 = vrot.lane.b32.xlu1 %v2341_v48, %s2569_s24 }
 0x271   :  { %v350_v49 = vpop.permute.xlu2 %349 }
 0x272   :  { %2149 = vmatmul.msk.bf16.vlgmr.msrb.gmra.mxu1 %vm154_vm1, %v350_v49 }
 0x273   :  { %667 = vmatpush.bf16.msrb.mxu1 %v2700_v4 }
 0x277   :  { %668 = vmatpush.bf16.msrb.mxu1 %v2708_v5 }
 0x282   :  { %2167 = vmatmul.msk.bf16.vlgmr.msra.gmra.mxu1 %vm115_vm0, %v2285_v2 }
 0x2bc   :  { %v478_v50 = vpop.permute.xlu0 %477 }
 0x2bd   :  { %v483_v52 = vmul.f32 %v478_v50, %v444_v39 }
 0x2c4   :  { %v480_v51 = vpop.permute.xlu1 %479 }
 0x2c5   :  { %v484_v53 = vmul.f32 %v480_v51, %v459_v1 }
 0x2c7   :  { %v485_v54 = vpack.c.bf16 %v484_v53, %v483_v52 }
 0x2c9   :  { %487 = vrot.lane.b32.xlu0 %v485_v54, %s2570_s6 }
 0x2ef   :  { %v2782_v4 = vpop.f32.mrf.mxu1 }
 0x2f7   :  { %v2784_v5 = vpop.f32.mrf.mxu1 }
 0x2ff   :  { %v526_v57 = vpop.f32.mrf.mxu1 }
 0x300   :  { %v527_v58 = vadd.f32 %v2723_v8, %v526_v57 }
 0x307   :  { %v528_v59 = vpop.f32.mrf.mxu1 }
 0x308   :  { %v529_v60 = vadd.f32 %v2723_v8, %v528_v59 }
 0x30a   :  { %v531_v61 = vpack.c.bf16 %v529_v60, %v527_v58 }
 0x30c   :  { %2168 = vmatmul.msk.bf16.vlgmr.msra.gmra.mxu3 %vm154_vm1, %v531_v61 }
 0x33b   :  { %v488_v62 = vpop.permute.xlu0 %487 }
 0x33c   :  { %2160 = vmatmul.msk.bf16.vlgmr.msrb.gmra.mxu2 %vm154_vm1, %v488_v62 }
 0x34c   :  { %2178 = vmatmul.msk.bf16.vlgmr.msra.gmra.mxu2 %vm115_vm0, %v2286_v63 }
 0x38f   :  { %v544_v3 = vpop.f32.mrf.mxu3 }
 0x390   :  { %v545_v6 = vadd.f32 %v2737_v14, %v544_v3 }
 0x392   :  { %2342 = vtanh.f32 %v545_v6  ;;  %v2169_v20 = vmul.f32 -1.442695, %v545_v6 }
 0x397   :  { %v546_v9 = vpop.f32.mrf.mxu3 }
 0x398   :  { %v2343_v7 = vpop.eup %2342  ;;  %v547_v10 = vadd.f32 %v2737_v14, %v546_v9 }
 0x399   :  { %591 = vrot.lane.b32.xlu1 %v2343_v7, %s2568_s23 }
 0x39a   :  { %2344 = vtanh.f32 %v547_v10  ;;  %v2170_v35 = vmul.f32 -1.442695, %v547_v10 }
 0x39b   :  { %2346 = vpow2.f32 %v2169_v20 }
 0x3a0   :  { %v2345_v12 = vpop.eup %2344 }
 0x3a1   :  { %593 = vrot.lane.b32.xlu2 %v2345_v12, %s2568_s23  ;;  %v2347_v21 = vpop.eup %2346 }
 0x3a2   :  { %v555_v22 = vadd.f32 1.0, %v2347_v21 }
 0x3a4   :  { %2348 = vrcp.f32 %v555_v22  ;;  %vm562_vm0 = vweird.f32 %v555_v22  ;;  %v568_v27 = vand.u32 2147483648, %v555_v22  ;;  %v566_v29 = vand.u32 2147483647, %v555_v22 }
 0x3a6   :  { %v569_v30 = vor.u32 1.1754944e-38, %v568_v27  ;;  %vm567_vm6 = vcmp.eq.f32.partialorder %v566_v29, 8.507059e+37 }
 0x3aa   :  { %v2349_v23 = vpop.eup %2348 }
 0x3ab   :  { %v558_v24 = vmul.f32 %v2349_v23, %v555_v22  ;;  %vm563_vm4 = vweird.f32 %v2349_v23 }
 0x3ac   :  { %vm564_vm5 = vmor %vm562_vm0, %vm563_vm4 }
 0x3ad   :  { %v559_v25 = vsub.f32 1.0, %v558_v24 }
 0x3af   :  { %v560_v26 = vmul.f32 %v2349_v23, %v559_v25 }
 0x3b1   :  { %v561_v28 = vadd.f32 %v2349_v23, %v560_v26 }
 0x3bf   :  { %v2797_v11 = vpop.f32.mrf.mxu2 }
 0x3c7   :  { %v2800_v13 = vpop.f32.mrf.mxu2 }
 0x3cf   :  { %v652_v15 = vpop.f32.mrf.mxu2 }
 0x3d0   :  { %v653_v17 = vadd.f32 %v2723_v8, %v652_v15 }
 0x3d7   :  { %v654_v16 = vpop.f32.mrf.mxu2 }
 0x3d8   :  { %v655_v18 = vadd.f32 %v2723_v8, %v654_v16  ;;  %v565_v8 = vsel %vm564_vm5, %v2349_v23, %v561_v28 }
 0x3d9   :  { %v2805_v31 = vsel %vm567_vm6, %v569_v30, %v565_v8 }
 0x3da   :  { %v657_v19 = vpack.c.bf16 %v655_v18, %v653_v17 }
 0x3dc   :  { %2179 = vmatmul.msk.bf16.vlgmr.msrb.gmra.mxu1 %vm154_vm1, %v657_v19 }
 0x3fb   :  { %v594_v47 = vpop.permute.xlu2 %593 }
 0x40b   :  { %v592_v32 = vpop.permute.xlu1 %591 }
 0x40c   :  { %v597_v33 = vmul.f32 %v592_v32, %v2805_v31 }
 0x40e   :  { %2350 = vtanh.f32 %v597_v33 }
 0x40f   :  { %2352 = vpow2.f32 %v2170_v35 }
 0x414   :  { %v2351_v34 = vpop.eup %2350 }
 0x415   :  { %603 = vrot.lane.b32.xlu2 %v2351_v34, %s2569_s24  ;;  %v2353_v36 = vpop.eup %2352 }
 0x416   :  { %v556_v37 = vadd.f32 1.0, %v2353_v36 }
 0x418   :  { %2354 = vrcp.f32 %v556_v37  ;;  %vm577_vm7 = vweird.f32 %v556_v37  ;;  %v583_v0 = vand.u32 2147483648, %v556_v37  ;;  %v581_v43 = vand.u32 2147483647, %v556_v37 }
 0x41a   :  { %v584_v44 = vor.u32 1.1754944e-38, %v583_v0  ;;  %vm582_vm10 = vcmp.eq.f32.partialorder %v581_v43, 8.507059e+37  ;;  %v2571_v43 = vmov 0  }
 0x41e   :  { %v2355_v38 = vpop.eup %2354 }
 0x41f   :  { %v573_v39 = vmul.f32 %v2355_v38, %v556_v37  ;;  %vm578_vm8 = vweird.f32 %v2355_v38  ;;  %v2282_v37 = vld [vmem:[%s3281_s8 + $0x8] sm:$0xff] }
 0x420   :  { %vm579_vm9 = vmor %vm577_vm7, %vm578_vm8  ;;  %783 = vmatpush.bf16.msrb.mxu0 %v2282_v37  ;;  %889 = vmatpush.bf16.msrb.mxu2 %v2282_v37 }
 0x421   :  { %v574_v40 = vsub.f32 1.0, %v573_v39  ;;  %992 = vmatpush.bf16.msra.mxu1 %v2282_v37  ;;  %1095 = vmatpush.bf16.msra.mxu3 %v2282_v37 }
 0x423   :  { %v575_v41 = vmul.f32 %v2355_v38, %v574_v40 }
 0x425   :  { %v576_v42 = vadd.f32 %v2355_v38, %v575_v41 }
 0x427   :  { %v580_v1 = vsel %vm579_vm9, %v2355_v38, %v576_v42 }
 0x428   :  { %v585_v48 = vsel %vm582_vm10, %v584_v44, %v580_v1 }
 0x429   :  { %v598_v49 = vmul.f32 %v594_v47, %v585_v48 }
 0x459   :  { %v670_v45 = vpop.f32.mrf.mxu1 }
 0x45a   :  { %v671_v46 = vadd.f32 %v2737_v14, %v670_v45  ;;  %v65_v45 = vlaneseq }
 0x45c   :  { %2356 = vtanh.f32 %v671_v46  ;;  %v2180_v54 = vmul.f32 -1.442695, %v671_v46  ;;  %v66_v47 = vand.u32 127, %v65_v45 }
 0x45d   :  { %2358 = vtanh.f32 %v598_v49 }
 0x461   :  { %v672_v2 = vpop.f32.mrf.mxu1 }
 0x462   :  { %v2357_v50 = vpop.eup %2356  ;;  %v673_v51 = vadd.f32 %v2737_v14, %v672_v2 }
 0x463   :  { %717 = vrot.lane.b32.xlu0 %v2357_v50, %s2568_s23  ;;  %v2359_v52 = vpop.eup %2358 }
 0x464   :  { %2360 = vtanh.f32 %v673_v51  ;;  %v2181_v57 = vmul.f32 -1.442695, %v673_v51  ;;  %v2841_v51 = vld [vmem:[%s3282_s9] ss:$0 sm:$0xff] }
 0x465   :  { %2362 = vpow2.f32 %v2180_v54 }
 0x466   :  { %2364 = vpow2.f32 %v2181_v57 }
 0x46a   :  { %v2361_v53 = vpop.eup %2360 }
 0x46b   :  { %605 = vrot.lane.b32.xlu0 %v2359_v52, %s2569_s24  ;;  %719 = vrot.lane.b32.xlu1 %v2361_v53, %s2568_s23  ;;  %v2363_v58 = vpop.eup %2362 }
 0x46c   :  { %v681_v59 = vadd.f32 1.0, %v2363_v58  ;;  %v2365_v60 = vpop.eup %2364 }
 0x46d   :  { %v682_v61 = vadd.f32 1.0, %v2365_v60 }
 0x46e   :  { %2366 = vrcp.f32 %v681_v59  ;;  %v694_v12 = vand.u32 2147483648, %v681_v59  ;;  %vm688_vm12 = vweird.f32 %v681_v59  ;;  %v692_v15 = vand.u32 2147483647, %v681_v59 }
 0x46f   :  { %2368 = vrcp.f32 %v682_v61  ;;  %v709_v23 = vand.u32 2147483648, %v682_v61  ;;  %vm703_vm2 = vweird.f32 %v682_v61  ;;  %v707_v24 = vand.u32 2147483647, %v682_v61  ;;  %v604_v26 = vpop.permute.xlu2 %603 }
 0x470   :  { %v695_v18 = vor.u32 1.1754944e-38, %v694_v12  ;;  %vm693_vm14 = vcmp.eq.f32.partialorder %v692_v15, 8.507059e+37  ;;  %v609_v32 = vmul.f32 %v604_v26, %v2805_v31  ;;  %v2281_v31 = vld [vmem:[%s3281_s8] sm:$0xff] }
 0x471   :  { %v710_v27 = vor.u32 1.1754944e-38, %v709_v23  ;;  %vm708_vm0 = vcmp.eq.f32.partialorder %v707_v24, 8.507059e+37  ;;  %784 = vmatpush.bf16.msrb.mxu0 %v2281_v31  ;;  %890 = vmatpush.bf16.msrb.mxu2 %v2281_v31 }
 0x472   :  { %993 = vmatpush.bf16.msra.mxu1 %v2281_v31  ;;  %1096 = vmatpush.bf16.msra.mxu3 %v2281_v31 }
 0x474   :  { %v2367_v14 = vpop.eup %2366 }
 0x475   :  { %v684_v62 = vmul.f32 %v2367_v14, %v681_v59  ;;  %v2369_v3 = vpop.eup %2368  ;;  %vm689_vm11 = vweird.f32 %v2367_v14 }
 0x476   :  { %v699_v7 = vmul.f32 %v2369_v3, %v682_v61  ;;  %vm690_vm13 = vmor %vm688_vm12, %vm689_vm11  ;;  %vm704_vm15 = vweird.f32 %v2369_v3 }
 0x477   :  { %v685_v63 = vsub.f32 1.0, %v684_v62  ;;  %vm705_vm3 = vmor %vm703_vm2, %vm704_vm15 }
 0x478   :  { %v700_v10 = vsub.f32 1.0, %v699_v7 }
 0x479   :  { %v686_v6 = vmul.f32 %v2367_v14, %v685_v63 }
 0x47a   :  { %v701_v17 = vmul.f32 %v2369_v3, %v700_v10 }
 0x47b   :  { %v687_v9 = vadd.f32 %v2367_v14, %v686_v6 }
 0x47c   :  { %v702_v22 = vadd.f32 %v2369_v3, %v701_v17 }
 0x47d   :  { %v691_v16 = vsel %vm690_vm13, %v2367_v14, %v687_v9  ;;  %vm1234_vm13 = vcmask 1043456  }
 0x47e   :  { %v696_v20 = vsel %vm693_vm14, %v695_v18, %v691_v16  ;;  %v706_v25 = vsel %vm705_vm3, %v2369_v3, %v702_v22  ;;  %vm1230_vm14 = vcmask 326656  }
 0x47f   :  { %v711_v29 = vsel %vm708_vm0, %v710_v27, %v706_v25 }
 0x4d5   :  { %v718_v19 = vpop.permute.xlu0 %717 }
 0x4d6   :  { %v723_v21 = vmul.f32 %v718_v19, %v696_v20 }
 0x4d8   :  { %2370 = vtanh.f32 %v723_v21 }
 0x4dd   :  { %v606_v28 = vpop.permute.xlu0 %605  ;;  %v720_v30 = vpop.permute.xlu1 %719 }
 0x4de   :  { %v2371_v8 = vpop.eup %2370  ;;  %v610_v33 = vmul.f32 %v606_v28, %v585_v48  ;;  %v724_v34 = vmul.f32 %v720_v30, %v711_v29  ;;  %v71_v48 = vand.u32 31, %v66_v47 }
 0x4df   :  { %729 = vrot.lane.b32.xlu1 %v2371_v8, %s2569_s24 }
 0x4e0   :  { %v611_v35 = vpack.c.bf16 %v610_v33, %v609_v32  ;;  %2372 = vtanh.f32 %v724_v34  ;;  %vm2832_vm4 = vcmp.lt.s32.totalorder %v71_v48, 16 }
 0x4e2   :  { %613 = vrot.lane.b32.xlu0 %v611_v35, %s2570_s6 }
 0x4e6   :  { %v2373_v36 = vpop.eup %2372 }
 0x4e7   :  { %731 = vrot.lane.b32.xlu2 %v2373_v36, %s2569_s24 }
 0x541   :  { %v732_v38 = vpop.permute.xlu2 %731 }
 0x542   :  { %v736_v40 = vmul.f32 %v732_v38, %v711_v29 }
 0x551   :  { %v730_v39 = vpop.permute.xlu1 %729 }
 0x552   :  { %v735_v41 = vmul.f32 %v730_v39, %v696_v20 }
 0x554   :  { %v737_v0 = vpack.c.bf16 %v736_v40, %v735_v41  ;;  %v614_v42 = vpop.permute.xlu0 %613 }
 0x555   :  { %2171 = vmatmul.msk.bf16.vlgmr.msra.gmra.mxu0 %vm154_vm1, %v614_v42 }
 0x556   :  { %739 = vrot.lane.b32.xlu1 %v737_v0, %s2570_s6 }
 0x565   :  { %785 = vmatmul.bf16.vlgmr.msrb.gmra.mxu0 %v2571_v43 }
 0x5c8   :  { %v740_v44 = vpop.permute.xlu1 %739 }
 0x5c9   :  { %2182 = vmatmul.msk.bf16.vlgmr.msrb.gmra.mxu3 %vm154_vm1, %v740_v44 }
 0x5d2   :  { %v2828_v1 = vpop.f32.mrf.mxu0 }
 0x5da   :  { %v2830_v46 = vpop.f32.mrf.mxu0 }
 0x5e2   :  { %v786_v49 = vpop.f32.mrf.mxu0 }
 0x5ea   :  { %v788_v58 = vpop.f32.mrf.mxu0 }
 0x64c   :  { %v2836_v50 = vpop.f32.mrf.mxu3 }
 0x64d   :  { %v760_v52 = vsel %vm2832_vm4, %v2782_v4, %v2836_v50 }
 0x64e   :  { %v791_v53 = vadd.f32 %v786_v49, %v760_v52 }
 0x650   :  { %v796_v54 = vadd.f32 %v2841_v51, %v791_v53  ;;  %v1189_v53 = vld [vmem:[%s3283_s10 + $0x10] sm:$0xf] }
 0x652   :  { %2374 = vtanh.f32 %v796_v54  ;;  %v2191_v63 = vmul.f32 -1.442695, %v796_v54  ;;  %v1224_v54 = vunpack.c.l.b16 %v1189_v53 }
 0x654   :  { %v2848_v57 = vpop.f32.mrf.mxu3 }
 0x655   :  { %v761_v59 = vsel %vm2832_vm4, %v2784_v5, %v2848_v57 }
 0x656   :  { %v792_v60 = vadd.f32 %v788_v58, %v761_v59  ;;  %v1227_v58 = vpack.c.b16 %v1224_v54, %v1224_v54 }
 0x658   :  { %v2375_v61 = vpop.eup %2374  ;;  %v797_v14 = vadd.f32 %v2841_v51, %v792_v60  ;;  %v1236_v59 = vsel %vm1234_vm13, %v1227_v58, 0  ;;  %v2288_v60 = vld [vmem:[%s3283_s10 + $0x8] sm:$0xff] }
 0x659   :  { %842 = vrot.lane.b32.xlu2 %v2375_v61, %s2568_s23  ;;  %1243 = vmatpush.bf16.msra.mxu0 %v1236_v59  ;;  %v2287_v61 = vld [vmem:[%s3283_s10] sm:$0xff] }
 0x65a   :  { %2376 = vtanh.f32 %v797_v14  ;;  %v2192_v12 = vmul.f32 -1.442695, %v797_v14  ;;  %1396 = vmatpush.bf16.msrb.mxu3 %v1236_v59  ;;  %v2295_v14 = vld [vmem:[%s3284_s2] sm:$0xff] }
 0x65b   :  { %2378 = vpow2.f32 %v2191_v63 }
 0x65d   :  { %1244 = vmatpush.bf16.msra.mxu0 %v2288_v60 }
 0x65e   :  { %1397 = vmatpush.bf16.msrb.mxu3 %v2288_v60 }
 0x660   :  { %v2377_v62 = vpop.eup %2376 }
 0x661   :  { %844 = vrot.lane.b32.xlu0 %v2377_v62, %s2568_s23  ;;  %v2379_v3 = vpop.eup %2378  ;;  %1245 = vmatpush.bf16.msra.mxu0 %v2287_v61 }
 0x662   :  { %v804_v6 = vadd.f32 1.0, %v2379_v3  ;;  %1398 = vmatpush.bf16.msrb.mxu3 %v2287_v61  ;;  %v2891_v3 = vld [vmem:[%s3286_s12 + $0x8] sm:$0xff] }
 0x663   :  { %1277 = vmatpush.bf16.msra.mxu2 %v2891_v3 }
 0x664   :  { %2380 = vrcp.f32 %v804_v6  ;;  %v817_v17 = vand.u32 2147483648, %v804_v6  ;;  %vm811_vm6 = vweird.f32 %v804_v6  ;;  %v815_v18 = vand.u32 2147483647, %v804_v6  ;;  %2214 = vmatmul.msk.bf16.vlgmr.msra.gmra.mxu0 %vm1230_vm14, %v2295_v14 }
 0x665   :  { %2382 = vpow2.f32 %v2192_v12  ;;  %1415 = vmatpush.bf16.msrb.mxu0 %v2891_v3 }
 0x666   :  { %v818_v21 = vor.u32 1.1754944e-38, %v817_v17  ;;  %vm816_vm8 = vcmp.eq.f32.partialorder %v815_v18, 8.507059e+37 }
 0x66a   :  { %v2381_v7 = vpop.eup %2380 }
 0x66b   :  { %v807_v9 = vmul.f32 %v2381_v7, %v804_v6  ;;  %vm812_vm5 = vweird.f32 %v2381_v7  ;;  %v2383_v19 = vpop.eup %2382  ;;  %v2897_v6 = vld [vmem:[%s3286_s12] sm:$0xff] }
 0x66c   :  { %vm813_vm7 = vmor %vm811_vm6, %vm812_vm5  ;;  %v805_v22 = vadd.f32 1.0, %v2383_v19  ;;  %1278 = vmatpush.bf16.msra.mxu2 %v2897_v6  ;;  %1416 = vmatpush.bf16.msrb.mxu0 %v2897_v6 }
 0x66d   :  { %v808_v10 = vsub.f32 1.0, %v807_v9 }
 0x66e   :  { %2384 = vrcp.f32 %v805_v22  ;;  %v832_v8 = vand.u32 2147483648, %v805_v22  ;;  %vm826_vm10 = vweird.f32 %v805_v22  ;;  %v830_v32 = vand.u32 2147483647, %v805_v22 }
 0x66f   :  { %v809_v15 = vmul.f32 %v2381_v7, %v808_v10  ;;  %v874_v10 = vsel %vm2832_vm4, %v2797_v11, %v2828_v1 }
 0x670   :  { %v833_v34 = vor.u32 1.1754944e-38, %v832_v8  ;;  %vm831_vm12 = vcmp.eq.f32.partialorder %v830_v32, 8.507059e+37 }
 0x671   :  { %v810_v16 = vadd.f32 %v2381_v7, %v809_v15 }
 0x673   :  { %v814_v20 = vsel %vm813_vm7, %v2381_v7, %v810_v16  ;;  %v2903_v7 = vld [vmem:[%s3285_s11] ss:$0 sm:$0xff] }
 0x674   :  { %v819_v24 = vsel %vm816_vm8, %v818_v21, %v814_v20  ;;  %v2385_v26 = vpop.eup %2384  ;;  %v875_v20 = vsel %vm2832_vm4, %v2800_v13, %v2830_v46 }
 0x675   :  { %v822_v27 = vmul.f32 %v2385_v26, %v805_v22  ;;  %vm827_vm9 = vweird.f32 %v2385_v26  ;;  %v838_v31 = vmul.f32 0.0, %v819_v24 }
 0x676   :  { %vm828_vm11 = vmor %vm826_vm10, %vm827_vm9 }
 0x677   :  { %v823_v28 = vsub.f32 1.0, %v822_v27 }
 0x679   :  { %v824_v29 = vmul.f32 %v2385_v26, %v823_v28 }
 0x67b   :  { %v825_v30 = vadd.f32 %v2385_v26, %v824_v29 }
 0x67d   :  { %v829_v33 = vsel %vm828_vm11, %v2385_v26, %v825_v30 }
 0x67e   :  { %v834_v36 = vsel %vm831_vm12, %v833_v34, %v829_v33 }
 0x67f   :  { %v839_v40 = vmul.f32 0.0, %v834_v36 }
 0x6b3   :  { %v843_v23 = vpop.permute.xlu2 %842 }
 0x6b4   :  { %v848_v25 = vmul.f32 %v843_v23, %v819_v24 }
 0x6b6   :  { %852 = vrot.lane.b32.xlu1 %v848_v25, %s2570_s6 }
 0x6d3   :  { %v845_v35 = vpop.permute.xlu0 %844 }
 0x6d4   :  { %v849_v37 = vmul.f32 %v845_v35, %v834_v36 }
 0x6d6   :  { %854 = vrot.lane.b32.xlu2 %v849_v37, %s2570_s6 }
 0x6e1   :  { %v1247_v63 = vpop.f32.mrf.mxu0 }
 0x6e2   :  { %v1248_v9 = vadd.f32 %v2903_v7, %v1247_v63 }
 0x6e9   :  { %v1249_v15 = vpop.f32.mrf.mxu0 }
 0x6ea   :  { %v1250_v17 = vadd.f32 %v2903_v7, %v1249_v15  ;;  %v2937_v15 = vld [vmem:[%s3287_s13] ss:$0 sm:$0xff] }
 0x6ec   :  { %v1252_v19 = vpack.c.bf16 %v1250_v17, %v1248_v9 }
 0x728   :  { %v853_v38 = vpop.permute.xlu1 %852 }
 0x729   :  { %v2859_v39 = vadd.f32 %v853_v38, %v838_v31 }
 0x72b   :  { %2386 = vtanh.f32 %v2859_v39 }
 0x730   :  { %v855_v41 = vpop.permute.xlu2 %854 }
 0x731   :  { %v2387_v0 = vpop.eup %2386  ;;  %v2862_v42 = vadd.f32 %v855_v41, %v839_v40 }
 0x732   :  { %864 = vrot.lane.b32.xlu0 %v2387_v0, %s2568_s23 }
 0x733   :  { %2388 = vtanh.f32 %v2862_v42 }
 0x739   :  { %v2389_v44 = vpop.eup %2388 }
 0x73a   :  { %866 = vrot.lane.b32.xlu1 %v2389_v44, %s2568_s23 }
 0x7a4   :  { %v865_v45 = vpop.permute.xlu0 %864 }
 0x7a5   :  { %v2867_v48 = vmul.f32 %v865_v45, %v819_v24 }
 0x7ac   :  { %v867_v47 = vpop.permute.xlu1 %866 }
 0x7ad   :  { %v2869_v49 = vmul.f32 %v867_v47, %v834_v36 }
 0x7af   :  { %v876_v52 = vpack.c.bf16 %v2869_v49, %v2867_v48 }
 0x7b1   :  { %878 = vrot.lane.b32.xlu2 %v876_v52, %s2570_s6 }
 0x80b   :  { %v879_v62 = vpop.permute.xlu2 %878 }
 0x80c   :  { %2193 = vmatmul.msk.bf16.vlgmr.msrb.gmra.mxu2 %vm154_vm1, %v879_v62 }
 0x80d   :  { %1502 = vmatpush.bf16.msrb.mxu2 %v1236_v59 }
 0x811   :  { %1503 = vmatpush.bf16.msrb.mxu2 %v2288_v60 }
 0x815   :  { %1504 = vmatpush.bf16.msrb.mxu2 %v2287_v61 }
 0x81c   :  { %2223 = vmatmul.msk.bf16.vlgmr.msra.gmra.mxu2 %vm154_vm1, %v1252_v19 }
 0x88f   :  { %v892_v12 = vpop.f32.mrf.mxu2 }
 0x890   :  { %v897_v16 = vadd.f32 %v892_v12, %v874_v10 }
 0x892   :  { %v899_v18 = vadd.f32 %v2841_v51, %v897_v16 }
 0x894   :  { %2390 = vtanh.f32 %v899_v18  ;;  %v2194_v26 = vmul.f32 -1.442695, %v899_v18 }
 0x897   :  { %v894_v21 = vpop.f32.mrf.mxu2 }
 0x898   :  { %v898_v22 = vadd.f32 %v894_v21, %v875_v20 }
 0x89a   :  { %v2391_v23 = vpop.eup %2390  ;;  %v900_v24 = vadd.f32 %v2841_v51, %v898_v22 }
 0x89b   :  { %945 = vrot.lane.b32.xlu0 %v2391_v23, %s2568_s23 }
 0x89c   :  { %2392 = vtanh.f32 %v900_v24  ;;  %v2195_v27 = vmul.f32 -1.442695, %v900_v24 }
 0x89d   :  { %2394 = vpow2.f32 %v2194_v26 }
 0x89e   :  { %2396 = vpow2.f32 %v2195_v27 }
 0x89f   :  { %v1280_v16 = vpop.f32.mrf.mxu2 }
 0x8a0   :  { %v1281_v17 = vadd.f32 %v2937_v15, %v1280_v16 }
 0x8a2   :  { %v2393_v25 = vpop.eup %2392  ;;  %v2224_v26 = vmul.f32 -1.442695, %v1281_v17 }
 0x8a3   :  { %947 = vrot.lane.b32.xlu1 %v2393_v25, %s2568_s23  ;;  %v2395_v28 = vpop.eup %2394 }
 0x8a4   :  { %v907_v29 = vadd.f32 1.0, %v2395_v28  ;;  %v2397_v30 = vpop.eup %2396 }
 0x8a5   :  { %v908_v8 = vadd.f32 1.0, %v2397_v30 }
 0x8a6   :  { %2398 = vrcp.f32 %v907_v29  ;;  %v920_v40 = vand.u32 2147483648, %v907_v29  ;;  %vm914_vm2 = vweird.f32 %v907_v29  ;;  %v918_v41 = vand.u32 2147483647, %v907_v29 }
 0x8a7   :  { %2400 = vrcp.f32 %v908_v8  ;;  %v935_v58 = vand.u32 2147483648, %v908_v8  ;;  %vm929_vm6 = vweird.f32 %v908_v8  ;;  %v933_v59 = vand.u32 2147483647, %v908_v8  ;;  %v1282_v22 = vpop.f32.mrf.mxu2 }
 0x8a8   :  { %v921_v45 = vor.u32 1.1754944e-38, %v920_v40  ;;  %vm919_vm0 = vcmp.eq.f32.partialorder %v918_v41, 8.507059e+37  ;;  %v1283_v23 = vadd.f32 %v2937_v15, %v1282_v22 }
 0x8a9   :  { %v936_v61 = vor.u32 1.1754944e-38, %v935_v58  ;;  %vm934_vm8 = vcmp.eq.f32.partialorder %v933_v59, 8.507059e+37 }
 0x8aa   :  { %v2225_v27 = vmul.f32 -1.442695, %v1283_v23 }
 0x8ac   :  { %v2399_v32 = vpop.eup %2398 }
 0x8ad   :  { %v910_v33 = vmul.f32 %v2399_v32, %v907_v29  ;;  %v2401_v35 = vpop.eup %2400  ;;  %vm915_vm15 = vweird.f32 %v2399_v32 }
 0x8ae   :  { %v925_v37 = vmul.f32 %v2401_v35, %v908_v8  ;;  %vm916_vm3 = vmor %vm914_vm2, %vm915_vm15  ;;  %vm930_vm5 = vweird.f32 %v2401_v35 }
 0x8af   :  { %v911_v34 = vsub.f32 1.0, %v910_v33  ;;  %vm931_vm7 = vmor %vm929_vm6, %vm930_vm5 }
 0x8b0   :  { %v926_v38 = vsub.f32 1.0, %v925_v37 }
 0x8b1   :  { %v912_v36 = vmul.f32 %v2399_v32, %v911_v34 }
 0x8b2   :  { %v927_v44 = vmul.f32 %v2401_v35, %v926_v38 }
 0x8b3   :  { %v913_v31 = vadd.f32 %v2399_v32, %v912_v36 }
 0x8b4   :  { %v928_v54 = vadd.f32 %v2401_v35, %v927_v44 }
 0x8b5   :  { %v917_v0 = vsel %vm916_vm3, %v2399_v32, %v913_v31 }
 0x8b6   :  { %v2922_v52 = vsel %vm919_vm0, %v921_v45, %v917_v0  ;;  %v932_v60 = vsel %vm931_vm7, %v2401_v35, %v928_v54 }
 0x8b7   :  { %v2926_v62 = vsel %vm934_vm8, %v936_v61, %v932_v60  ;;  %v941_v9 = vmul.f32 %v2922_v52, %v2859_v39 }
 0x8b8   :  { %v942_v39 = vmul.f32 %v2926_v62, %v2862_v42 }
 0x90d   :  { %v946_v47 = vpop.permute.xlu0 %945 }
 0x90e   :  { %v951_v53 = vmul.f32 %v946_v47, %v2922_v52 }
 0x910   :  { %955 = vrot.lane.b32.xlu2 %v951_v53, %s2570_s6 }
 0x915   :  { %v948_v14 = vpop.permute.xlu1 %947 }
 0x916   :  { %v952_v63 = vmul.f32 %v948_v14, %v2926_v62 }
 0x918   :  { %957 = vrot.lane.b32.xlu0 %v952_v63, %s2570_s6 }
 0x96a   :  { %v956_v10 = vpop.permute.xlu2 %955 }
 0x96b   :  { %v2932_v12 = vadd.f32 %v956_v10, %v941_v9 }
 0x96d   :  { %2402 = vtanh.f32 %v2932_v12 }
 0x96e   :  { %2404 = vtanh.f32 %v1281_v17 }
 0x973   :  { %v2403_v18 = vpop.eup %2402 }
 0x974   :  { %967 = vrot.lane.b32.xlu1 %v2403_v18, %s2568_s23  ;;  %v2405_v19 = vpop.eup %2404 }
 0x97c   :  { %1327 = vrot.lane.b32.xlu1 %v2405_v19, %s2568_s23 }
 0x98a   :  { %v958_v20 = vpop.permute.xlu0 %957 }
 0x98b   :  { %v2945_v21 = vadd.f32 %v958_v20, %v942_v39 }
 0x98d   :  { %2406 = vtanh.f32 %v2945_v21 }
 0x98e   :  { %2408 = vtanh.f32 %v1283_v23 }
 0x98f   :  { %2410 = vpow2.f32 %v2224_v26 }
 0x990   :  { %2412 = vpow2.f32 %v2225_v27  ;;  %v2971_v27 = vld [vmem:[%s3288_s14 + $0x8] sm:$0xff] }
 0x991   :  { %1372 = vmatpush.bf16.msrb.mxu1 %v2971_v27 }
 0x993   :  { %v2407_v24 = vpop.eup %2406 }
 0x994   :  { %969 = vrot.lane.b32.xlu2 %v2407_v24, %s2568_s23  ;;  %v2409_v25 = vpop.eup %2408 }
 0x995   :  { %v2411_v28 = vpop.eup %2410 }
 0x996   :  { %v1291_v42 = vadd.f32 1.0, %v2411_v28  ;;  %v2413_v29 = vpop.eup %2412  ;;  %v2977_v28 = vld [vmem:[%s3288_s14] sm:$0xff] }
 0x997   :  { %v1292_v30 = vadd.f32 1.0, %v2413_v29  ;;  %1373 = vmatpush.bf16.msrb.mxu1 %v2977_v28 }
 0x998   :  { %2414 = vrcp.f32 %v1291_v42  ;;  %vm1298_vm9 = vweird.f32 %v1291_v42  ;;  %v1304_v37 = vand.u32 2147483648, %v1291_v42  ;;  %v1302_v38 = vand.u32 2147483647, %v1291_v42 }
 0x999   :  { %2416 = vrcp.f32 %v1292_v30  ;;  %vm1313_vm13 = vweird.f32 %v1292_v30  ;;  %v1319_v53 = vand.u32 2147483648, %v1292_v30  ;;  %v1317_v58 = vand.u32 2147483647, %v1292_v30 }
 0x99a   :  { %v1305_v0 = vor.u32 1.1754944e-38, %v1304_v37  ;;  %vm1303_vm12 = vcmp.eq.f32.partialorder %v1302_v38, 8.507059e+37 }
 0x99b   :  { %v1320_v9 = vor.u32 1.1754944e-38, %v1319_v53  ;;  %vm1318_vm3 = vcmp.eq.f32.partialorder %v1317_v58, 8.507059e+37 }
 0x99c   :  { %1329 = vrot.lane.b32.xlu2 %v2409_v25, %s2568_s23 }
 0x99e   :  { %v2415_v8 = vpop.eup %2414 }
 0x99f   :  { %v1294_v32 = vmul.f32 %v2415_v8, %v1291_v42  ;;  %v2417_v34 = vpop.eup %2416  ;;  %vm1299_vm10 = vweird.f32 %v2415_v8  ;;  %v977_v42 = vsel %vm2832_vm4, %v2828_v1, %v2797_v11 }
 0x9a0   :  { %v1309_v36 = vmul.f32 %v2417_v34, %v1292_v30  ;;  %vm1300_vm11 = vmor %vm1298_vm9, %vm1299_vm10  ;;  %vm1314_vm15 = vweird.f32 %v2417_v34 }
 0x9a1   :  { %v1295_v33 = vsub.f32 1.0, %v1294_v32  ;;  %vm1315_vm2 = vmor %vm1313_vm13, %vm1314_vm15 }
 0x9a2   :  { %v1310_v40 = vsub.f32 1.0, %v1309_v36 }
 0x9a3   :  { %v1296_v35 = vmul.f32 %v2415_v8, %v1295_v33 }
 0x9a4   :  { %v1311_v45 = vmul.f32 %v2417_v34, %v1310_v40 }
 0x9a5   :  { %v1297_v31 = vadd.f32 %v2415_v8, %v1296_v35 }
 0x9a6   :  { %v1312_v54 = vadd.f32 %v2417_v34, %v1311_v45 }
 0x9a7   :  { %v1301_v44 = vsel %vm1300_vm11, %v2415_v8, %v1297_v31 }
 0x9a8   :  { %v1306_v47 = vsel %vm1303_vm12, %v1305_v0, %v1301_v44  ;;  %v1316_v16 = vsel %vm1315_vm2, %v2417_v34, %v1312_v54 }
 0x9a9   :  { %v1321_v17 = vsel %vm1318_vm3, %v1320_v9, %v1316_v16 }
 0x9e6   :  { %v968_v41 = vpop.permute.xlu1 %967 }
 0x9e7   :  { %v2952_v61 = vmul.f32 %v968_v41, %v2922_v52 }
 0x9ee   :  { %v970_v59 = vpop.permute.xlu2 %969  ;;  %v1328_v60 = vpop.permute.xlu1 %1327 }
 0x9ef   :  { %v2955_v14 = vmul.f32 %v970_v59, %v2926_v62  ;;  %v1333_v63 = vmul.f32 %v1328_v60, %v1306_v47  ;;  %v2297_v62 = vld [vmem:[%s3284_s2 + $0x10] sm:$0xff] }
 0x9f0   :  { %2251 = vmatmul.msk.bf16.vlgmr.msrb.gmra.mxu2 %vm1230_vm14, %v2297_v62 }
 0x9f1   :  { %v979_v10 = vpack.c.bf16 %v2955_v14, %v2952_v61  ;;  %2418 = vtanh.f32 %v1333_v63 }
 0x9f3   :  { %981 = vrot.lane.b32.xlu0 %v979_v10, %s2570_s6 }
 0x9f6   :  { %v1330_v18 = vpop.permute.xlu2 %1329 }
 0x9f7   :  { %v1334_v19 = vmul.f32 %v1330_v18, %v1321_v17  ;;  %v2419_v39 = vpop.eup %2418 }
 0x9f9   :  { %2420 = vtanh.f32 %v1334_v19 }
 0x9fb   :  { %1339 = vrot.lane.b32.xlu0 %v2419_v39, %s2569_s24 }
 0x9ff   :  { %v2421_v52 = vpop.eup %2420 }
 0xa00   :  { %1341 = vrot.lane.b32.xlu1 %v2421_v52, %s2569_s24 }
 0xa65   :  { %v982_v20 = vpop.permute.xlu0 %981 }
 0xa66   :  { %2196 = vmatmul.msk.bf16.vlgmr.msra.gmra.mxu1 %vm154_vm1, %v982_v20 }
 0xa67   :  { %1521 = vmatpush.bf16.msra.mxu1 %v2891_v3  ;;  %v978_v3 = vsel %vm2832_vm4, %v2830_v46, %v2800_v13 }
 0xa6b   :  { %1522 = vmatpush.bf16.msra.mxu1 %v2897_v6 }
 0xa6d   :  { %v1340_v22 = vpop.permute.xlu0 %1339 }
 0xa6e   :  { %v1345_v24 = vmul.f32 %v1340_v22, %v1306_v47 }
 0xa72   :  { %v1342_v23 = vpop.permute.xlu1 %1341 }
 0xa73   :  { %v1346_v25 = vmul.f32 %v1342_v23, %v1321_v17  ;;  %v1506_v8 = vpop.f32.mrf.mxu2 }
 0xa74   :  { %v1507_v36 = vadd.f32 %v2903_v7, %v1506_v8 }
 0xa75   :  { %v1347_v26 = vpack.c.bf16 %v1346_v25, %v1345_v24 }
 0xa77   :  { %1349 = vrot.lane.b32.xlu1 %v1347_v26, %s2570_s6 }
 0xa7b   :  { %v1508_v1 = vpop.f32.mrf.mxu2 }
 0xa7c   :  { %v1509_v37 = vadd.f32 %v2903_v7, %v1508_v1 }
 0xa7e   :  { %v1511_v38 = vpack.c.bf16 %v1509_v37, %v1507_v36 }
 0xae3   :  { %v995_v29 = vpop.f32.mrf.mxu1 }
 0xae4   :  { %v1000_v30 = vadd.f32 %v995_v29, %v977_v42 }
 0xae6   :  { %v1002_v32 = vadd.f32 %v2841_v51, %v1000_v30 }
 0xae8   :  { %2422 = vtanh.f32 %v1002_v32  ;;  %v2197_v13 = vmul.f32 -1.442695, %v1002_v32 }
 0xae9   :  { %v1350_v33 = vpop.permute.xlu1 %1349 }
 0xaea   :  { %2234 = vmatmul.msk.bf16.vlgmr.msrb.gmra.mxu1 %vm154_vm1, %v1350_v33 }
 0xaeb   :  { %v997_v6 = vpop.f32.mrf.mxu1  ;;  %1756 = vmatpush.bf16.msrb.mxu1 %v2971_v27 }
 0xaec   :  { %v1001_v34 = vadd.f32 %v997_v6, %v978_v3 }
 0xaee   :  { %v2423_v35 = vpop.eup %2422  ;;  %v1003_v11 = vadd.f32 %v2841_v51, %v1001_v34 }
 0xaef   :  { %1048 = vrot.lane.b32.xlu2 %v2423_v35, %s2568_s23  ;;  %1757 = vmatpush.bf16.msrb.mxu1 %v2977_v28 }
 0xaf0   :  { %2424 = vtanh.f32 %v1003_v11  ;;  %v2198_v44 = vmul.f32 -1.442695, %v1003_v11 }
 0xaf1   :  { %2426 = vpow2.f32 %v2197_v13 }
 0xaf6   :  { %v2425_v31 = vpop.eup %2424 }
 0xaf7   :  { %1050 = vrot.lane.b32.xlu0 %v2425_v31, %s2568_s23  ;;  %v2427_v46 = vpop.eup %2426 }
 0xaf8   :  { %v1010_v51 = vadd.f32 1.0, %v2427_v46 }
 0xafa   :  { %2252 = vmatmul.msk.bf16.vlgmr.msra.gmra.mxu1 %vm154_vm1, %v1511_v38  ;;  %2428 = vrcp.f32 %v1010_v51  ;;  %v1023_v53 = vand.u32 2147483648, %v1010_v51  ;;  %vm1017_vm5 = vweird.f32 %v1010_v51  ;;  %v1021_v54 = vand.u32 2147483647, %v1010_v51 }
 0xafb   :  { %2430 = vpow2.f32 %v2198_v44 }
 0xafc   :  { %v1024_v60 = vor.u32 1.1754944e-38, %v1023_v53  ;;  %vm1022_vm7 = vcmp.eq.f32.partialorder %v1021_v54, 8.507059e+37 }
 0xb00   :  { %v2429_v40 = vpop.eup %2428 }
 0xb01   :  { %v1013_v41 = vmul.f32 %v2429_v40, %v1010_v51  ;;  %vm1018_vm0 = vweird.f32 %v2429_v40  ;;  %v2431_v58 = vpop.eup %2430  ;;  %v975_v51 = vadd.f32 %v2952_v61, %v2867_v48 }
 0xb02   :  { %vm1019_vm6 = vmor %vm1017_vm5, %vm1018_vm0  ;;  %v1011_v63 = vadd.f32 1.0, %v2431_v58 }
 0xb03   :  { %v1014_v0 = vsub.f32 1.0, %v1013_v41 }
 0xb04   :  { %2432 = vrcp.f32 %v1011_v63  ;;  %v1038_v62 = vand.u32 2147483648, %v1011_v63  ;;  %vm1032_vm9 = vweird.f32 %v1011_v63  ;;  %v1036_v20 = vand.u32 2147483647, %v1011_v63 }
 0xb05   :  { %v1015_v45 = vmul.f32 %v2429_v40, %v1014_v0 }
 0xb06   :  { %v1039_v23 = vor.u32 1.1754944e-38, %v1038_v62  ;;  %vm1037_vm11 = vcmp.eq.f32.partialorder %v1036_v20, 8.507059e+37 }
 0xb07   :  { %v1016_v47 = vadd.f32 %v2429_v40, %v1015_v45 }
 0xb09   :  { %v1020_v59 = vsel %vm1019_vm6, %v2429_v40, %v1016_v47 }
 0xb0a   :  { %v1025_v9 = vsel %vm1022_vm7, %v1024_v60, %v1020_v59  ;;  %v2433_v17 = vpop.eup %2432 }
 0xb0b   :  { %v1028_v18 = vmul.f32 %v2433_v17, %v1011_v63  ;;  %vm1033_vm8 = vweird.f32 %v2433_v17  ;;  %v1044_v30 = vmul.f32 %v1025_v9, %v2932_v12 }
 0xb0c   :  { %vm1034_vm10 = vmor %vm1032_vm9, %vm1033_vm8 }
 0xb0d   :  { %v1029_v19 = vsub.f32 1.0, %v1028_v18 }
 0xb0f   :  { %v1030_v39 = vmul.f32 %v2433_v17, %v1029_v19  ;;  %v976_v19 = vadd.f32 %v2955_v14, %v2869_v49 }
 0xb11   :  { %v1031_v52 = vadd.f32 %v2433_v17, %v1030_v39 }
 0xb13   :  { %v1035_v22 = vsel %vm1034_vm10, %v2433_v17, %v1031_v52 }
 0xb14   :  { %v3001_v24 = vsel %vm1037_vm11, %v1039_v23, %v1035_v22 }
 0xb15   :  { %v1045_v35 = vmul.f32 %v3001_v24, %v2945_v21 }
 0xb49   :  { %v1049_v10 = vpop.permute.xlu2 %1048 }
 0xb4a   :  { %v1054_v16 = vmul.f32 %v1049_v10, %v1025_v9 }
 0xb4c   :  { %1058 = vrot.lane.b32.xlu2 %v1054_v16, %s2570_s6 }
 0xb67   :  { %v3005_v42 = vpop.f32.mrf.mxu1 }
 0xb69   :  { %v1051_v25 = vpop.permute.xlu0 %1050 }
 0xb6a   :  { %v1055_v26 = vmul.f32 %v1051_v25, %v3001_v24 }
 0xb6c   :  { %1060 = vrot.lane.b32.xlu0 %v1055_v26, %s2570_s6 }
 0xb6f   :  { %v3007_v29 = vpop.f32.mrf.mxu1 }
 0xb77   :  { %v1524_v33 = vpop.f32.mrf.mxu1 }
 0xb78   :  { %v1525_v3 = vadd.f32 %v2937_v15, %v1524_v33 }
 0xb7a   :  { %v2253_v38 = vmul.f32 -1.442695, %v1525_v3 }
 0xb7f   :  { %v1526_v1 = vpop.f32.mrf.mxu1 }
 0xb80   :  { %v1527_v36 = vadd.f32 %v2937_v15, %v1526_v1  ;;  %v2296_v1 = vld [vmem:[%s3284_s2 + $0x8] sm:$0xff] }
 0xb82   :  { %v2254_v13 = vmul.f32 -1.442695, %v1527_v36 }
 0xba6   :  { %v1059_v8 = vpop.permute.xlu2 %1058 }
 0xba7   :  { %v3010_v32 = vadd.f32 %v1059_v8, %v1044_v30 }
 0xba9   :  { %2434 = vtanh.f32 %v3010_v32 }
 0xbaa   :  { %2436 = vtanh.f32 %v1525_v3 }
 0xbaf   :  { %v2435_v6 = vpop.eup %2434 }
 0xbb0   :  { %1070 = vrot.lane.b32.xlu1 %v2435_v6, %s2568_s23  ;;  %v2437_v34 = vpop.eup %2436 }
 0xbb8   :  { %1571 = vrot.lane.b32.xlu1 %v2437_v34, %s2568_s23 }
 0xbde   :  { %v1061_v11 = vpop.permute.xlu0 %1060 }
 0xbdf   :  { %v3018_v12 = vadd.f32 %v1061_v11, %v1045_v35 }
 0xbe1   :  { %2438 = vtanh.f32 %v3018_v12 }
 0xbe2   :  { %2440 = vtanh.f32 %v1527_v36 }
 0xbe3   :  { %2442 = vpow2.f32 %v2253_v38 }
 0xbe4   :  { %2444 = vpow2.f32 %v2254_v13  ;;  %v1080_v13 = vsel %vm2832_vm4, %v2836_v50, %v2782_v4 }
 0xbe7   :  { %v2439_v37 = vpop.eup %2438 }
 0xbe8   :  { %1072 = vrot.lane.b32.xlu2 %v2439_v37, %s2568_s23  ;;  %v2441_v31 = vpop.eup %2440 }
 0xbe9   :  { %v2443_v46 = vpop.eup %2442 }
 0xbea   :  { %v1535_v40 = vadd.f32 1.0, %v2443_v46  ;;  %v2445_v44 = vpop.eup %2444 }
 0xbeb   :  { %v1536_v45 = vadd.f32 1.0, %v2445_v44 }
 0xbec   :  { %2446 = vrcp.f32 %v1535_v40  ;;  %vm1542_vm12 = vweird.f32 %v1535_v40  ;;  %v1548_v63 = vand.u32 2147483648, %v1535_v40  ;;  %v1546_v48 = vand.u32 2147483647, %v1535_v40 }
 0xbed   :  { %2448 = vrcp.f32 %v1536_v45  ;;  %vm1557_vm3 = vweird.f32 %v1536_v45  ;;  %v1563_v52 = vand.u32 2147483648, %v1536_v45  ;;  %v1561_v23 = vand.u32 2147483647, %v1536_v45 }
 0xbee   :  { %v1549_v61 = vor.u32 1.1754944e-38, %v1548_v63  ;;  %vm1547_vm2 = vcmp.eq.f32.partialorder %v1546_v48, 8.507059e+37 }
 0xbef   :  { %v1564_v8 = vor.u32 1.1754944e-38, %v1563_v52  ;;  %vm1562_vm6 = vcmp.eq.f32.partialorder %v1561_v23, 8.507059e+37 }
 0xbf0   :  { %1573 = vrot.lane.b32.xlu2 %v2441_v31, %s2568_s23 }
 0xbf2   :  { %v2447_v47 = vpop.eup %2446 }
 0xbf3   :  { %v1538_v53 = vmul.f32 %v2447_v47, %v1535_v40  ;;  %v2449_v54 = vpop.eup %2448  ;;  %vm1543_vm13 = vweird.f32 %v2447_v47 }
 0xbf4   :  { %v1553_v59 = vmul.f32 %v2449_v54, %v1536_v45  ;;  %vm1544_vm15 = vmor %vm1542_vm12, %vm1543_vm13  ;;  %vm1558_vm0 = vweird.f32 %v2449_v54 }
 0xbf5   :  { %v1539_v58 = vsub.f32 1.0, %v1538_v53  ;;  %vm1559_vm5 = vmor %vm1557_vm3, %vm1558_vm0 }
 0xbf6   :  { %v1554_v10 = vsub.f32 1.0, %v1553_v59 }
 0xbf7   :  { %v1540_v60 = vmul.f32 %v2447_v47, %v1539_v58 }
 0xbf9   :  { %v1541_v16 = vadd.f32 %v2447_v47, %v1540_v60 }
 0xbfb   :  { %v1545_v17 = vsel %vm1544_vm15, %v2447_v47, %v1541_v16 }
 0xbfc   :  { %v1550_v62 = vsel %vm1547_vm2, %v1549_v61, %v1545_v17 }
 0xc22   :  { %v1071_v21 = vpop.permute.xlu1 %1070 }
 0xc23   :  { %v1076_v41 = vmul.f32 %v1071_v21, %v1025_v9  ;;  %v1555_v9 = vmul.f32 %v2449_v54, %v1554_v10 }
 0xc25   :  { %v3026_v0 = vadd.f32 %v1076_v41, %v975_v51  ;;  %v1556_v22 = vadd.f32 %v2449_v54, %v1555_v9 }
 0xc27   :  { %v1560_v33 = vsel %vm1559_vm5, %v2449_v54, %v1556_v22  ;;  %v3068_v54 = vld [vmem:[%s3290_s16] ss:$0 sm:$0xff] }
 0xc28   :  { %v1565_v3 = vsel %vm1562_vm6, %v1564_v8, %v1560_v33 }
 0xc2a   :  { %v1572_v18 = vpop.permute.xlu1 %1571 }
 0xc2b   :  { %v1577_v25 = vmul.f32 %v1572_v18, %v1550_v62 }
 0xc2d   :  { %2450 = vtanh.f32 %v1577_v25 }
 0xc33   :  { %v2451_v6 = vpop.eup %2450 }
 0xc42   :  { %v1073_v39 = vpop.permute.xlu2 %1072 }
 0xc43   :  { %v1077_v20 = vmul.f32 %v1073_v39, %v3001_v24 }
 0xc45   :  { %v3031_v26 = vadd.f32 %v1077_v20, %v976_v19  ;;  %v1082_v30 = vpack.c.bf16 %v1077_v20, %v1076_v41 }
 0xc47   :  { %1084 = vrot.lane.b32.xlu0 %v1082_v30, %s2570_s6 }
 0xc4a   :  { %v1574_v49 = vpop.permute.xlu2 %1573 }
 0xc4b   :  { %v1578_v14 = vmul.f32 %v1574_v49, %v1565_v3 }
 0xc4d   :  { %2452 = vtanh.f32 %v1578_v14 }
 0xc4f   :  { %1583 = vrot.lane.b32.xlu0 %v2451_v6, %s2569_s24 }
 0xc53   :  { %v2453_v24 = vpop.eup %2452 }
 0xc54   :  { %1585 = vrot.lane.b32.xlu1 %v2453_v24, %s2569_s24 }
 0xcb9   :  { %v1085_v34 = vpop.permute.xlu0 %1084 }
 0xcba   :  { %2199 = vmatmul.msk.bf16.vlgmr.msra.gmra.mxu3 %vm154_vm1, %v1085_v34 }
 0xcbb   :  { %1604 = vmatpush.bf16.msra.mxu3 %v2971_v27  ;;  %v2294_v27 = vld [vmem:[%s3289_s15 + $0x8] sm:$0xff] }
 0xcbc   :  { %1632 = vmatpush.bf16.msra.mxu0 %v2294_v27  ;;  %1736 = vmatpush.bf16.msra.mxu2 %v2294_v27 }
 0xcbf   :  { %1605 = vmatpush.bf16.msra.mxu3 %v2977_v28  ;;  %v2293_v28 = vld [vmem:[%s3289_s15] sm:$0xff] }
 0xcc0   :  { %1633 = vmatpush.bf16.msra.mxu0 %v2293_v28  ;;  %1737 = vmatpush.bf16.msra.mxu2 %v2293_v28 }
 0xcc1   :  { %v1584_v35 = vpop.permute.xlu0 %1583 }
 0xcc2   :  { %v1589_v36 = vmul.f32 %v1584_v35, %v1550_v62 }
 0xcc6   :  { %v1586_v11 = vpop.permute.xlu1 %1585 }
 0xcc7   :  { %v1590_v37 = vmul.f32 %v1586_v11, %v1565_v3 }
 0xcc9   :  { %v1591_v31 = vpack.c.bf16 %v1590_v37, %v1589_v36 }
 0xcca   :  { %2241 = vmatmul.msk.bf16.vlgmr.msrb.gmra.mxu3 %vm1230_vm14, %v2296_v1 }
 0xccb   :  { %1593 = vrot.lane.b32.xlu2 %v1591_v31, %s2570_s6  ;;  %1857 = vmatpush.bf16.msrb.mxu3 %v2294_v27 }
 0xccf   :  { %1858 = vmatpush.bf16.msrb.mxu3 %v2293_v28 }
 0xd25   :  { %v1594_v38 = vpop.permute.xlu2 %1593 }
 0xd26   :  { %2255 = vmatmul.msk.bf16.vlgmr.msra.gmra.mxu3 %vm154_vm1, %v1594_v38 }
 0xd3d   :  { %v1098_v46 = vpop.f32.mrf.mxu3 }
 0xd3e   :  { %v3055_v21 = vadd.f32 %v1098_v46, %v1080_v13 }
 0xd45   :  { %v3057_v51 = vpop.f32.mrf.mxu3 }
 0xd4d   :  { %v1400_v40 = vpop.f32.mrf.mxu3 }
 0xd4e   :  { %v1401_v44 = vadd.f32 %v2903_v7, %v1400_v40 }
 0xd55   :  { %v1402_v41 = vpop.f32.mrf.mxu3 }
 0xd56   :  { %v1403_v45 = vadd.f32 %v2903_v7, %v1402_v41 }
 0xd58   :  { %v1405_v47 = vpack.c.bf16 %v1403_v45, %v1401_v44 }
 0xd5a   :  { %2242 = vmatmul.msk.bf16.vlgmr.msrb.gmra.mxu0 %vm154_vm1, %v1405_v47 }
 0xd6a   :  { %1634 = vmatmul.bf16.vlgmr.msra.gmra.mxu0 %v2571_v43 }
 0xda9   :  { %v3063_v53 = vpop.f32.mrf.mxu3 }
 0xdaa   :  { %v1612_v58 = vsel %vm2832_vm4, %v3005_v42, %v3063_v53 }
 0xdb1   :  { %v3075_v63 = vpop.f32.mrf.mxu3 }
 0xdb2   :  { %v1613_v43 = vsel %vm2832_vm4, %v3007_v29, %v3075_v63 }
 0xdd7   :  { %v1418_v4 = vpop.f32.mrf.mxu0 }
 0xdd8   :  { %v1419_v9 = vadd.f32 %v2937_v15, %v1418_v4 }
 0xdda   :  { %v2243_v20 = vmul.f32 -1.442695, %v1419_v9 }
 0xddf   :  { %v1420_v50 = vpop.f32.mrf.mxu0 }
 0xde0   :  { %v1421_v27 = vadd.f32 %v2937_v15, %v1420_v50 }
 0xde7   :  { %v1635_v7 = vpop.f32.mrf.mxu0 }
 0xde8   :  { %v1640_v59 = vadd.f32 %v1635_v7, %v1612_v58 }
 0xdea   :  { %v1645_v60 = vadd.f32 %v3068_v54, %v1640_v59 }
 0xdec   :  { %2454 = vtanh.f32 %v1645_v60  ;;  %v2264_v19 = vmul.f32 -1.442695, %v1645_v60 }
 0xdef   :  { %v1637_v10 = vpop.f32.mrf.mxu0 }
 0xdf0   :  { %v1641_v16 = vadd.f32 %v1637_v10, %v1613_v43 }
 0xdf2   :  { %v2455_v48 = vpop.eup %2454  ;;  %v1646_v61 = vadd.f32 %v3068_v54, %v1641_v16 }
 0xdf3   :  { %1691 = vrot.lane.b32.xlu0 %v2455_v48, %s2568_s23 }
 0xdf4   :  { %2456 = vtanh.f32 %v1646_v61  ;;  %v2265_v39 = vmul.f32 -1.442695, %v1646_v61 }
 0xdf5   :  { %2458 = vtanh.f32 %v1419_v9 }
 0xdf6   :  { %2460 = vpow2.f32 %v2264_v19  ;;  %v2244_v19 = vmul.f32 -1.442695, %v1421_v27 }
 0xdf7   :  { %2462 = vpow2.f32 %v2265_v39 }
 0xdfa   :  { %v2457_v17 = vpop.eup %2456 }
 0xdfb   :  { %1693 = vrot.lane.b32.xlu1 %v2457_v17, %s2568_s23  ;;  %v2459_v18 = vpop.eup %2458 }
 0xdfc   :  { %v2461_v52 = vpop.eup %2460 }
 0xdfd   :  { %v1653_v62 = vadd.f32 1.0, %v2461_v52  ;;  %v2463_v22 = vpop.eup %2462 }
 0xdfe   :  { %v1654_v23 = vadd.f32 1.0, %v2463_v22 }
 0xdff   :  { %2464 = vrcp.f32 %v1653_v62  ;;  %v1666_v11 = vand.u32 2147483648, %v1653_v62  ;;  %vm1660_vm7 = vweird.f32 %v1653_v62  ;;  %v1664_v1 = vand.u32 2147483647, %v1653_v62 }
 0xe00   :  { %2466 = vpow2.f32 %v2243_v20  ;;  %v1681_v44 = vand.u32 2147483648, %v1654_v23  ;;  %vm1675_vm11 = vweird.f32 %v1654_v23  ;;  %v1679_v45 = vand.u32 2147483647, %v1654_v23 }
 0xe01   :  { %2468 = vrcp.f32 %v1654_v23  ;;  %v1667_v38 = vor.u32 1.1754944e-38, %v1666_v11  ;;  %vm1665_vm9 = vcmp.eq.f32.partialorder %v1664_v1, 8.507059e+37 }
 0xe02   :  { %v1682_v58 = vor.u32 1.1754944e-38, %v1681_v44  ;;  %vm1680_vm13 = vcmp.eq.f32.partialorder %v1679_v45, 8.507059e+37 }
 0xe03   :  { %1465 = vrot.lane.b32.xlu1 %v2459_v18, %s2568_s23 }
 0xe05   :  { %v2465_v25 = vpop.eup %2464 }
 0xe06   :  { %v2467_v30 = vpop.eup %2466  ;;  %v1656_v8 = vmul.f32 %v2465_v25, %v1653_v62  ;;  %vm1661_vm14 = vweird.f32 %v2465_v25 }
 0xe07   :  { %v1429_v33 = vadd.f32 1.0, %v2467_v30  ;;  %v2469_v49 = vpop.eup %2468  ;;  %vm1662_vm8 = vmor %vm1660_vm7, %vm1661_vm14 }
 0xe08   :  { %v1657_v3 = vsub.f32 1.0, %v1656_v8  ;;  %v1671_v6 = vmul.f32 %v2469_v49, %v1654_v23  ;;  %vm1676_vm10 = vweird.f32 %v2469_v49 }
 0xe09   :  { %2470 = vrcp.f32 %v1429_v33  ;;  %vm1677_vm12 = vmor %vm1675_vm11, %vm1676_vm10  ;;  %v1442_v43 = vand.u32 2147483648, %v1429_v33  ;;  %vm1436_vm2 = vweird.f32 %v1429_v33  ;;  %v1440_v10 = vand.u32 2147483647, %v1429_v33 }
 0xe0a   :  { %v1658_v14 = vmul.f32 %v2465_v25, %v1657_v3  ;;  %v1672_v34 = vsub.f32 1.0, %v1671_v6  ;;  %2472 = vtanh.f32 %v1421_v27 }
 0xe0b   :  { %v1443_v48 = vor.u32 1.1754944e-38, %v1442_v43  ;;  %vm1441_vm0 = vcmp.eq.f32.partialorder %v1440_v10, 8.507059e+37 }
 0xe0c   :  { %v1659_v24 = vadd.f32 %v2465_v25, %v1658_v14  ;;  %v1673_v37 = vmul.f32 %v2469_v49, %v1672_v34 }
 0xe0e   :  { %v1663_v36 = vsel %vm1662_vm8, %v2465_v25, %v1659_v24  ;;  %v1674_v40 = vadd.f32 %v2469_v49, %v1673_v37 }
 0xe0f   :  { %v2471_v35 = vpop.eup %2470  ;;  %v3087_v13 = vsel %vm1665_vm9, %v1667_v38, %v1663_v36 }
 0xe10   :  { %v1432_v31 = vmul.f32 %v2471_v35, %v1429_v33  ;;  %v1678_v47 = vsel %vm1677_vm12, %v2469_v49, %v1674_v40  ;;  %vm1437_vm15 = vweird.f32 %v2471_v35  ;;  %v2473_v60 = vpop.eup %2472  ;;  %v1687_v25 = vmul.f32 0.0, %v3087_v13 }
 0xe11   :  { %v3091_v50 = vsel %vm1680_vm13, %v1682_v58, %v1678_v47  ;;  %vm1438_vm3 = vmor %vm1436_vm2, %vm1437_vm15 }
 0xe12   :  { %v1433_v41 = vsub.f32 1.0, %v1432_v31  ;;  %v1688_v36 = vmul.f32 0.0, %v3091_v50 }
 0xe14   :  { %v1434_v4 = vmul.f32 %v2471_v35, %v1433_v41 }
 0xe16   :  { %v1435_v59 = vadd.f32 %v2471_v35, %v1434_v4 }
 0xe18   :  { %v1439_v16 = vsel %vm1438_vm3, %v2471_v35, %v1435_v59 }
 0xe19   :  { %v1444_v61 = vsel %vm1441_vm0, %v1443_v48, %v1439_v16 }
 0xe65   :  { %v1692_v28 = vpop.permute.xlu0 %1691 }
 0xe66   :  { %v1697_v46 = vmul.f32 %v1692_v28, %v3087_v13 }
 0xe68   :  { %1701 = vrot.lane.b32.xlu2 %v1697_v46, %s2570_s6 }
 0xe6d   :  { %v1694_v15 = vpop.permute.xlu1 %1693 }
 0xe6e   :  { %v1698_v7 = vmul.f32 %v1694_v15, %v3091_v50 }
 0xe70   :  { %1467 = vrot.lane.b32.xlu2 %v2473_v60, %s2568_s23  ;;  %1703 = vrot.lane.b32.xlu0 %v1698_v7, %s2570_s6 }
 0xe75   :  { %v1466_v9 = vpop.permute.xlu1 %1465 }
 0xe76   :  { %v1471_v17 = vmul.f32 %v1466_v9, %v1444_v61 }
 0xe78   :  { %2474 = vtanh.f32 %v1471_v17 }
 0xe79   :  { %2476 = vpow2.f32 %v2244_v19 }
 0xe7e   :  { %v2475_v18 = vpop.eup %2474 }
 0xe7f   :  { %1477 = vrot.lane.b32.xlu2 %v2475_v18, %s2569_s24  ;;  %v2477_v39 = vpop.eup %2476 }
 0xe80   :  { %v1430_v52 = vadd.f32 1.0, %v2477_v39 }
 0xe82   :  { %2478 = vrcp.f32 %v1430_v52  ;;  %v1457_v3 = vand.u32 2147483648, %v1430_v52  ;;  %vm1451_vm6 = vweird.f32 %v1430_v52  ;;  %v1455_v49 = vand.u32 2147483647, %v1430_v52 }
 0xe84   :  { %v1458_v6 = vor.u32 1.1754944e-38, %v1457_v3  ;;  %vm1456_vm7 = vcmp.eq.f32.partialorder %v1455_v49, 8.507059e+37 }
 0xe88   :  { %v2479_v62 = vpop.eup %2478 }
 0xe89   :  { %v1447_v20 = vmul.f32 %v2479_v62, %v1430_v52  ;;  %vm1452_vm5 = vweird.f32 %v2479_v62 }
 0xe8a   :  { %vm1453_vm14 = vmor %vm1451_vm6, %vm1452_vm5 }
 0xe8b   :  { %v1448_v22 = vsub.f32 1.0, %v1447_v20 }
 0xe8d   :  { %v1449_v23 = vmul.f32 %v2479_v62, %v1448_v22 }
 0xe8f   :  { %v1450_v33 = vadd.f32 %v2479_v62, %v1449_v23 }
 0xe91   :  { %v1454_v14 = vsel %vm1453_vm14, %v2479_v62, %v1450_v33 }
 0xe92   :  { %v1459_v24 = vsel %vm1456_vm7, %v1458_v6, %v1454_v14 }
 0xec2   :  { %v1702_v30 = vpop.permute.xlu2 %1701 }
 0xec3   :  { %v3098_v8 = vadd.f32 %v1702_v30, %v1687_v25 }
 0xec5   :  { %2480 = vtanh.f32 %v3098_v8 }
 0xeca   :  { %v1468_v34 = vpop.permute.xlu2 %1467 }
 0xecb   :  { %v2481_v35 = vpop.eup %2480  ;;  %v1472_v11 = vmul.f32 %v1468_v34, %v1459_v24 }
 0xecc   :  { %1713 = vrot.lane.b32.xlu0 %v2481_v35, %s2568_s23 }
 0xecd   :  { %2482 = vtanh.f32 %v1472_v11 }
 0xed3   :  { %v2483_v1 = vpop.eup %2482 }
 0xed4   :  { %1479 = vrot.lane.b32.xlu0 %v2483_v1, %s2569_s24 }
 0xed9   :  { %v1478_v28 = vpop.permute.xlu2 %1477 }
 0xeda   :  { %v1483_v40 = vmul.f32 %v1478_v28, %v1444_v61 }
 0xee2   :  { %v1704_v37 = vpop.permute.xlu0 %1703 }
 0xee3   :  { %v3104_v31 = vadd.f32 %v1704_v37, %v1688_v36 }
 0xee5   :  { %2484 = vtanh.f32 %v3104_v31 }
 0xeeb   :  { %v2485_v38 = vpop.eup %2484 }
 0xeec   :  { %1715 = vrot.lane.b32.xlu1 %v2485_v38, %s2568_s23 }
 0xf3e   :  { %v1714_v27 = vpop.permute.xlu0 %1713 }
 0xf3f   :  { %v3110_v47 = vmul.f32 %v1714_v27, %v3087_v13 }
 0xf46   :  { %v1480_v46 = vpop.permute.xlu0 %1479 }
 0xf47   :  { %v1484_v41 = vmul.f32 %v1480_v46, %v1459_v24 }
 0xf49   :  { %v1485_v44 = vpack.c.bf16 %v1484_v41, %v1483_v40 }
 0xf4b   :  { %1745 = vrot.lane.b32.xlu2 %v1485_v44, %s2570_s6 }
 0xf5e   :  { %v1716_v45 = vpop.permute.xlu1 %1715 }
 0xf5f   :  { %v3113_v4 = vmul.f32 %v1716_v45, %v3091_v50 }
 0xf61   :  { %v1723_v58 = vpack.c.bf16 %v3113_v4, %v3110_v47 }
 0xf63   :  { %1725 = vrot.lane.b32.xlu1 %v1723_v58, %s2570_s6 }
 0xfa5   :  { %v1746_v15 = vpop.permute.xlu2 %1745 }
 0xfa6   :  { %2267 = vmatmul.msk.bf16.vlgmr.msrb.gmra.mxu1 %vm154_vm1, %v1746_v15 }
 0xfd5   :  { %v1726_v7 = vpop.permute.xlu1 %1725 }
 0xfd6   :  { %2266 = vmatmul.msk.bf16.vlgmr.msra.gmra.mxu2 %vm154_vm1, %v1726_v7  ;;  %v2566_v7 = vld [vmem:[%s3282_s9] ss:$0 sm:$0xff] }
0x1023   :  { %v1759_v59 = vpop.f32.mrf.mxu1 }
0x102b   :  { %v1761_v10 = vpop.f32.mrf.mxu1 }
0x1059   :  { %v1739_v60 = vpop.f32.mrf.mxu2 }
0x105a   :  { %v1760_v43 = vadd.f32 %v1759_v59, %v1739_v60  ;;  %v1105_v59 = vadd.f32 %v2566_v7, %v3055_v21 }
0x105c   :  { %v1764_v13 = vadd.f32 %v3068_v54, %v1760_v43 }
0x105e   :  { %2486 = vtanh.f32 %v1764_v13  ;;  %v2268_v17 = vmul.f32 -1.442695, %v1764_v13 }
0x1061   :  { %v1741_v50 = vpop.f32.mrf.mxu2 }
0x1062   :  { %v1762_v16 = vadd.f32 %v1761_v10, %v1741_v50  ;;  %v1081_v50 = vsel %vm2832_vm4, %v2848_v57, %v2784_v5 }
0x1064   :  { %v2487_v48 = vpop.eup %2486  ;;  %v1765_v61 = vadd.f32 %v3068_v54, %v1762_v16  ;;  %v1104_v16 = vadd.f32 %v3057_v51, %v1081_v50 }
0x1065   :  { %1810 = vrot.lane.b32.xlu0 %v2487_v48, %s2568_s23 }
0x1066   :  { %2488 = vtanh.f32 %v1765_v61  ;;  %v2269_v18 = vmul.f32 -1.442695, %v1765_v61  ;;  %v1106_v21 = vadd.f32 %v2566_v7, %v1104_v16 }
0x1067   :  { %2490 = vpow2.f32 %v2268_v17 }
0x1068   :  { %2492 = vpow2.f32 %v2269_v18 }
0x106c   :  { %v2489_v9 = vpop.eup %2488 }
0x106d   :  { %1812 = vrot.lane.b32.xlu1 %v2489_v9, %s2568_s23  ;;  %v2491_v19 = vpop.eup %2490 }
0x106e   :  { %v1772_v39 = vadd.f32 1.0, %v2491_v19  ;;  %v2493_v52 = vpop.eup %2492 }
0x106f   :  { %v1773_v62 = vadd.f32 1.0, %v2493_v52 }
0x1070   :  { %2494 = vrcp.f32 %v1772_v39  ;;  %v1785_v14 = vand.u32 2147483648, %v1772_v39  ;;  %vm1779_vm9 = vweird.f32 %v1772_v39  ;;  %v1783_v6 = vand.u32 2147483647, %v1772_v39 }
0x1071   :  { %2496 = vrcp.f32 %v1773_v62  ;;  %v1800_v38 = vand.u32 2147483648, %v1773_v62  ;;  %vm1794_vm13 = vweird.f32 %v1773_v62  ;;  %v1798_v27 = vand.u32 2147483647, %v1773_v62 }
0x1072   :  { %v1786_v35 = vor.u32 1.1754944e-38, %v1785_v14  ;;  %vm1784_vm11 = vcmp.eq.f32.partialorder %v1783_v6, 8.507059e+37 }
0x1073   :  { %v1801_v46 = vor.u32 1.1754944e-38, %v1800_v38  ;;  %vm1799_vm2 = vcmp.eq.f32.partialorder %v1798_v27, 8.507059e+37 }
0x1076   :  { %v2495_v20 = vpop.eup %2494 }
0x1077   :  { %v1775_v22 = vmul.f32 %v2495_v20, %v1772_v39  ;;  %v2497_v25 = vpop.eup %2496  ;;  %vm1780_vm8 = vweird.f32 %v2495_v20 }
0x1078   :  { %v1790_v33 = vmul.f32 %v2497_v25, %v1773_v62  ;;  %vm1781_vm10 = vmor %vm1779_vm9, %vm1780_vm8  ;;  %vm1795_vm12 = vweird.f32 %v2497_v25 }
0x1079   :  { %v1776_v23 = vsub.f32 1.0, %v1775_v22  ;;  %vm1796_vm15 = vmor %vm1794_vm13, %vm1795_vm12 }
0x107a   :  { %v1791_v49 = vsub.f32 1.0, %v1790_v33 }
0x107b   :  { %v1777_v30 = vmul.f32 %v2495_v20, %v1776_v23 }
0x107c   :  { %v1792_v34 = vmul.f32 %v2497_v25, %v1791_v49 }
0x107d   :  { %v1778_v3 = vadd.f32 %v2495_v20, %v1777_v30 }
0x107e   :  { %v1793_v37 = vadd.f32 %v2497_v25, %v1792_v34 }
0x107f   :  { %v1782_v24 = vsel %vm1781_vm10, %v2495_v20, %v1778_v3 }
0x1080   :  { %v1787_v1 = vsel %vm1784_vm11, %v1786_v35, %v1782_v24  ;;  %v1797_v28 = vsel %vm1796_vm15, %v2497_v25, %v1793_v37  ;;  %v2201_v24 = vmul.f32 -1.442695, %v1106_v21 }
0x1081   :  { %v1802_v41 = vsel %vm1799_vm2, %v1801_v46, %v1797_v28  ;;  %v1806_v45 = vmul.f32 %v1787_v1, %v3098_v8 }
0x1082   :  { %v1807_v8 = vmul.f32 %v1802_v41, %v3104_v31  ;;  %v2200_v31 = vmul.f32 -1.442695, %v1105_v59 }
0x10d7   :  { %v1811_v11 = vpop.permute.xlu0 %1810 }
0x10d8   :  { %v1816_v36 = vmul.f32 %v1811_v11, %v1787_v1 }
0x10da   :  { %1820 = vrot.lane.b32.xlu2 %v1816_v36, %s2570_s6  ;;  %v1842_v36 = vsel %vm2832_vm4, %v3063_v53, %v3005_v42 }
0x10df   :  { %v1813_v40 = vpop.permute.xlu1 %1812 }
0x10e0   :  { %v1817_v44 = vmul.f32 %v1813_v40, %v1802_v41  ;;  %v1843_v40 = vsel %vm2832_vm4, %v3075_v63, %v3007_v29 }
0x10e2   :  { %1822 = vrot.lane.b32.xlu0 %v1817_v44, %s2570_s6 }
0x1134   :  { %v1821_v58 = vpop.permute.xlu2 %1820 }
0x1135   :  { %v3127_v15 = vadd.f32 %v1821_v58, %v1806_v45 }
0x1137   :  { %2498 = vtanh.f32 %v3127_v15 }
0x1138   :  { %2500 = vtanh.f32 %v1105_v59 }
0x113d   :  { %v2499_v60 = vpop.eup %2498 }
0x113e   :  { %1832 = vrot.lane.b32.xlu1 %v2499_v60, %s2568_s23  ;;  %v2501_v43 = vpop.eup %2500 }
0x1146   :  { %1151 = vrot.lane.b32.xlu1 %v2501_v43, %s2568_s23 }
0x1154   :  { %v1823_v13 = vpop.permute.xlu0 %1822 }
0x1155   :  { %v3137_v10 = vadd.f32 %v1823_v13, %v1807_v8  ;;  %v2567_v8 = vld [vmem:[%s3304_s1] ss:$0 sm:$0xff] }
0x1157   :  { %2502 = vtanh.f32 %v3137_v10 }
0x1158   :  { %2504 = vtanh.f32 %v1106_v21 }
0x1159   :  { %2506 = vpow2.f32 %v2200_v31 }
0x115d   :  { %v2503_v48 = vpop.eup %2502 }
0x115e   :  { %1834 = vrot.lane.b32.xlu2 %v2503_v48, %s2568_s23  ;;  %v2505_v61 = vpop.eup %2504 }
0x115f   :  { %v2507_v9 = vpop.eup %2506 }
0x1160   :  { %v1113_v17 = vadd.f32 1.0, %v2507_v9 }
0x1162   :  { %2508 = vrcp.f32 %v1113_v17  ;;  %v1126_v52 = vand.u32 2147483648, %v1113_v17  ;;  %vm1120_vm0 = vweird.f32 %v1113_v17  ;;  %v1124_v62 = vand.u32 2147483647, %v1113_v17 }
0x1163   :  { %2510 = vpow2.f32 %v2201_v24 }
0x1164   :  { %v1127_v22 = vor.u32 1.1754944e-38, %v1126_v52  ;;  %vm1125_vm6 = vcmp.eq.f32.partialorder %v1124_v62, 8.507059e+37 }
0x1166   :  { %1153 = vrot.lane.b32.xlu2 %v2505_v61, %s2568_s23 }
0x1168   :  { %v2509_v18 = vpop.eup %2508 }
0x1169   :  { %v1116_v19 = vmul.f32 %v2509_v18, %v1113_v17  ;;  %vm1121_vm3 = vweird.f32 %v2509_v18  ;;  %v2511_v34 = vpop.eup %2510 }
0x116a   :  { %vm1122_vm5 = vmor %vm1120_vm0, %vm1121_vm3  ;;  %v1114_v35 = vadd.f32 1.0, %v2511_v34 }
0x116b   :  { %v1117_v5 = vsub.f32 1.0, %v1116_v19 }
0x116c   :  { %2512 = vrcp.f32 %v1114_v35  ;;  %v1141_v7 = vand.u32 2147483648, %v1114_v35  ;;  %vm1135_vm7 = vweird.f32 %v1114_v35  ;;  %v1139_v53 = vand.u32 2147483647, %v1114_v35 }
0x116d   :  { %v1118_v57 = vmul.f32 %v2509_v18, %v1117_v5 }
0x116e   :  { %v1142_v60 = vor.u32 1.1754944e-38, %v1141_v7  ;;  %vm1140_vm9 = vcmp.eq.f32.partialorder %v1139_v53, 8.507059e+37 }
0x116f   :  { %v1119_v39 = vadd.f32 %v2509_v18, %v1118_v57 }
0x1171   :  { %v1123_v20 = vsel %vm1122_vm5, %v2509_v18, %v1119_v39 }
0x1172   :  { %v3147_v23 = vsel %vm1125_vm6, %v1127_v22, %v1123_v20  ;;  %v2513_v11 = vpop.eup %2512 }
0x1173   :  { %vm1136_vm14 = vweird.f32 %v2513_v11 }
0x1174   :  { %vm1137_vm8 = vmor %vm1135_vm7, %vm1136_vm14 }
0x11b0   :  { %v1833_v51 = vpop.permute.xlu1 %1832 }
0x11b1   :  { %v3149_v33 = vmul.f32 %v1833_v51, %v1787_v1  ;;  %v1131_v1 = vmul.f32 %v2513_v11, %v1114_v35 }
0x11b3   :  { %v1132_v27 = vsub.f32 1.0, %v1131_v1 }
0x11b5   :  { %v1133_v46 = vmul.f32 %v2513_v11, %v1132_v27 }
0x11b7   :  { %v1134_v45 = vadd.f32 %v2513_v11, %v1133_v46 }
0x11b8   :  { %v1152_v25 = vpop.permute.xlu1 %1151  ;;  %v1835_v30 = vpop.permute.xlu2 %1834 }
0x11b9   :  { %v1157_v3 = vmul.f32 %v1152_v25, %v3147_v23  ;;  %v3152_v49 = vmul.f32 %v1835_v30, %v1802_v41  ;;  %v1138_v59 = vsel %vm1137_vm8, %v2513_v11, %v1134_v45 }
0x11ba   :  { %v3170_v2 = vsel %vm1140_vm9, %v1142_v60, %v1138_v59 }
0x11bb   :  { %v1844_v14 = vpack.c.bf16 %v3152_v49, %v3149_v33  ;;  %1161 = vrot.lane.b32.xlu2 %v1157_v3, %s2570_s6 }
0x11bd   :  { %1846 = vrot.lane.b32.xlu0 %v1844_v14, %s2570_s6 }
0x11c0   :  { %v1154_v43 = vpop.permute.xlu2 %1153 }
0x11c1   :  { %v1158_v29 = vmul.f32 %v1154_v43, %v3170_v2 }
0x1215   :  { %v1162_v27 = vpop.permute.xlu2 %1161 }
0x122f   :  { %v1847_v6 = vpop.permute.xlu0 %1846 }
0x1230   :  { %2270 = vmatmul.msk.bf16.vlgmr.msrb.gmra.mxu3 %vm154_vm1, %v1847_v6 }
0x12b3   :  { %v1860_v37 = vpop.f32.mrf.mxu3 }
0x12b4   :  { %v1865_v38 = vadd.f32 %v1860_v37, %v1842_v36  ;;  %v170_v36 = vadd.f32 %v2567_v8, %v2780_v56 }
0x12b6   :  { %v1867_v28 = vadd.f32 %v3068_v54, %v1865_v38 }
0x12b8   :  { %2514 = vtanh.f32 %v1867_v28  ;;  %v2271_v50 = vmul.f32 -1.442695, %v1867_v28 }
0x12bb   :  { %v1862_v41 = vpop.f32.mrf.mxu3 }
0x12bc   :  { %v1866_v44 = vadd.f32 %v1862_v41, %v1843_v40  ;;  %v1147_v40 = vmul.f32 %v3147_v23, %v3010_v32 }
0x12be   :  { %v2515_v58 = vpop.eup %2514  ;;  %v1868_v42 = vadd.f32 %v3068_v54, %v1866_v44  ;;  %v168_v54 = vadd.f32 %v2567_v8, %v2778_v55  ;;  %v1148_v44 = vmul.f32 %v3170_v2, %v3018_v12  ;;  %v1167_v56 = vadd.f32 %v1162_v27, %v1147_v40 }
0x12bf   :  { %1913 = vrot.lane.b32.xlu0 %v2515_v58, %s2568_s23 }
0x12c0   :  { %2516 = vtanh.f32 %v1868_v42  ;;  %v2272_v16 = vmul.f32 -1.442695, %v1868_v42  ;;  %v2131_v61 = vmul.f32 -1.442695, %v168_v54 }
0x12c1   :  { %2518 = vtanh.f32 %v168_v54 }
0x12c2   :  { %2520 = vpow2.f32 %v2271_v50 }
0x12c3   :  { %2522 = vpow2.f32 %v2272_v16 }
0x12c6   :  { %v2517_v63 = vpop.eup %2516 }
0x12c7   :  { %1915 = vrot.lane.b32.xlu1 %v2517_v63, %s2568_s23  ;;  %1163 = vrot.lane.b32.xlu0 %v1158_v29, %s2570_s6  ;;  %v2519_v13 = vpop.eup %2518 }
0x12c8   :  { %v2521_v21 = vpop.eup %2520 }
0x12c9   :  { %v1875_v48 = vadd.f32 1.0, %v2521_v21  ;;  %v2523_v31 = vpop.eup %2522  ;;  %v2308_v21 = vld [vmem:[%s3291_s18] ss:$0 sm:$0xff] }
0x12ca   :  { %v1876_v9 = vadd.f32 1.0, %v2523_v31 }
0x12cb   :  { %2524 = vrcp.f32 %v1875_v48  ;;  %v1888_v22 = vand.u32 2147483648, %v1875_v48  ;;  %vm1882_vm10 = vweird.f32 %v1875_v48  ;;  %v1886_v25 = vand.u32 2147483647, %v1875_v48 }
0x12cc   :  { %2526 = vpow2.f32 %v2131_v61  ;;  %v1903_v37 = vand.u32 2147483648, %v1876_v9  ;;  %vm1897_vm15 = vweird.f32 %v1876_v9  ;;  %v1901_v38 = vand.u32 2147483647, %v1876_v9 }
0x12cd   :  { %2528 = vrcp.f32 %v1876_v9  ;;  %v1889_v6 = vor.u32 1.1754944e-38, %v1888_v22  ;;  %vm1887_vm12 = vcmp.eq.f32.partialorder %v1886_v25, 8.507059e+37 }
0x12ce   :  { %v1904_v41 = vor.u32 1.1754944e-38, %v1903_v37  ;;  %vm1902_vm3 = vcmp.eq.f32.partialorder %v1901_v38, 8.507059e+37 }
0x12cf   :  { %214 = vrot.lane.b32.xlu0 %v2519_v13, %s2568_s23 }
0x12d1   :  { %v2525_v55 = vpop.eup %2524 }
0x12d2   :  { %v2527_v17 = vpop.eup %2526  ;;  %v1878_v18 = vmul.f32 %v2525_v55, %v1875_v48  ;;  %vm1883_vm4 = vweird.f32 %v2525_v55  ;;  %v2132_v48 = vmul.f32 -1.442695, %v170_v36 }
0x12d3   :  { %v178_v19 = vadd.f32 1.0, %v2527_v17  ;;  %v2529_v57 = vpop.eup %2528  ;;  %vm1884_vm11 = vmor %vm1882_vm10, %vm1883_vm4 }
0x12d4   :  { %v1879_v5 = vsub.f32 1.0, %v1878_v18  ;;  %v1893_v39 = vmul.f32 %v2529_v57, %v1876_v9  ;;  %vm1898_vm13 = vweird.f32 %v2529_v57 }
0x12d5   :  { %2530 = vrcp.f32 %v178_v19  ;;  %vm1899_vm2 = vmor %vm1897_vm15, %vm1898_vm13  ;;  %vm185_vm0 = vweird.f32 %v178_v19  ;;  %v191_v42 = vand.u32 2147483648, %v178_v19  ;;  %v189_v43 = vand.u32 2147483647, %v178_v19 }
0x12d6   :  { %v1880_v51 = vmul.f32 %v2525_v55, %v1879_v5  ;;  %v1894_v62 = vsub.f32 1.0, %v1893_v39  ;;  %2532 = vtanh.f32 %v170_v36  ;;  %v2309_v39 = vld [vmem:[%s3292_s17] ss:$0 sm:$0xff] }
0x12d7   :  { %v192_v32 = vor.u32 1.1754944e-38, %v191_v42  ;;  %vm190_vm14 = vcmp.eq.f32.partialorder %v189_v43, 8.507059e+37 }
0x12d8   :  { %v1881_v52 = vadd.f32 %v2525_v55, %v1880_v51  ;;  %v1895_v3 = vmul.f32 %v2529_v57, %v1894_v62 }
0x12da   :  { %v1885_v30 = vsel %vm1884_vm11, %v2525_v55, %v1881_v52  ;;  %v1896_v11 = vadd.f32 %v2529_v57, %v1895_v3 }
0x12db   :  { %v2531_v20 = vpop.eup %2530  ;;  %v3180_v34 = vsel %vm1887_vm12, %v1889_v6, %v1885_v30 }
0x12dc   :  { %v181_v14 = vmul.f32 %v2531_v20, %v178_v19  ;;  %v1900_v28 = vsel %vm1899_vm2, %v2529_v57, %v1896_v11  ;;  %vm186_vm5 = vweird.f32 %v2531_v20  ;;  %v2533_v29 = vpop.eup %2532  ;;  %v1909_v52 = vmul.f32 %v3180_v34, %v3127_v15 }
0x12dd   :  { %v3189_v58 = vsel %vm1902_vm3, %v1904_v41, %v1900_v28  ;;  %vm187_vm6 = vmor %vm185_vm0, %vm186_vm5 }
0x12de   :  { %v182_v1 = vsub.f32 1.0, %v181_v14  ;;  %v1910_v9 = vmul.f32 %v3189_v58, %v3137_v10 }
0x12e0   :  { %v183_v46 = vmul.f32 %v2531_v20, %v182_v1 }
0x12e2   :  { %v184_v60 = vadd.f32 %v2531_v20, %v183_v46 }
0x12e4   :  { %v188_v12 = vsel %vm187_vm6, %v2531_v20, %v184_v60 }
0x12e5   :  { %v193_v8 = vsel %vm190_vm14, %v192_v32, %v188_v12 }
0x1331   :  { %v1914_v24 = vpop.permute.xlu0 %1913 }
0x1332   :  { %v1919_v35 = vmul.f32 %v1914_v24, %v3180_v34 }
0x1334   :  { %1923 = vrot.lane.b32.xlu1 %v1919_v35, %s2570_s6 }
0x1339   :  { %v1916_v45 = vpop.permute.xlu1 %1915  ;;  %v1164_v7 = vpop.permute.xlu0 %1163 }
0x133a   :  { %v1920_v53 = vmul.f32 %v1916_v45, %v3189_v58  ;;  %v1168_v59 = vadd.f32 %v1164_v7, %v1148_v44 }
0x133c   :  { %2534 = vtanh.f32 %v1168_v59  ;;  %1925 = vrot.lane.b32.xlu2 %v1920_v53, %s2570_s6  ;;  %216 = vrot.lane.b32.xlu1 %v2533_v29, %s2568_s23 }
0x133d   :  { %2536 = vtanh.f32 %v1167_v56 }
0x1341   :  { %v215_v63 = vpop.permute.xlu0 %214 }
0x1342   :  { %v2535_v54 = vpop.eup %2534  ;;  %v220_v13 = vmul.f32 %v215_v63, %v193_v8 }
0x1343   :  { %v2537_v50 = vpop.eup %2536  ;;  %1175 = vrot.lane.b32.xlu0 %v2535_v54, %s2568_s23 }
0x1344   :  { %2538 = vtanh.f32 %v220_v13  ;;  %1173 = vrot.lane.b32.xlu2 %v2537_v50, %s2568_s23 }
0x1345   :  { %2540 = vpow2.f32 %v2132_v48 }
0x134a   :  { %v2539_v16 = vpop.eup %2538 }
0x134b   :  { %226 = vrot.lane.b32.xlu0 %v2539_v16, %s2569_s24  ;;  %v2541_v61 = vpop.eup %2540 }
0x134c   :  { %v179_v31 = vadd.f32 1.0, %v2541_v61 }
0x134e   :  { %2542 = vrcp.f32 %v179_v31  ;;  %vm200_vm7 = vweird.f32 %v179_v31  ;;  %v206_v62 = vand.u32 2147483648, %v179_v31  ;;  %v204_v25 = vand.u32 2147483647, %v179_v31 }
0x1350   :  { %v207_v30 = vor.u32 1.1754944e-38, %v206_v62  ;;  %vm205_vm4 = vcmp.eq.f32.partialorder %v204_v25, 8.507059e+37 }
0x1353   :  { %1970 = vrot.lane.b32.xlu0 %v2308_v21, %s2569_s24 }
0x1354   :  { %v2543_v18 = vpop.eup %2542 }
0x1355   :  { %v196_v19 = vmul.f32 %v2543_v18, %v179_v31  ;;  %vm201_vm8 = vweird.f32 %v2543_v18 }
0x1356   :  { %vm202_vm9 = vmor %vm200_vm7, %vm201_vm8 }
0x1357   :  { %v197_v57 = vsub.f32 1.0, %v196_v19 }
0x1359   :  { %v198_v51 = vmul.f32 %v2543_v18, %v197_v57 }
0x135b   :  { %v199_v22 = vadd.f32 %v2543_v18, %v198_v51 }
0x135d   :  { %v203_v3 = vsel %vm202_vm9, %v2543_v18, %v199_v22 }
0x135e   :  { %v208_v6 = vsel %vm205_vm4, %v207_v30, %v203_v3 }
0x1396   :  { %v1926_v55 = vpop.permute.xlu2 %1925 }
0x1397   :  { %v1930_v17 = vadd.f32 %v1926_v55, %v1910_v9 }
0x1399   :  { %2544 = vtanh.f32 %v1930_v17 }
0x139e   :  { %v1174_v41 = vpop.permute.xlu2 %1173 }
0x139f   :  { %v2545_v5 = vpop.eup %2544  ;;  %v1179_v53 = vmul.f32 %v1174_v41, %v3147_v23 }
0x13a0   :  { %1937 = vrot.lane.b32.xlu2 %v2545_v5, %s2568_s23 }
0x13a1   :  { %v1181_v32 = vadd.f32 %v1179_v53, %v3026_v0 }
0x13a3   :  { %v3240_v23 = vmul.f32 0.25, %v1181_v32 }
0x13a6   :  { %v1924_v10 = vpop.permute.xlu1 %1923 }
0x13a7   :  { %v1929_v20 = vadd.f32 %v1924_v10, %v1909_v52 }
0x13a8   :  { %1949 = vrot.lane.b32.xlu2 %v2309_v39, %s2569_s24 }
0x13a9   :  { %2546 = vtanh.f32 %v1929_v20 }
0x13ae   :  { %v217_v14 = vpop.permute.xlu1 %216 }
0x13af   :  { %v2547_v24 = vpop.eup %2546  ;;  %v221_v35 = vmul.f32 %v217_v14, %v208_v6 }
0x13b0   :  { %1935 = vrot.lane.b32.xlu1 %v2547_v24, %s2568_s23 }
0x13b1   :  { %2548 = vtanh.f32 %v221_v35 }
0x13b5   :  { %v1176_v15 = vpop.permute.xlu0 %1175 }
0x13b6   :  { %v1180_v36 = vmul.f32 %v1176_v15, %v3170_v2 }
0x13b7   :  { %v2549_v11 = vpop.eup %2548 }
0x13b8   :  { %228 = vrot.lane.b32.xlu1 %v2549_v11, %s2569_s24  ;;  %v1182_v28 = vadd.f32 %v1180_v36, %v3031_v26  ;;  %v1840_v26 = vadd.f32 %v3149_v33, %v3110_v47  ;;  %v1841_v47 = vadd.f32 %v3152_v49, %v3113_v4 }
0x13ba   :  { %v3218_v46 = vmul.f32 0.25, %v1182_v28 }
0x13bd   :  { %v227_v1 = vpop.permute.xlu0 %226 }
0x13be   :  { %v3213_v37 = vmul.f32 %v227_v1, %v193_v8 }
0x13c5   :  { %v1971_v38 = vpop.permute.xlu0 %1970 }
0x13c6   :  { %v1973_v27 = vmul.f32 %v1971_v38, %v3213_v37  ;;  %v1998_v40 = vmul.f32 %v1971_v38, %v3218_v46  ;;  %v1997_v63 = vmul.f32 %v1971_v38, %v3240_v23 }
0x13c8   :  { %1977 = vrot.lane.b32.xlu0 %v1973_v27, %s2570_s6 }
0x13d0   :  { %2003 = vrot.lane.b32.xlu0 %v1998_v40, %s2570_s6 }
0x13fa   :  { %v1938_v44 = vpop.permute.xlu2 %1937 }
0x1402   :  { %v1950_v56 = vpop.permute.xlu2 %1949 }
0x1403   :  { %v1952_v2 = vmul.f32 %v1950_v56, %v3213_v37 }
0x1405   :  { %1956 = vrot.lane.b32.xlu1 %v1952_v2, %s2570_s6 }
0x1422   :  { %v1936_v45 = vpop.permute.xlu1 %1935 }
0x1423   :  { %v1941_v7 = vmul.f32 %v1936_v45, %v3180_v34  ;;  %v1942_v34 = vmul.f32 %v1938_v44, %v3189_v58 }
0x1425   :  { %v1943_v60 = vadd.f32 %v1941_v7, %v1840_v26  ;;  %v1944_v33 = vadd.f32 %v1942_v34, %v1841_v47 }
0x1427   :  { %v3236_v12 = vmul.f32 0.33333334, %v1943_v60  ;;  %v3246_v0 = vmul.f32 0.33333334, %v1944_v33 }
0x1429   :  { %v2021_v8 = vmul.f32 %v1971_v38, %v3236_v12  ;;  %v2022_v58 = vmul.f32 %v1971_v38, %v3246_v0 }
0x142a   :  { %v229_v42 = vpop.permute.xlu1 %228 }
0x142b   :  { %v3228_v59 = vmul.f32 %v229_v42, %v208_v6 }
0x142d   :  { %v1953_v43 = vmul.f32 %v1950_v56, %v3228_v59  ;;  %v1974_v29 = vmul.f32 %v1971_v38, %v3228_v59 }
0x142f   :  { %1958 = vrot.lane.b32.xlu2 %v1953_v43, %s2570_s6  ;;  %1979 = vrot.lane.b32.xlu1 %v1974_v29, %s2570_s6 }
0x1437   :  { %2001 = vrot.lane.b32.xlu2 %v1997_v63, %s2570_s6  ;;  %2025 = vrot.lane.b32.xlu1 %v2021_v8, %s2570_s6 }
0x143a   :  { %v1978_v54 = vpop.permute.xlu0 %1977 }
0x143b   :  { %v1983_v4 = vsel %vm154_vm1, %v1978_v54, 0.0 }
0x143f   :  { %2027 = vrot.lane.b32.xlu2 %v2022_v58, %s2570_s6 }
0x1442   :  { %v2004_v21 = vpop.permute.xlu0 %2003 }
0x1443   :  { %v2010_v31 = vsel %vm154_vm1, %v2004_v21, 0.0 }
0x1468   :  { %1984 = vadd.xlane.f32.xlu2 %v1983_v4 }
0x1477   :  { %v1957_v49 = vpop.permute.xlu1 %1956 }
0x1478   :  { %v1962_v13 = vsel %vm154_vm1, %v1957_v49, 0.0 }
0x1479   :  { %1963 = vadd.xlane.f32.xlu0 %v1962_v13 }
0x1489   :  { %v1959_v50 = vpop.permute.xlu2 %1958 }
0x148a   :  { %v1965_v16 = vsel %vm154_vm1, %v1959_v50, 0.0 }
0x148b   :  { %1966 = vadd.xlane.f32.xlu1 %v1965_v16 }
0x1491   :  { %v2002_v48 = vpop.permute.xlu2 %2001 }
0x1492   :  { %v2007_v61 = vsel %vm154_vm1, %v2002_v48, 0.0 }
0x1493   :  { %2008 = vadd.xlane.f32.xlu0 %v2007_v61  ;;  %2011 = vadd.xlane.f32.xlu1 %v2010_v31 }
0x1499   :  { %v2028_v9 = vpop.permute.xlu2 %2027 }
0x149a   :  { %v2034_v55 = vsel %vm154_vm1, %v2028_v9, 0.0 }
0x149b   :  { %2035 = vadd.xlane.f32.xlu0 %v2034_v55 }
0x14a1   :  { %v1980_v17 = vpop.permute.xlu1 %1979 }
0x14a2   :  { %v1986_v18 = vsel %vm154_vm1, %v1980_v17, 0.0 }
0x14a3   :  { %1987 = vadd.xlane.f32.xlu2 %v1986_v18 }
0x14a9   :  { %v2026_v19 = vpop.permute.xlu1 %2025 }
0x14aa   :  { %v2031_v5 = vsel %vm154_vm1, %v2026_v19, 0.0 }
0x14ab   :  { %2032 = vadd.xlane.f32.xlu2 %v2031_v5 }
0x14db   :  { %v1985_v52 = vpop.xlane.xlu2 %1984 }
0x14ec   :  { %v1964_v57 = vpop.xlane.xlu0 %1963 }
0x14ed   :  { %v1989_v6 = vadd.f32 %v1985_v52, %v1964_v57 }
0x14ef   :  { %v1993_v38 = vmul.f32 0.01, %v1989_v6  ;;  %vm1991_vm15 = vcmp.gt.f32.partialorder %v1989_v6, 0.0 }
0x14f1   :  { %v1995_v7 = vsel %vm1991_vm15, %v1989_v6, %v1993_v38 }
0x14fe   :  { %v1967_v51 = vpop.xlane.xlu1 %1966 }
0x1506   :  { %v2009_v39 = vpop.xlane.xlu0 %2008  ;;  %v2012_v10 = vpop.xlane.xlu1 %2011 }
0x1507   :  { %v2014_v20 = vadd.f32 %v2012_v10, %v1967_v51  ;;  %v2013_v3 = vadd.f32 %v2009_v39, %v1964_v57 }
0x1509   :  { %v2018_v30 = vmul.f32 0.01, %v2014_v20  ;;  %vm2016_vm10 = vcmp.gt.f32.partialorder %v2014_v20, 0.0  ;;  %v2017_v11 = vmul.f32 0.01, %v2013_v3  ;;  %vm2015_vm13 = vcmp.gt.f32.partialorder %v2013_v3, 0.0 }
0x150b   :  { %v2020_v15 = vsel %vm2016_vm10, %v2014_v20, %v2018_v30  ;;  %v2019_v41 = vsel %vm2015_vm13, %v2013_v3, %v2017_v11 }
0x150c   :  { %v2045_v26 = vmax.f32 %v1995_v7, %v2019_v41 }
0x150e   :  { %v2036_v62 = vpop.xlane.xlu0 %2035 }
0x150f   :  { %v2038_v22 = vadd.f32 %v2036_v62, %v1967_v51 }
0x1511   :  { %v2042_v24 = vmul.f32 0.01, %v2038_v22  ;;  %vm2040_vm12 = vcmp.gt.f32.partialorder %v2038_v22, 0.0 }
0x1513   :  { %v2044_v27 = vsel %vm2040_vm12, %v2038_v22, %v2042_v24 }
0x1516   :  { %v1988_v25 = vpop.xlane.xlu2 %1987 }
0x1517   :  { %v1990_v14 = vadd.f32 %v1988_v25, %v1967_v51 }
0x1519   :  { %vm1992_vm11 = vcmp.gt.f32.partialorder %v1990_v14, 0.0  ;;  %v1994_v35 = vmul.f32 0.01, %v1990_v14 }
0x151b   :  { %v1996_v1 = vsel %vm1992_vm11, %v1990_v14, %v1994_v35 }
0x151c   :  { %v2046_v36 = vmax.f32 %v1996_v1, %v2020_v15 }
0x151e   :  { %v2048_v28 = vmax.f32 %v2046_v36, %v2044_v27  ;;  %v2033_v40 = vpop.xlane.xlu2 %2032 }
0x151f   :  { %v2037_v44 = vadd.f32 %v2033_v40, %v1964_v57 }
0x1520   :  { %v2050_v56 = vsub.f32 %v1996_v1, %v2048_v28  ;;  %v2056_v2 = vsub.f32 %v2020_v15, %v2048_v28  ;;  %v2062_v45 = vsub.f32 %v2044_v27, %v2048_v28 }
0x1521   :  { %vm2039_vm2 = vcmp.gt.f32.partialorder %v2037_v44, 0.0  ;;  %v2041_v42 = vmul.f32 0.01, %v2037_v44 }
0x1522   :  { %v2053_v53 = vmul.f32 1.442695, %v2050_v56  ;;  %v2059_v60 = vmul.f32 1.442695, %v2056_v2  ;;  %v2065_v43 = vmul.f32 1.442695, %v2062_v45 }
0x1523   :  { %v2043_v29 = vsel %vm2039_vm2, %v2037_v44, %v2041_v42 }
0x1524   :  { %2550 = vpow2.f32 %v2053_v53  ;;  %v2047_v32 = vmax.f32 %v2045_v26, %v2043_v29 }
0x1525   :  { %2552 = vpow2.f32 %v2059_v60 }
0x1526   :  { %v2049_v34 = vsub.f32 %v1995_v7, %v2047_v32  ;;  %v2055_v47 = vsub.f32 %v2019_v41, %v2047_v32  ;;  %v2061_v33 = vsub.f32 %v2043_v29, %v2047_v32  ;;  %2554 = vpow2.f32 %v2065_v43 }
0x1528   :  { %v2051_v63 = vmul.f32 1.442695, %v2049_v34  ;;  %v2057_v8 = vmul.f32 1.442695, %v2055_v47  ;;  %v2063_v58 = vmul.f32 1.442695, %v2061_v33 }
0x152a   :  { %v2551_v54 = vpop.eup %2550  ;;  %2556 = vpow2.f32 %v2051_v63 }
0x152b   :  { %v2553_v4 = vpop.eup %2552  ;;  %2558 = vpow2.f32 %v2057_v8 }
0x152c   :  { %v2068_v49 = vadd.f32 %v2553_v4, %v2551_v54  ;;  %v2555_v13 = vpop.eup %2554  ;;  %2560 = vpow2.f32 %v2063_v58 }
0x152e   :  { %v2070_v50 = vadd.f32 %v2555_v13, %v2068_v49 }
0x1530   :  { %v2557_v16 = vpop.eup %2556  ;;  %2562 = vrcp.f32 %v2070_v50 }
0x1531   :  { %v2559_v21 = vpop.eup %2558 }
0x1532   :  { %v2067_v48 = vadd.f32 %v2559_v21, %v2557_v16  ;;  %v2561_v61 = vpop.eup %2560 }
0x1534   :  { %v2069_v31 = vadd.f32 %v2561_v61, %v2067_v48 }
0x1536   :  { %v2563_v9 = vpop.eup %2562  ;;  %2564 = vrcp.f32 %v2069_v31 }
0x1537   :  { %v2074_v55 = vmul.f32 %v2563_v9, %v2551_v54  ;;  %v2080_v17 = vmul.f32 %v2563_v9, %v2553_v4  ;;  %v2086_v18 = vmul.f32 %v2563_v9, %v2555_v13 }
0x1539   :  { %v2076_v19 = vmul.f32 %v2074_v55, %v3228_v59  ;;  %v2082_v5 = vmul.f32 %v2080_v17, %v3218_v46  ;;  %v2088_v51 = vmul.f32 %v2086_v18, %v3246_v0 }
0x153b   :  { %v2084_v57 = vadd.f32 %v2082_v5, %v2076_v19 }
0x153c   :  { %v2565_v39 = vpop.eup %2564 }
0x153d   :  { %v2090_v52 = vadd.f32 %v2088_v51, %v2084_v57  ;;  %v2073_v10 = vmul.f32 %v2565_v39, %v2557_v16  ;;  %v2079_v62 = vmul.f32 %v2565_v39, %v2559_v21  ;;  %v2085_v20 = vmul.f32 %v2565_v39, %v2561_v61 }
0x153f   :  { %2095 = vrot.lane.b32.xlu2 %v2090_v52, %s2570_s6  ;;  %v2075_v22 = vmul.f32 %v2073_v10, %v3213_v37  ;;  %v2081_v25 = vmul.f32 %v2079_v62, %v3240_v23  ;;  %v2087_v3 = vmul.f32 %v2085_v20, %v3236_v12 }
0x1541   :  { %v2083_v30 = vadd.f32 %v2081_v25, %v2075_v22 }
0x1543   :  { %v2089_v59 = vadd.f32 %v2087_v3, %v2083_v30 }
0x1545   :  { %2093 = vrot.lane.b32.xlu1 %v2089_v59, %s2570_s6 }
0x1599   :  { %v2096_v46 = vpop.permute.xlu2 %2095 }
0x159a   :  { %2100 = vst.msk [vmem:[%s3293_s19 + $0x8] sm:$0xff] %vm154_vm1, %v2096_v46 }
0x15b7   :  { %v2094_v0 = vpop.permute.xlu1 %2093 }
0x15b8   :  { %2099 = vst.msk [vmem:[%s3293_s19] sm:$0xff] %vm154_vm1, %v2094_v0 }

</bundles_post_ra>
